<compile_context>
chip_gen: v5e
topology: v5e:2x2
jax: 0.10.0
libtpu: 0.0.40
codegen_flags: <defaults>
</compile_context>

<pallas_src>
import functools

import jax
import jax.numpy as jnp
from jax.experimental import pallas as pl
from jax.experimental.pallas import tpu as pltpu

N32 = 2048          # hidden width fixed in the module
BN_EPS = 1e-5
N_LAYERS = 3


# --------------------------------------------------------------------- hw capability probes

def _device_kind():
    try:
        return jax.devices()[0].device_kind.lower()
    except Exception:
        return ""


@functools.lru_cache(maxsize=None)
def _vmem_capacity_bytes():
    """Physical per-core VMEM capacity (generation-aware)."""
    try:
        cap = getattr(pltpu.get_tpu_info(), "vmem_capacity_bytes", None)
        if cap:
            return int(cap)
    except Exception:
        pass
    # Fallback on device kind: v7x has 64 MiB/TC, earlier generations 128 MiB.
    return (64 << 20) if "v7" in _device_kind() else (128 << 20)


@functools.lru_cache(maxsize=None)
def _has_bf16_vpu():
    """v6e/v7x have native bf16 VPU ops; v5e and older do not."""
    kind = _device_kind()
    return not any(t in kind for t in ("v2", "v3", "v4", "v5"))


@functools.lru_cache(maxsize=None)
def _min_grid_steps():
    """v7x has 2 TensorCores/chip: keep >=4 'parallel' grid steps when B allows so the
    batch axis shards across both cores with some load-balance slack."""
    return 4 if "v7" in _device_kind() else 1


# ----------------------------------------------------------------------------------- kernel

def residual_mlp_kernel(x_ref, w_ref, W1_ref, c1_ref, W2_ref, c2_ref, o_ref):
    """One batch tile: per-feature scale + 3 residual MLP blocks.

    BatchNorm (eval, running stats) and the linear bias are pre-folded into W1/c1,
    W2/c2 on the host, so each block is: relu(x @ W1' + c1) @ W2' + c2, residual add.
    Residual stream is kept in f32; both matmuls accumulate in f32 on the MXU.
    The matmul-1 epilogue (bias + ReLU over the (TB, 2048) hidden) runs in c1's
    dtype: bf16 on v6e/v7x (packed VPU -> ~2x elementwise throughput), f32 on v5e.
    """
    wdt = W1_ref.dtype          # MXU input dtype (bf16)
    edt = c1_ref.dtype          # epilogue dtype (bf16 on v6e/v7x, f32 on v5e)

    x = x_ref[...] * w_ref[...]                      # (TB, n_in) f32

    for l in range(N_LAYERS):                         # static unroll over the 3 blocks
        # Linear1 (+ folded BN1 affine): n_in -> n32, then ReLU.
        h = jnp.dot(x.astype(wdt), W1_ref[l],
                    preferred_element_type=jnp.float32)
        h = jnp.maximum(h.astype(edt) + c1_ref[l], 0).astype(wdt)
        # Linear2 (+ folded BN2 affine): n32 -> n_in, residual add in f32.
        y = jnp.dot(h, W2_ref[l],
                    preferred_element_type=jnp.float32) + c2_ref[l]
        x = x + y
        if l < N_LAYERS - 1:                          # activation_last=None on block 3
            x = jnp.maximum(x, 0.0)

    o_ref[...] = x.astype(o_ref.dtype)


# ---------------------------------------------------------------------------------- wrapper

def _round_up(a, m):
    return ((a + m - 1) // m) * m


def _cdiv(a, b):
    return -(-a // b)


# Whole-array VMEM-resident operand (no blocking, no per-step DMA, single copy).
_VMEM_SPEC = pl.BlockSpec(memory_space=pltpu.MemorySpace.VMEM)


def _pick_tile(B, tb_max):
    """Even-splitting batch tile: ceil(B / n_tiles) rounded up to 8 rows, with n_tiles
    chosen so tiles are <= tb_max and (on v7x) the grid has enough steps for 2 TCs."""
    n_tiles = _cdiv(B, tb_max)
    n_tiles = max(n_tiles, _min_grid_steps())
    n_tiles = min(n_tiles, _cdiv(B, 8))       # keep every tile >= 8 rows
    n_tiles = max(n_tiles, 1)
    tb_eff = _round_up(_cdiv(B, n_tiles), 8)
    Bp = _round_up(B, tb_eff)
    return tb_eff, Bp


def _forward_impl(x, fp, *, tb):
    B, n_in = x.shape
    assert n_in % 128 == 0, "n_in must be a multiple of 128 (TPU lane width)"
    # TODO(synk): with n_in=128 both matmuls half-fill the 256x256 MXU on v6e/v7x
    # (K or N = 128); choose n_in as a multiple of 256 there if the model permits.

    tb_eff, Bp = _pick_tile(B, tb)
    if Bp != B:
        x = jnp.pad(x, ((0, Bp - B), (0, 0)))

    # Resident-VMEM estimate -> explicit, generation-aware scoped limit.
    weight_bytes = sum(int(v.size) * v.dtype.itemsize for v in fp.values())
    io_bytes = 2 * 2 * tb_eff * n_in * 4               # x + out tiles, double-buffered, f32
    act_bytes = 3 * tb_eff * N32 * 4                   # hidden-activation headroom
    est = weight_bytes + io_bytes + act_bytes
    cap = int(_vmem_capacity_bytes() * 0.85)           # headroom for internal scratch / DMA
    vmem_limit = max(16 << 20, min(cap, max(32 << 20, int(1.5 * est))))

    out = pl.pallas_call(
        residual_mlp_kernel,
        out_shape=jax.ShapeDtypeStruct((Bp, n_in), jnp.float32),
        grid_spec=pltpu.PrefetchScalarGridSpec(
            num_scalar_prefetch=0,
            grid=(Bp // tb_eff,),
            in_specs=[
                pl.BlockSpec((tb_eff, n_in), lambda i: (i, 0)),   # x (pipelined tiles)
                _VMEM_SPEC,                                        # w   (per-feature scale)
                _VMEM_SPEC,                                        # W1' (BN1-folded, bf16)
                _VMEM_SPEC,                                        # c1  (folded bias)
                _VMEM_SPEC,                                        # W2' (BN2-folded, bf16)
                _VMEM_SPEC,                                        # c2  (folded bias)
            ],
            out_specs=pl.BlockSpec((tb_eff, n_in), lambda i: (i, 0)),
        ),
        compiler_params=pltpu.CompilerParams(
            dimension_semantics=("parallel",),
            vmem_limit_bytes=vmem_limit,
        ),
    )(x, fp["w"], fp["W1"], fp["c1"], fp["W2"], fp["c2"])

    return out[:B]


def model_forward(x, fparams, *, tb=1024):
    """x: (B, n_in) f32.  fparams: output of prepare_params()."""
    return _forward_impl(x, fparams, tb=tb)


# ----------------------------------------------------------------------------------- params

def init_raw_params(key, n_in, w_init=1.0):
    """Matches Model.__init__ / weights_init:
       Linear.weight ~ N(0, 0.2), Linear.bias = 0,
       BN.weight ~ N(0, 0.2),     BN.bias = 0,
       BN running_mean = 0, running_var = 1,  w = w_init.
    Linear weights are stored (in, out) so the kernel computes x @ W on the MXU."""
    k1, k2, k3, k4 = jax.random.split(key, 4)
    L = N_LAYERS
    z = lambda *s: jnp.zeros(s, jnp.float32)
    return {
        "w":   jnp.full((n_in,), w_init, dtype=jnp.float32),
        "W1":  0.2 * jax.random.normal(k1, (L, n_in, N32), dtype=jnp.float32),
        "b1":  z(L, 1, N32),
        "g1":  0.2 * jax.random.normal(k2, (L, 1, N32), dtype=jnp.float32),
        "be1": z(L, 1, N32),
        "rm1": z(L, 1, N32),
        "rv1": jnp.ones((L, 1, N32), jnp.float32),
        "W2":  0.2 * jax.random.normal(k3, (L, N32, n_in), dtype=jnp.float32),
        "b2":  z(L, 1, n_in),
        "g2":  0.2 * jax.random.normal(k4, (L, 1, n_in), dtype=jnp.float32),
        "be2": z(L, 1, n_in),
        "rm2": z(L, 1, n_in),
        "rv2": jnp.ones((L, 1, n_in), jnp.float32),
    }


def prepare_params(raw, weight_dtype=jnp.bfloat16, bf16_epilogue=None):
    """Fold eval-mode BatchNorm (running stats) and the linear bias into the linear
    weights once on the host:
        bn(v) = (v - rm) / sqrt(rv + eps) * g + be  =  v * s + (be - rm * s)
        bn(x @ W + b) = x @ (W * s) + ((b - rm) * s + be)
    c1 is stored in bf16 on chips with a native bf16 VPU (v6e/v7x) so the (TB, 2048)
    bias+ReLU epilogue runs packed; f32 otherwise (v5e)."""
    if bf16_epilogue is None:
        bf16_epilogue = _has_bf16_vpu() and weight_dtype == jnp.bfloat16
    c1_dtype = jnp.bfloat16 if bf16_epilogue else jnp.float32

    s1 = raw["g1"] / jnp.sqrt(raw["rv1"] + BN_EPS)          # (L, 1, N32)
    c1 = (raw["b1"] - raw["rm1"]) * s1 + raw["be1"]
    W1 = (raw["W1"] * s1).astype(weight_dtype)              # (L, n_in, N32)

    s2 = raw["g2"] / jnp.sqrt(raw["rv2"] + BN_EPS)          # (L, 1, n_in)
    c2 = (raw["b2"] - raw["rm2"]) * s2 + raw["be2"]
    W2 = (raw["W2"] * s2).astype(weight_dtype)              # (L, N32, n_in)

    return {
        "w":  raw["w"].reshape(1, -1).astype(jnp.float32),
        "W1": W1, "c1": c1.astype(c1_dtype),
        "W2": W2, "c2": c2.astype(jnp.float32),
    }


# -------------------------------------------------------------------------------- references

def reference_forward(x, fp):
    """Pure-JAX reference of the folded forward pass (same dtypes / op order as kernel)."""
    wdt = fp["W1"].dtype
    edt = fp["c1"].dtype
    y = x * fp["w"]
    for l in range(N_LAYERS):
        h = jnp.dot(y.astype(wdt), fp["W1"][l], preferred_element_type=jnp.float32)
        h = jnp.maximum(h.astype(edt) + fp["c1"][l], 0).astype(wdt)
        r = jnp.dot(h, fp["W2"][l], preferred_element_type=jnp.float32) + fp["c2"][l]
        y = y + r
        if l < N_LAYERS - 1:
            y = jnp.maximum(y, 0.0)
    return y


def reference_forward_f32(x, raw):
    """Full-precision, unfolded reference matching the original PyTorch eval forward
    (explicit BN, no bf16). Used to bound bf16 weight-quantization drift."""
    def bn(v, g, be, rm, rv):
        return (v - rm) / jnp.sqrt(rv + BN_EPS) * g + be
    y = x * raw["w"]
    for l in range(N_LAYERS):
        h = y @ raw["W1"][l] + raw["b1"][l]
        h = jnp.maximum(bn(h, raw["g1"][l], raw["be1"][l], raw["rm1"][l], raw["rv1"][l]), 0.0)
        r = h @ raw["W2"][l] + raw["b2"][l]
        r = bn(r, raw["g2"][l], raw["be2"][l], raw["rm2"][l], raw["rv2"][l])
        y = y + r
        if l < N_LAYERS - 1:
            y = jnp.maximum(y, 0.0)
    return y


# -------------------------------------------------------------------------------------- demo

if __name__ == "__main__":
    key = jax.random.PRNGKey(0)
    kx1, kx2, kp = jax.random.split(key, 3)

    n_in = 128
    raw = init_raw_params(kp, n_in, w_init=1.0)
    fparams = prepare_params(raw)          # BN-folded, bf16 weights

    # Small batch (single tile, padding-free path).
    x1 = jax.random.normal(kx1, (8, n_in), dtype=jnp.float32)
    out1 = jax.block_until_ready(model_forward(x1, fparams))
    ref1 = reference_forward(x1, fparams)
    assert out1.shape == x1.shape
    assert jnp.allclose(out1, ref1, atol=5e-3, rtol=5e-3)

    # Larger batch exercising the even-split tile selection (384 -> 1x384 or 4x96 on v7x).
    x2 = jax.random.normal(kx2, (384, n_in), dtype=jnp.float32)
    out2 = jax.block_until_ready(model_forward(x2, fparams))
    ref2 = reference_forward(x2, fparams)
    assert out2.shape == x2.shape
    assert jnp.allclose(out2, ref2, atol=5e-3, rtol=5e-3)

    # Loose-tolerance check against the unfolded f32 reference (bounds bf16 drift).
    ref2_f32 = reference_forward_f32(x2, raw)
    scale = jnp.max(jnp.abs(ref2_f32)) + 1e-6
    assert float(jnp.max(jnp.abs(out2 - ref2_f32)) / scale) < 0.05

    print("KERNEL_OK")
</pallas_src>

<mosaic_0001>
module attributes {stable_mosaic.version = 11 : i64} {
  func.func @residual_mlp_kernel(%arg0: i32, %arg1: memref<8x128xf32, #tpu.memory_space<vmem>>, %arg2: memref<1x128xf32, #tpu.memory_space<vmem>>, %arg3: memref<3x128x2048xbf16, #tpu.memory_space<vmem>>, %arg4: memref<3x1x2048xbf16, #tpu.memory_space<vmem>>, %arg5: memref<3x2048x128xbf16, #tpu.memory_space<vmem>>, %arg6: memref<3x1x128xf32, #tpu.memory_space<vmem>>, %arg7: memref<8x128xf32, #tpu.memory_space<vmem>>) attributes {dimension_semantics = [#tpu.dimension_semantics<parallel>], iteration_bounds = array<i64: 1>, scalar_prefetch = 0 : i64, scratch_operands = 0 : i64, tpu.core_type = #tpu.core_type<tc>, window_params = [{transform_indices = @transform_0, window_bounds = array<i64: 8, 128>}, {pipeline_mode = #tpu.pipeline_mode<synchronous>, transform_indices = @transform_1, window_bounds = array<i64: 1, 128>}, {pipeline_mode = #tpu.pipeline_mode<synchronous>, transform_indices = @transform_2, window_bounds = array<i64: 3, 128, 2048>}, {pipeline_mode = #tpu.pipeline_mode<synchronous>, transform_indices = @transform_3, window_bounds = array<i64: 3, 1, 2048>}, {pipeline_mode = #tpu.pipeline_mode<synchronous>, transform_indices = @transform_4, window_bounds = array<i64: 3, 2048, 128>}, {pipeline_mode = #tpu.pipeline_mode<synchronous>, transform_indices = @transform_5, window_bounds = array<i64: 3, 1, 128>}, {transform_indices = @transform_6, window_bounds = array<i64: 8, 128>}]} {
    %c0 = arith.constant 0 : index
    %c0_0 = arith.constant 0 : index
    %0 = vector.load %arg1[%c0, %c0_0] : memref<8x128xf32, #tpu.memory_space<vmem>>, vector<8x128xf32>
    %c0_1 = arith.constant 0 : index
    %c0_2 = arith.constant 0 : index
    %1 = vector.load %arg2[%c0_1, %c0_2] : memref<1x128xf32, #tpu.memory_space<vmem>>, vector<1x128xf32>
    %2 = vector.broadcast %1 : vector<1x128xf32> to vector<8x128xf32>
    %3 = arith.mulf %0, %2 : vector<8x128xf32>
    %4 = arith.truncf %3 : vector<8x128xf32> to vector<8x128xbf16>
    %c0_3 = arith.constant 0 : index
    %c0_4 = arith.constant 0 : index
    %c0_5 = arith.constant 0 : index
    %5 = vector.load %arg3[%c0_3, %c0_4, %c0_5] : memref<3x128x2048xbf16, #tpu.memory_space<vmem>>, vector<1x128x2048xbf16>
    %6 = vector.shape_cast %5 : vector<1x128x2048xbf16> to vector<128x2048xbf16>
    %cst = arith.constant dense<0.000000e+00> : vector<8x2048xf32>
    %7 = tpu.matmul %4, %6, %cst {dimension_numbers = #tpu.dot_dimension_numbers<[1], [0], [0], [1], [0, 0, 1, 1], [], []>} : vector<8x128xbf16>, vector<128x2048xbf16>, vector<8x2048xf32> -> vector<8x2048xf32>
    %8 = arith.truncf %7 : vector<8x2048xf32> to vector<8x2048xbf16>
    %c0_6 = arith.constant 0 : index
    %c0_7 = arith.constant 0 : index
    %c0_8 = arith.constant 0 : index
    %9 = vector.load %arg4[%c0_6, %c0_7, %c0_8] : memref<3x1x2048xbf16, #tpu.memory_space<vmem>>, vector<1x1x2048xbf16>
    %10 = vector.shape_cast %9 : vector<1x1x2048xbf16> to vector<1x2048xbf16>
    %11 = vector.broadcast %10 : vector<1x2048xbf16> to vector<8x2048xbf16>
    %12 = arith.addf %8, %11 : vector<8x2048xbf16>
    %cst_9 = arith.constant 0.000000e+00 : bf16
    %13 = vector.broadcast %cst_9 : bf16 to vector<8x2048xbf16>
    %14 = arith.maximumf %12, %13 : vector<8x2048xbf16>
    %c0_10 = arith.constant 0 : index
    %c0_11 = arith.constant 0 : index
    %c0_12 = arith.constant 0 : index
    %15 = vector.load %arg5[%c0_10, %c0_11, %c0_12] : memref<3x2048x128xbf16, #tpu.memory_space<vmem>>, vector<1x2048x128xbf16>
    %16 = vector.shape_cast %15 : vector<1x2048x128xbf16> to vector<2048x128xbf16>
    %cst_13 = arith.constant dense<0.000000e+00> : vector<8x128xf32>
    %17 = tpu.matmul %14, %16, %cst_13 {dimension_numbers = #tpu.dot_dimension_numbers<[1], [0], [0], [1], [0, 0, 1, 1], [], []>} : vector<8x2048xbf16>, vector<2048x128xbf16>, vector<8x128xf32> -> vector<8x128xf32>
    %c0_14 = arith.constant 0 : index
    %c0_15 = arith.constant 0 : index
    %c0_16 = arith.constant 0 : index
    %18 = vector.load %arg6[%c0_14, %c0_15, %c0_16] : memref<3x1x128xf32, #tpu.memory_space<vmem>>, vector<1x1x128xf32>
    %19 = vector.shape_cast %18 : vector<1x1x128xf32> to vector<1x128xf32>
    %20 = vector.broadcast %19 : vector<1x128xf32> to vector<8x128xf32>
    %21 = arith.addf %17, %20 : vector<8x128xf32>
    %22 = arith.addf %3, %21 : vector<8x128xf32>
    %cst_17 = arith.constant 0.000000e+00 : f32
    %23 = vector.broadcast %cst_17 : f32 to vector<8x128xf32>
    %24 = arith.maximumf %22, %23 : vector<8x128xf32>
    %25 = arith.truncf %24 : vector<8x128xf32> to vector<8x128xbf16>
    %c1 = arith.constant 1 : index
    %c0_18 = arith.constant 0 : index
    %c0_19 = arith.constant 0 : index
    %26 = vector.load %arg3[%c1, %c0_18, %c0_19] : memref<3x128x2048xbf16, #tpu.memory_space<vmem>>, vector<1x128x2048xbf16>
    %27 = vector.shape_cast %26 : vector<1x128x2048xbf16> to vector<128x2048xbf16>
    %cst_20 = arith.constant dense<0.000000e+00> : vector<8x2048xf32>
    %28 = tpu.matmul %25, %27, %cst_20 {dimension_numbers = #tpu.dot_dimension_numbers<[1], [0], [0], [1], [0, 0, 1, 1], [], []>} : vector<8x128xbf16>, vector<128x2048xbf16>, vector<8x2048xf32> -> vector<8x2048xf32>
    %29 = arith.truncf %28 : vector<8x2048xf32> to vector<8x2048xbf16>
    %c1_21 = arith.constant 1 : index
    %c0_22 = arith.constant 0 : index
    %c0_23 = arith.constant 0 : index
    %30 = vector.load %arg4[%c1_21, %c0_22, %c0_23] : memref<3x1x2048xbf16, #tpu.memory_space<vmem>>, vector<1x1x2048xbf16>
    %31 = vector.shape_cast %30 : vector<1x1x2048xbf16> to vector<1x2048xbf16>
    %32 = vector.broadcast %31 : vector<1x2048xbf16> to vector<8x2048xbf16>
    %33 = arith.addf %29, %32 : vector<8x2048xbf16>
    %cst_24 = arith.constant 0.000000e+00 : bf16
    %34 = vector.broadcast %cst_24 : bf16 to vector<8x2048xbf16>
    %35 = arith.maximumf %33, %34 : vector<8x2048xbf16>
    %c1_25 = arith.constant 1 : index
    %c0_26 = arith.constant 0 : index
    %c0_27 = arith.constant 0 : index
    %36 = vector.load %arg5[%c1_25, %c0_26, %c0_27] : memref<3x2048x128xbf16, #tpu.memory_space<vmem>>, vector<1x2048x128xbf16>
    %37 = vector.shape_cast %36 : vector<1x2048x128xbf16> to vector<2048x128xbf16>
    %cst_28 = arith.constant dense<0.000000e+00> : vector<8x128xf32>
    %38 = tpu.matmul %35, %37, %cst_28 {dimension_numbers = #tpu.dot_dimension_numbers<[1], [0], [0], [1], [0, 0, 1, 1], [], []>} : vector<8x2048xbf16>, vector<2048x128xbf16>, vector<8x128xf32> -> vector<8x128xf32>
    %c1_29 = arith.constant 1 : index
    %c0_30 = arith.constant 0 : index
    %c0_31 = arith.constant 0 : index
    %39 = vector.load %arg6[%c1_29, %c0_30, %c0_31] : memref<3x1x128xf32, #tpu.memory_space<vmem>>, vector<1x1x128xf32>
    %40 = vector.shape_cast %39 : vector<1x1x128xf32> to vector<1x128xf32>
    %41 = vector.broadcast %40 : vector<1x128xf32> to vector<8x128xf32>
    %42 = arith.addf %38, %41 : vector<8x128xf32>
    %43 = arith.addf %24, %42 : vector<8x128xf32>
    %cst_32 = arith.constant 0.000000e+00 : f32
    %44 = vector.broadcast %cst_32 : f32 to vector<8x128xf32>
    %45 = arith.maximumf %43, %44 : vector<8x128xf32>
    %46 = arith.truncf %45 : vector<8x128xf32> to vector<8x128xbf16>
    %c2 = arith.constant 2 : index
    %c0_33 = arith.constant 0 : index
    %c0_34 = arith.constant 0 : index
    %47 = vector.load %arg3[%c2, %c0_33, %c0_34] : memref<3x128x2048xbf16, #tpu.memory_space<vmem>>, vector<1x128x2048xbf16>
    %48 = vector.shape_cast %47 : vector<1x128x2048xbf16> to vector<128x2048xbf16>
    %cst_35 = arith.constant dense<0.000000e+00> : vector<8x2048xf32>
    %49 = tpu.matmul %46, %48, %cst_35 {dimension_numbers = #tpu.dot_dimension_numbers<[1], [0], [0], [1], [0, 0, 1, 1], [], []>} : vector<8x128xbf16>, vector<128x2048xbf16>, vector<8x2048xf32> -> vector<8x2048xf32>
    %50 = arith.truncf %49 : vector<8x2048xf32> to vector<8x2048xbf16>
    %c2_36 = arith.constant 2 : index
    %c0_37 = arith.constant 0 : index
    %c0_38 = arith.constant 0 : index
    %51 = vector.load %arg4[%c2_36, %c0_37, %c0_38] : memref<3x1x2048xbf16, #tpu.memory_space<vmem>>, vector<1x1x2048xbf16>
    %52 = vector.shape_cast %51 : vector<1x1x2048xbf16> to vector<1x2048xbf16>
    %53 = vector.broadcast %52 : vector<1x2048xbf16> to vector<8x2048xbf16>
    %54 = arith.addf %50, %53 : vector<8x2048xbf16>
    %cst_39 = arith.constant 0.000000e+00 : bf16
    %55 = vector.broadcast %cst_39 : bf16 to vector<8x2048xbf16>
    %56 = arith.maximumf %54, %55 : vector<8x2048xbf16>
    %c2_40 = arith.constant 2 : index
    %c0_41 = arith.constant 0 : index
    %c0_42 = arith.constant 0 : index
    %57 = vector.load %arg5[%c2_40, %c0_41, %c0_42] : memref<3x2048x128xbf16, #tpu.memory_space<vmem>>, vector<1x2048x128xbf16>
    %58 = vector.shape_cast %57 : vector<1x2048x128xbf16> to vector<2048x128xbf16>
    %cst_43 = arith.constant dense<0.000000e+00> : vector<8x128xf32>
    %59 = tpu.matmul %56, %58, %cst_43 {dimension_numbers = #tpu.dot_dimension_numbers<[1], [0], [0], [1], [0, 0, 1, 1], [], []>} : vector<8x2048xbf16>, vector<2048x128xbf16>, vector<8x128xf32> -> vector<8x128xf32>
    %c2_44 = arith.constant 2 : index
    %c0_45 = arith.constant 0 : index
    %c0_46 = arith.constant 0 : index
    %60 = vector.load %arg6[%c2_44, %c0_45, %c0_46] : memref<3x1x128xf32, #tpu.memory_space<vmem>>, vector<1x1x128xf32>
    %61 = vector.shape_cast %60 : vector<1x1x128xf32> to vector<1x128xf32>
    %62 = vector.broadcast %61 : vector<1x128xf32> to vector<8x128xf32>
    %63 = arith.addf %59, %62 : vector<8x128xf32>
    %64 = arith.addf %45, %63 : vector<8x128xf32>
    %c0_47 = arith.constant 0 : index
    %c0_48 = arith.constant 0 : index
    %65 = vector.load %arg7[%c0_47, %c0_48] : memref<8x128xf32, #tpu.memory_space<vmem>>, vector<8x128xf32>
    tpu.vector_store %arg7[%c0_47, %c0_48], %64 {strides = array<i32>} : memref<8x128xf32, #tpu.memory_space<vmem>>, vector<8x128xf32>,
    return
  }
  func.func @transform_0(%arg0: i32) -> (i32, i32) {
    %c0_i32 = arith.constant 0 : i32
    %c0_i32_0 = arith.constant 0 : i32
    return %arg0, %c0_i32 : i32, i32
  }
  func.func @transform_1(%arg0: i32) -> (i32, i32) {
    %c0_i32 = arith.constant 0 : i32
    %c0_i32_0 = arith.constant 0 : i32
    %c0_i32_1 = arith.constant 0 : i32
    return %c0_i32, %c0_i32_0 : i32, i32
  }
  func.func @transform_2(%arg0: i32) -> (i32, i32, i32) {
    %c0_i32 = arith.constant 0 : i32
    %c0_i32_0 = arith.constant 0 : i32
    %c0_i32_1 = arith.constant 0 : i32
    %c0_i32_2 = arith.constant 0 : i32
    return %c0_i32, %c0_i32_0, %c0_i32_1 : i32, i32, i32
  }
  func.func @transform_3(%arg0: i32) -> (i32, i32, i32) {
    %c0_i32 = arith.constant 0 : i32
    %c0_i32_0 = arith.constant 0 : i32
    %c0_i32_1 = arith.constant 0 : i32
    %c0_i32_2 = arith.constant 0 : i32
    return %c0_i32, %c0_i32_0, %c0_i32_1 : i32, i32, i32
  }
  func.func @transform_4(%arg0: i32) -> (i32, i32, i32) {
    %c0_i32 = arith.constant 0 : i32
    %c0_i32_0 = arith.constant 0 : i32
    %c0_i32_1 = arith.constant 0 : i32
    %c0_i32_2 = arith.constant 0 : i32
    return %c0_i32, %c0_i32_0, %c0_i32_1 : i32, i32, i32
  }
  func.func @transform_5(%arg0: i32) -> (i32, i32, i32) {
    %c0_i32 = arith.constant 0 : i32
    %c0_i32_0 = arith.constant 0 : i32
    %c0_i32_1 = arith.constant 0 : i32
    %c0_i32_2 = arith.constant 0 : i32
    return %c0_i32, %c0_i32_0, %c0_i32_1 : i32, i32, i32
  }
  func.func @transform_6(%arg0: i32) -> (i32, i32) {
    %c0_i32 = arith.constant 0 : i32
    %c0_i32_0 = arith.constant 0 : i32
    return %arg0, %c0_i32 : i32, i32
  }
}

</mosaic_0001>

<bundles_post_ra>
// kernel: tpu_custom_call.1
= control target key start
LH: loop header
LB: loop body
LE: loop exit
PB: predicated region body
PF: predicated region fallthrough
CT: control target
= control target key end

     0   :  { %11 = vsyncpa [#allocation3], 0  ;;  %s11557_s0 = inlined_call_operand.hbm [shape: f32[8,128], index: 0, kind: input, shape index: {}]   ;;  %s11558_s1 = inlined_call_operand.hbm [shape: f32[1,128], index: 1, kind: input, shape index: {}]   ;;  %s11559_s2 = inlined_call_operand.hbm [shape: bf16[3,128,2048], index: 2, kind: input, shape index: {}]   ;;  %s11560_s3 = inlined_call_operand.vmem [shape: bf16[3,1,2048], index: 3, kind: input, shape index: {}]   ;;  %s11561_s4 = inlined_call_operand.hbm [shape: bf16[3,2048,128], index: 4, kind: input, shape index: {}]   ;;  %s11562_s5 = inlined_call_operand.hbm [shape: f32[3,1,128], index: 5, kind: input, shape index: {}]   ;;  %s11563_s6 = inlined_call_operand.hbm [shape: f32[8,128], index: 6, kind: output, shape index: {}]  }
   0x1   :  { %12 = vsyncpa [#allocation6], 0 }
   0x2   :  { %13 = vsyncpa [#allocation9], 0  ;;  %s31_s23 = sshll.u32 %s11558_s1, 4  ;;  %s32_s23 = int_to_ptr.hbm [resolvable:$true] %s31_s23 }
   0x3   :  { %14 = vsyncpa [#allocation4], 0  ;;  %s11333_s24 = smov [#allocation5]   ;;  %s56_s28 = sshll.u32 %s11561_s4, 4  ;;  %s57_s28 = int_to_ptr.hbm [resolvable:$true] %s56_s28 }
   0x4   :  { %s33_s25 = sshll.u32 %s11333_s24, 4  ;;  %s11334_s29 = smov [#allocation8]   ;;  %s34_s25 = int_to_ptr.vmem [resolvable:$true] %s33_s25 }
   0x5   :  { %36 = dma.hbm_to_vmem [thread:$0]  %s32_s23, 16, %s34_s25, [#allocation6]  }
   0x6   :  { %s58_s30 = sshll.u32 %s11334_s29, 4  ;;  %s11335_s7 = smov 64   ;;  %s59_s30 = int_to_ptr.vmem [resolvable:$true] %s58_s30 }
   0x7   :  { %s11336_s8 = smov 4   ;;  %s20_s1 = sshll.u32 %s11557_s0, 4  ;;  %s21_s1 = int_to_ptr.hbm [resolvable:$true] %s20_s1 }
   0x8   :  { %64 = dma.hbm_to_vmem [thread:$0]  %s57_s28, 49152, %s59_s30, [#allocation9], %s11335_s7, %s11335_s7, %s11336_s8  }
   0x9   :  { %s11337_s11 = smov [#allocation2]   ;;  %s41_s15 = sshll.u32 %s11559_s2, 4  ;;  %s42_s15 = int_to_ptr.hbm [resolvable:$true] %s41_s15 }
   0xa   :  { %s22_s12 = sshll.u32 %s11337_s11, 4  ;;  %s11338_s4 = smov [#allocation7]   ;;  %s23_s12 = int_to_ptr.vmem [resolvable:$true] %s22_s12 }
   0xb   :  { %25 = dma.hbm_to_vmem [thread:$0]  %s21_s1, 128, %s23_s12, [#allocation3]  }
   0xc   :  { %s43_s16 = sshll.u32 %s11338_s4, 4  ;;  %s69_s19 = sshll.u32 %s11562_s5, 4  ;;  %s44_s16 = int_to_ptr.vmem [resolvable:$true] %s43_s16  ;;  %s70_s19 = int_to_ptr.hbm [resolvable:$true] %s69_s19 }
   0xd   :  { %s11339_s20 = smov 1024   ;;  %s11340_s0 = smov [#allocation10]  }
   0xe   :  { %49 = dma.hbm_to_vmem [thread:$0]  %s42_s15, 49152, %s44_s16, [#allocation6], %s11339_s20, %s11339_s20, %s11335_s7  }
   0xf   :  { %s71_s21 = sshll.u32 %s11340_s0, 4  ;;  %s11341_s22 = smov 16   ;;  %s72_s21 = int_to_ptr.vmem [resolvable:$true] %s71_s21 }
  0x10   :  { %s11342_s23 = smov 1  }
  0x11   :  { %77 = dma.hbm_to_vmem [thread:$0]  %s70_s19, 48, %s72_s21, [#allocation9], %s11341_s22, %s11341_s22, %s11342_s23  }
  0x12   :  { %11325 = dma.done.wait [#allocation3], 128  }
  0x13   :  { %11326 = vsyncadd [#allocation3], 4294967168 }
  0x14   :  { %11327 = dma.done.wait [#allocation6], 49168  }
  0x15   :  { %11328 = vsyncadd [#allocation6], 4294918128 }
  0x16   :  { %11329 = dma.done.wait [#allocation9], 49200  }
  0x17   :  { %11330 = vsyncadd [#allocation9], 4294918096  ;;  %v7772_v0 = vld [vmem:[#allocation7 + $0x380] sm:$0xf]  ;;  %v10510_v2 = vld [vmem:[#allocation7 + $0x384] sm:$0xf] }
  0x18   :  { %v10518_v1 = vld [vmem:[#allocation7 + $0x3bc] sm:$0xf0]  ;;  %v7774_v4 = vld [vmem:[#allocation7 + $0x3c0] sm:$0xf0]  ;;  %v7780_v5 = vld [vmem:[#allocation7 + $0x388] sm:$0xf] }
  0x19   :  { %v7773_v3 = vor.u32 %v10518_v1, %v7772_v0  ;;  %v10519_v6 = vld [vmem:[#allocation7 + $0x3c4] sm:$0xf0]  ;;  %v7777_v7 = vor.u32 %v10510_v2, %v7774_v4  ;;  %v10511_v9 = vld [vmem:[#allocation7 + $0x38c] sm:$0xf]  ;;  %v7708_v11 = vld [vmem:[#allocation7 + $0x300] sm:$0xf] }
  0x1a   :  { %v7781_v8 = vor.u32 %v10519_v6, %v7780_v5  ;;  %v7782_v10 = vld [vmem:[#allocation7 + $0x3c8] sm:$0xf0]  ;;  %v10502_v13 = vld [vmem:[#allocation7 + $0x33c] sm:$0xf0]  ;;  %v10494_v14 = vld [vmem:[#allocation7 + $0x304] sm:$0xf] }
  0x1b   :  { %873 = vmatpush.bf16.msra.mxu0 %v7773_v3  ;;  %v7785_v12 = vor.u32 %v10511_v9, %v7782_v10  ;;  %v7710_v15 = vld [vmem:[#allocation7 + $0x340] sm:$0xf0]  ;;  %886 = vmatpush.bf16.msra.mxu1 %v7777_v7  ;;  %v7709_v16 = vor.u32 %v10502_v13, %v7708_v11  ;;  %v7716_v18 = vld [vmem:[#allocation7 + $0x308] sm:$0xf]  ;;  %v10495_v20 = vld [vmem:[#allocation7 + $0x30c] sm:$0xf] }
  0x1c   :  { %899 = vmatpush.bf16.msra.mxu2 %v7781_v8  ;;  %v7713_v17 = vor.u32 %v10494_v14, %v7710_v15  ;;  %v10503_v19 = vld [vmem:[#allocation7 + $0x344] sm:$0xf0]  ;;  %v7718_v22 = vld [vmem:[#allocation7 + $0x348] sm:$0xf0]  ;;  %v7644_v23 = vld [vmem:[#allocation7 + $0x280] sm:$0xf] }
  0x1d   :  { %912 = vmatpush.bf16.msra.mxu3 %v7785_v12  ;;  %v7717_v21 = vor.u32 %v10503_v19, %v7716_v18  ;;  %v10486_v24 = vld [vmem:[#allocation7 + $0x2bc] sm:$0xf0]  ;;  %v7721_v25 = vor.u32 %v10495_v20, %v7718_v22  ;;  %v10478_v26 = vld [vmem:[#allocation7 + $0x284] sm:$0xf]  ;;  %v7652_v28 = vld [vmem:[#allocation7 + $0x288] sm:$0xf] }
  0x1e   :  { %v7646_v27 = vld [vmem:[#allocation7 + $0x2c0] sm:$0xf0]  ;;  %v7645_v29 = vor.u32 %v10486_v24, %v7644_v23  ;;  %v10487_v30 = vld [vmem:[#allocation7 + $0x2c4] sm:$0xf0]  ;;  %v10479_v31 = vld [vmem:[#allocation7 + $0x28c] sm:$0xf] }
  0x1f   :  { %874 = vmatpush.bf16.msra.mxu0 %v7709_v16  ;;  %v7654_v32 = vld [vmem:[#allocation7 + $0x2c8] sm:$0xf0]  ;;  %887 = vmatpush.bf16.msra.mxu1 %v7713_v17  ;;  %v7649_v33 = vor.u32 %v10478_v26, %v7646_v27  ;;  %v7653_v34 = vor.u32 %v10487_v30, %v7652_v28  ;;  %v7580_v35 = vld [vmem:[#allocation7 + $0x200] sm:$0xf]  ;;  %v10462_v37 = vld [vmem:[#allocation7 + $0x204] sm:$0xf] }
  0x20   :  { %900 = vmatpush.bf16.msra.mxu2 %v7717_v21  ;;  %v10470_v36 = vld [vmem:[#allocation7 + $0x23c] sm:$0xf0]  ;;  %v7657_v38 = vor.u32 %v10479_v31, %v7654_v32  ;;  %v7582_v39 = vld [vmem:[#allocation7 + $0x240] sm:$0xf0]  ;;  %v7588_v40 = vld [vmem:[#allocation7 + $0x208] sm:$0xf] }
  0x21   :  { %913 = vmatpush.bf16.msra.mxu3 %v7721_v25  ;;  %v10471_v41 = vld [vmem:[#allocation7 + $0x244] sm:$0xf0]  ;;  %v10463_v42 = vld [vmem:[#allocation7 + $0x20c] sm:$0xf]  ;;  %v7581_v44 = vor.u32 %v10470_v36, %v7580_v35  ;;  %v7585_v45 = vor.u32 %v10462_v37, %v7582_v39  ;;  %v7516_v47 = vld [vmem:[#allocation7 + $0x180] sm:$0xf] }
  0x22   :  { %v7590_v43 = vld [vmem:[#allocation7 + $0x248] sm:$0xf0]  ;;  %v7589_v46 = vor.u32 %v10471_v41, %v7588_v40  ;;  %v10454_v48 = vld [vmem:[#allocation7 + $0x1bc] sm:$0xf0]  ;;  %v10446_v49 = vld [vmem:[#allocation7 + $0x184] sm:$0xf] }
  0x23   :  { %875 = vmatpush.bf16.msra.mxu0 %v7645_v29  ;;  %888 = vmatpush.bf16.msra.mxu1 %v7649_v33  ;;  %v7593_v50 = vor.u32 %v10463_v42, %v7590_v43  ;;  %v7518_v51 = vld [vmem:[#allocation7 + $0x1c0] sm:$0xf0]  ;;  %v7524_v52 = vld [vmem:[#allocation7 + $0x188] sm:$0xf]  ;;  %v10447_v54 = vld [vmem:[#allocation7 + $0x18c] sm:$0xf]  ;;  %v7517_v56 = vor.u32 %v10454_v48, %v7516_v47 }
  0x24   :  { %901 = vmatpush.bf16.msra.mxu2 %v7653_v34  ;;  %v10455_v53 = vld [vmem:[#allocation7 + $0x1c4] sm:$0xf0]  ;;  %v7526_v55 = vld [vmem:[#allocation7 + $0x1c8] sm:$0xf0]  ;;  %v7521_v57 = vor.u32 %v10446_v49, %v7518_v51  ;;  %v7452_v59 = vld [vmem:[#allocation7 + $0x100] sm:$0xf] }
  0x25   :  { %914 = vmatpush.bf16.msra.mxu3 %v7657_v38  ;;  %v7525_v58 = vor.u32 %v10455_v53, %v7524_v52  ;;  %v10438_v60 = vld [vmem:[#allocation7 + $0x13c] sm:$0xf0]  ;;  %v10430_v61 = vld [vmem:[#allocation7 + $0x104] sm:$0xf]  ;;  %v7529_v62 = vor.u32 %v10447_v54, %v7526_v55  ;;  %v7460_v0 = vld [vmem:[#allocation7 + $0x108] sm:$0xf] }
  0x26   :  { %v7454_v63 = vld [vmem:[#allocation7 + $0x140] sm:$0xf0]  ;;  %v10439_v1 = vld [vmem:[#allocation7 + $0x144] sm:$0xf0]  ;;  %v10431_v2 = vld [vmem:[#allocation7 + $0x10c] sm:$0xf]  ;;  %v7453_v4 = vor.u32 %v10438_v60, %v7452_v59 }
  0x27   :  { %876 = vmatpush.bf16.msra.mxu0 %v7581_v44  ;;  %889 = vmatpush.bf16.msra.mxu1 %v7585_v45  ;;  %v7462_v3 = vld [vmem:[#allocation7 + $0x148] sm:$0xf0]  ;;  %v7457_v5 = vor.u32 %v10430_v61, %v7454_v63  ;;  %v7461_v6 = vor.u32 %v10439_v1, %v7460_v0  ;;  %v7388_v7 = vld [vmem:[#allocation7 + $0x80] sm:$0xf]  ;;  %v10414_v9 = vld [vmem:[#allocation7 + $0x84] sm:$0xf] }
  0x28   :  { %902 = vmatpush.bf16.msra.mxu2 %v7589_v46  ;;  %v10422_v8 = vld [vmem:[#allocation7 + $0xbc] sm:$0xf0]  ;;  %v7465_v10 = vor.u32 %v10431_v2, %v7462_v3  ;;  %v7390_v11 = vld [vmem:[#allocation7 + $0xc0] sm:$0xf0]  ;;  %v7396_v12 = vld [vmem:[#allocation7 + $0x88] sm:$0xf] }
  0x29   :  { %915 = vmatpush.bf16.msra.mxu3 %v7593_v50  ;;  %v10423_v13 = vld [vmem:[#allocation7 + $0xc4] sm:$0xf0]  ;;  %v10415_v14 = vld [vmem:[#allocation7 + $0x8c] sm:$0xf]  ;;  %v7389_v16 = vor.u32 %v10422_v8, %v7388_v7  ;;  %v7324_v17 = vld [vmem:[#allocation7] sm:$0xf]  ;;  %v7393_v19 = vor.u32 %v10414_v9, %v7390_v11 }
  0x2a   :  { %v7398_v15 = vld [vmem:[#allocation7 + $0xc8] sm:$0xf0]  ;;  %v10406_v18 = vld [vmem:[#allocation7 + $0x3c] sm:$0xf0]  ;;  %v7397_v20 = vor.u32 %v10423_v13, %v7396_v12  ;;  %v10398_v21 = vld [vmem:[#allocation7 + $0x4] sm:$0xf] }
  0x2b   :  { %877 = vmatpush.bf16.msra.mxu0 %v7517_v56  ;;  %890 = vmatpush.bf16.msra.mxu1 %v7521_v57  ;;  %v7326_v22 = vld [vmem:[#allocation7 + $0x40] sm:$0xf0]  ;;  %v7332_v23 = vld [vmem:[#allocation7 + $0x8] sm:$0xf]  ;;  %v7401_v24 = vor.u32 %v10415_v14, %v7398_v15  ;;  %v10399_v26 = vld [vmem:[#allocation7 + $0xc] sm:$0xf]  ;;  %v7325_v31 = vor.u32 %v10406_v18, %v7324_v17 }
  0x2c   :  { %903 = vmatpush.bf16.msra.mxu2 %v7525_v58  ;;  %v10407_v25 = vld [vmem:[#allocation7 + $0x44] sm:$0xf0]  ;;  %v7334_v27 = vld [vmem:[#allocation7 + $0x48] sm:$0xf0]  ;;  %v7788_v28 = vld [vmem:[#allocation7 + $0x390] sm:$0xf]  ;;  %v7329_v35 = vor.u32 %v10398_v21, %v7326_v22 }
  0x2d   :  { %916 = vmatpush.bf16.msra.mxu3 %v7529_v62  ;;  %v10520_v29 = vld [vmem:[#allocation7 + $0x3cc] sm:$0xf0]  ;;  %v10512_v30 = vld [vmem:[#allocation7 + $0x394] sm:$0xf]  ;;  %v7796_v33 = vld [vmem:[#allocation7 + $0x398] sm:$0xf]  ;;  %v7333_v36 = vor.u32 %v10407_v25, %v7332_v23  ;;  %v7337_v39 = vor.u32 %v10399_v26, %v7334_v27 }
  0x2e   :  { %v7790_v32 = vld [vmem:[#allocation7 + $0x3d0] sm:$0xf0]  ;;  %v10521_v34 = vld [vmem:[#allocation7 + $0x3d4] sm:$0xf0]  ;;  %v10513_v37 = vld [vmem:[#allocation7 + $0x39c] sm:$0xf]  ;;  %v7789_v40 = vor.u32 %v10520_v29, %v7788_v28 }
  0x2f   :  { %878 = vmatpush.bf16.msra.mxu0 %v7453_v4  ;;  %891 = vmatpush.bf16.msra.mxu1 %v7457_v5  ;;  %v7798_v38 = vld [vmem:[#allocation7 + $0x3d8] sm:$0xf0]  ;;  %v7793_v41 = vor.u32 %v10512_v30, %v7790_v32  ;;  %v7797_v42 = vor.u32 %v10521_v34, %v7796_v33  ;;  %v7724_v43 = vld [vmem:[#allocation7 + $0x310] sm:$0xf]  ;;  %v10496_v45 = vld [vmem:[#allocation7 + $0x314] sm:$0xf] }
  0x30   :  { %904 = vmatpush.bf16.msra.mxu2 %v7461_v6  ;;  %v10504_v44 = vld [vmem:[#allocation7 + $0x34c] sm:$0xf0]  ;;  %v7801_v46 = vor.u32 %v10513_v37, %v7798_v38  ;;  %v7726_v47 = vld [vmem:[#allocation7 + $0x350] sm:$0xf0]  ;;  %v7732_v48 = vld [vmem:[#allocation7 + $0x318] sm:$0xf] }
  0x31   :  { %917 = vmatpush.bf16.msra.mxu3 %v7465_v10  ;;  %v10505_v49 = vld [vmem:[#allocation7 + $0x354] sm:$0xf0]  ;;  %v10497_v50 = vld [vmem:[#allocation7 + $0x31c] sm:$0xf]  ;;  %v7725_v52 = vor.u32 %v10504_v44, %v7724_v43  ;;  %v7660_v53 = vld [vmem:[#allocation7 + $0x290] sm:$0xf]  ;;  %v7729_v56 = vor.u32 %v10496_v45, %v7726_v47 }
  0x32   :  { %v7734_v51 = vld [vmem:[#allocation7 + $0x358] sm:$0xf0]  ;;  %v10488_v54 = vld [vmem:[#allocation7 + $0x2cc] sm:$0xf0]  ;;  %v10480_v55 = vld [vmem:[#allocation7 + $0x294] sm:$0xf]  ;;  %v7733_v57 = vor.u32 %v10505_v49, %v7732_v48 }
  0x33   :  { %879 = vmatpush.bf16.msra.mxu0 %v7389_v16  ;;  %892 = vmatpush.bf16.msra.mxu1 %v7393_v19  ;;  %v7662_v58 = vld [vmem:[#allocation7 + $0x2d0] sm:$0xf0]  ;;  %v7668_v59 = vld [vmem:[#allocation7 + $0x298] sm:$0xf]  ;;  %v7737_v61 = vor.u32 %v10497_v50, %v7734_v51  ;;  %v11177_v63 = vld [vmem:[#allocation5] ss:$0 sm:$0xff]  ;;  %v7661_v2 = vor.u32 %v10488_v54, %v7660_v53 }
  0x34   :  { %905 = vmatpush.bf16.msra.mxu2 %v7397_v20  ;;  %v98_v60 = vld [vmem:[#allocation2] sm:$0xff]  ;;  %v7665_v4 = vor.u32 %v10480_v55, %v7662_v58  ;;  %v7596_v6 = vld [vmem:[#allocation7 + $0x210] sm:$0xf]  ;;  %s7310_s12 = sshll.u32 %s11563_s6, 4  ;;  %s7311_s12 = int_to_ptr.hbm [resolvable:$true] %s7310_s12 }
  0x35   :  { %918 = vmatpush.bf16.msra.mxu3 %v7401_v24  ;;  %v10489_v62 = vld [vmem:[#allocation7 + $0x2d4] sm:$0xf0]  ;;  %v10481_v0 = vld [vmem:[#allocation7 + $0x29c] sm:$0xf]  ;;  %v11394_v3 = vmul.f32 %v11177_v63, %v98_v60  ;;  %v10472_v7 = vld [vmem:[#allocation7 + $0x24c] sm:$0xf0] }
  0x36   :  { %v7670_v1 = vld [vmem:[#allocation7 + $0x2d8] sm:$0xf0]  ;;  %v7669_v5 = vor.u32 %v10489_v62, %v7668_v59  ;;  %v10464_v8 = vld [vmem:[#allocation7 + $0x214] sm:$0xf]  ;;  %v7604_v11 = vld [vmem:[#allocation7 + $0x218] sm:$0xf]  ;;  %v7597_v16 = vor.u32 %v10472_v7, %v7596_v6 }
  0x37   :  { %880 = vmatpush.bf16.msra.mxu0 %v7325_v31  ;;  %893 = vmatpush.bf16.msra.mxu1 %v7329_v35  ;;  %v7673_v9 = vor.u32 %v10481_v0, %v7670_v1  ;;  %v7598_v10 = vld [vmem:[#allocation7 + $0x250] sm:$0xf0]  ;;  %v10473_v12 = vld [vmem:[#allocation7 + $0x254] sm:$0xf0]  ;;  %v11398_v13 = vpack.c.bf16 %v11394_v3, %v11394_v3  ;;  %v10465_v14 = vld [vmem:[#allocation7 + $0x21c] sm:$0xf] }
  0x38   :  { %906 = vmatpush.bf16.msra.mxu2 %v7333_v36  ;;  %v7606_v15 = vld [vmem:[#allocation7 + $0x258] sm:$0xf0]  ;;  %v7601_v17 = vor.u32 %v10464_v8, %v7598_v10  ;;  %v7605_v18 = vor.u32 %v10473_v12, %v7604_v11  ;;  %v7532_v19 = vld [vmem:[#allocation7 + $0x190] sm:$0xf]  ;;  %v10448_v21 = vld [vmem:[#allocation7 + $0x194] sm:$0xf] }
  0x39   :  { %919 = vmatpush.bf16.msra.mxu3 %v7337_v39  ;;  %v10456_v20 = vld [vmem:[#allocation7 + $0x1cc] sm:$0xf0]  ;;  %v7609_v22 = vor.u32 %v10465_v14, %v7606_v15  ;;  %v7534_v23 = vld [vmem:[#allocation7 + $0x1d0] sm:$0xf0]  ;;  %v7540_v24 = vld [vmem:[#allocation7 + $0x198] sm:$0xf] }
  0x3a   :  { %v10457_v25 = vld [vmem:[#allocation7 + $0x1d4] sm:$0xf0]  ;;  %881 = vmatmul.bf16.vlgmr.msra.gmra.mxu0 %v11398_v13  ;;  %v10449_v26 = vld [vmem:[#allocation7 + $0x19c] sm:$0xf]  ;;  %894 = vmatmul.bf16.vlgmr.msra.gmra.mxu1 %v11398_v13  ;;  %v7533_v28 = vor.u32 %v10456_v20, %v7532_v19  ;;  %v7537_v29 = vor.u32 %v10448_v21, %v7534_v23  ;;  %v7468_v31 = vld [vmem:[#allocation7 + $0x110] sm:$0xf] }
  0x3b   :  { %925 = vmatpush.bf16.msrb.mxu0 %v7789_v40  ;;  %938 = vmatpush.bf16.msrb.mxu1 %v7793_v41  ;;  %v7542_v27 = vld [vmem:[#allocation7 + $0x1d8] sm:$0xf0]  ;;  %v7541_v30 = vor.u32 %v10457_v25, %v7540_v24  ;;  %v10440_v32 = vld [vmem:[#allocation7 + $0x14c] sm:$0xf0]  ;;  %v10432_v33 = vld [vmem:[#allocation7 + $0x114] sm:$0xf] }
  0x3c   :  { %951 = vmatpush.bf16.msrb.mxu2 %v7797_v42  ;;  %920 = vmatmul.bf16.vlgmr.msra.gmra.mxu3 %v11398_v13  ;;  %v7545_v34 = vor.u32 %v10449_v26, %v7542_v27  ;;  %v7470_v35 = vld [vmem:[#allocation7 + $0x150] sm:$0xf0]  ;;  %v7476_v36 = vld [vmem:[#allocation7 + $0x118] sm:$0xf]  ;;  %v10433_v38 = vld [vmem:[#allocation7 + $0x11c] sm:$0xf]  ;;  %v7469_v40 = vor.u32 %v10440_v32, %v7468_v31 }
  0x3d   :  { %964 = vmatpush.bf16.msrb.mxu3 %v7801_v46  ;;  %907 = vmatmul.bf16.vlgmr.msra.gmra.mxu2 %v11398_v13  ;;  %v10441_v37 = vld [vmem:[#allocation7 + $0x154] sm:$0xf0]  ;;  %v7478_v39 = vld [vmem:[#allocation7 + $0x158] sm:$0xf0]  ;;  %v7473_v41 = vor.u32 %v10432_v33, %v7470_v35  ;;  %v7404_v43 = vld [vmem:[#allocation7 + $0x90] sm:$0xf] }
  0x3e   :  { %v7477_v42 = vor.u32 %v10441_v37, %v7476_v36  ;;  %v10424_v44 = vld [vmem:[#allocation7 + $0xcc] sm:$0xf0]  ;;  %v10416_v45 = vld [vmem:[#allocation7 + $0x94] sm:$0xf]  ;;  %v7481_v46 = vor.u32 %v10433_v38, %v7478_v39  ;;  %v7412_v48 = vld [vmem:[#allocation7 + $0x98] sm:$0xf] }
  0x3f   :  { %926 = vmatpush.bf16.msrb.mxu0 %v7725_v52  ;;  %939 = vmatpush.bf16.msrb.mxu1 %v7729_v56  ;;  %v7406_v47 = vld [vmem:[#allocation7 + $0xd0] sm:$0xf0]  ;;  %v10425_v49 = vld [vmem:[#allocation7 + $0xd4] sm:$0xf0]  ;;  %v10417_v50 = vld [vmem:[#allocation7 + $0x9c] sm:$0xf]  ;;  %v7405_v52 = vor.u32 %v10424_v44, %v7404_v43 }
  0x40   :  { %952 = vmatpush.bf16.msrb.mxu2 %v7733_v57  ;;  %v7414_v51 = vld [vmem:[#allocation7 + $0xd8] sm:$0xf0]  ;;  %v7340_v53 = vld [vmem:[#allocation7 + $0x10] sm:$0xf]  ;;  %v7409_v55 = vor.u32 %v10416_v45, %v7406_v47  ;;  %v7413_v56 = vor.u32 %v10425_v49, %v7412_v48  ;;  %v10400_v57 = vld [vmem:[#allocation7 + $0x14] sm:$0xf] }
  0x41   :  { %965 = vmatpush.bf16.msrb.mxu3 %v7737_v61  ;;  %v10408_v54 = vld [vmem:[#allocation7 + $0x4c] sm:$0xf0]  ;;  %v7342_v58 = vld [vmem:[#allocation7 + $0x50] sm:$0xf0]  ;;  %v7348_v59 = vld [vmem:[#allocation7 + $0x18] sm:$0xf]  ;;  %v7417_v60 = vor.u32 %v10417_v50, %v7414_v51 }
  0x42   :  { %v10409_v61 = vld [vmem:[#allocation7 + $0x54] sm:$0xf0]  ;;  %v10401_v62 = vld [vmem:[#allocation7 + $0x1c] sm:$0xf]  ;;  %v7804_v0 = vld [vmem:[#allocation7 + $0x3a0] sm:$0xf]  ;;  %v7345_v8 = vor.u32 %v10400_v57, %v7342_v58 }
  0x43   :  { %927 = vmatpush.bf16.msrb.mxu0 %v7661_v2  ;;  %940 = vmatpush.bf16.msrb.mxu1 %v7665_v4  ;;  %v7350_v63 = vld [vmem:[#allocation7 + $0x58] sm:$0xf0]  ;;  %v10522_v1 = vld [vmem:[#allocation7 + $0x3dc] sm:$0xf0]  ;;  %v10514_v2 = vld [vmem:[#allocation7 + $0x3a4] sm:$0xf]  ;;  %v7341_v4 = vor.u32 %v10408_v54, %v7340_v53 }
  0x44   :  { %953 = vmatpush.bf16.msrb.mxu2 %v7669_v5  ;;  %v7806_v5 = vld [vmem:[#allocation7 + $0x3e0] sm:$0xf0]  ;;  %v7812_v6 = vld [vmem:[#allocation7 + $0x3a8] sm:$0xf]  ;;  %v10515_v10 = vld [vmem:[#allocation7 + $0x3ac] sm:$0xf]  ;;  %v7353_v12 = vor.u32 %v10401_v62, %v7350_v63  ;;  %v7805_v14 = vor.u32 %v10522_v1, %v7804_v0 }
  0x45   :  { %966 = vmatpush.bf16.msrb.mxu3 %v7673_v9  ;;  %v10523_v7 = vld [vmem:[#allocation7 + $0x3e4] sm:$0xf0]  ;;  %v7349_v9 = vor.u32 %v10409_v61, %v7348_v59  ;;  %v7814_v11 = vld [vmem:[#allocation7 + $0x3e8] sm:$0xf0]  ;;  %v7809_v15 = vor.u32 %v10514_v2, %v7806_v5  ;;  %v10498_v19 = vld [vmem:[#allocation7 + $0x324] sm:$0xf] }
  0x46   :  { %v7817_v20 = vor.u32 %v10515_v10, %v7814_v11  ;;  %v7742_v21 = vld [vmem:[#allocation7 + $0x360] sm:$0xf0]  ;;  %v10507_v23 = vld [vmem:[#allocation7 + $0x364] sm:$0xf0]  ;;  %v10499_v24 = vld [vmem:[#allocation7 + $0x32c] sm:$0xf] }
  0x47   :  { %928 = vmatpush.bf16.msrb.mxu0 %v7597_v16  ;;  %941 = vmatpush.bf16.msrb.mxu1 %v7601_v17  ;;  %v7813_v16 = vor.u32 %v10523_v7, %v7812_v6  ;;  %v7740_v17 = vld [vmem:[#allocation7 + $0x320] sm:$0xf]  ;;  %v7750_v25 = vld [vmem:[#allocation7 + $0x368] sm:$0xf0]  ;;  %v7745_v27 = vor.u32 %v10498_v19, %v7742_v21  ;;  %v10482_v31 = vld [vmem:[#allocation7 + $0x2a4] sm:$0xf] }
  0x48   :  { %954 = vmatpush.bf16.msrb.mxu2 %v7605_v18  ;;  %v10506_v18 = vld [vmem:[#allocation7 + $0x35c] sm:$0xf0]  ;;  %v7753_v32 = vor.u32 %v10499_v24, %v7750_v25  ;;  %v7678_v33 = vld [vmem:[#allocation7 + $0x2e0] sm:$0xf0]  ;;  %v10491_v35 = vld [vmem:[#allocation7 + $0x2e4] sm:$0xf0] }
  0x49   :  { %967 = vmatpush.bf16.msrb.mxu3 %v7609_v22  ;;  %v7748_v22 = vld [vmem:[#allocation7 + $0x328] sm:$0xf]  ;;  %v7741_v26 = vor.u32 %v10506_v18, %v7740_v17  ;;  %v10483_v36 = vld [vmem:[#allocation7 + $0x2ac] sm:$0xf]  ;;  %v7681_v39 = vor.u32 %v10482_v31, %v7678_v33  ;;  %v10466_v43 = vld [vmem:[#allocation7 + $0x224] sm:$0xf] }
  0x4a   :  { %v7686_v37 = vld [vmem:[#allocation7 + $0x2e8] sm:$0xf0]  ;;  %v7614_v45 = vld [vmem:[#allocation7 + $0x260] sm:$0xf0]  ;;  %v10475_v47 = vld [vmem:[#allocation7 + $0x264] sm:$0xf0] }
  0x4b   :  { %929 = vmatpush.bf16.msrb.mxu0 %v7533_v28  ;;  %942 = vmatpush.bf16.msrb.mxu1 %v7537_v29  ;;  %v7749_v28 = vor.u32 %v10507_v23, %v7748_v22  ;;  %v7676_v29 = vld [vmem:[#allocation7 + $0x2a0] sm:$0xf]  ;;  %v7689_v44 = vor.u32 %v10483_v36, %v7686_v37  ;;  %v10467_v48 = vld [vmem:[#allocation7 + $0x22c] sm:$0xf]  ;;  %v7617_v51 = vor.u32 %v10466_v43, %v7614_v45  ;;  %v7550_v57 = vld [vmem:[#allocation7 + $0x1e0] sm:$0xf0] }
  0x4c   :  { %955 = vmatpush.bf16.msrb.mxu2 %v7541_v30  ;;  %v10490_v30 = vld [vmem:[#allocation7 + $0x2dc] sm:$0xf0]  ;;  %v7622_v49 = vld [vmem:[#allocation7 + $0x268] sm:$0xf0]  ;;  %v7556_v58 = vld [vmem:[#allocation7 + $0x1a8] sm:$0xf] }
  0x4d   :  { %968 = vmatpush.bf16.msrb.mxu3 %v7545_v34  ;;  %v7684_v34 = vld [vmem:[#allocation7 + $0x2a8] sm:$0xf]  ;;  %v7677_v38 = vor.u32 %v10490_v30, %v7676_v29  ;;  %v7548_v53 = vld [vmem:[#allocation7 + $0x1a0] sm:$0xf]  ;;  %v7558_v61 = vld [vmem:[#allocation7 + $0x1e8] sm:$0xf0] }
  0x4e   :  { %v10458_v54 = vld [vmem:[#allocation7 + $0x1dc] sm:$0xf0]  ;;  %v10459_v59 = vld [vmem:[#allocation7 + $0x1e4] sm:$0xf0]  ;;  %v7486_v5 = vld [vmem:[#allocation7 + $0x160] sm:$0xf0] }
  0x4f   :  { %930 = vmatpush.bf16.msrb.mxu0 %v7469_v40  ;;  %943 = vmatpush.bf16.msrb.mxu1 %v7473_v41  ;;  %v7685_v40 = vor.u32 %v10491_v35, %v7684_v34  ;;  %v7612_v41 = vld [vmem:[#allocation7 + $0x220] sm:$0xf]  ;;  %v7549_v62 = vor.u32 %v10458_v54, %v7548_v53  ;;  %v7557_v1 = vor.u32 %v10459_v59, %v7556_v58  ;;  %v7492_v7 = vld [vmem:[#allocation7 + $0x128] sm:$0xf]  ;;  %v7494_v10 = vld [vmem:[#allocation7 + $0x168] sm:$0xf0] }
  0x50   :  { %956 = vmatpush.bf16.msrb.mxu2 %v7477_v42  ;;  %v10474_v42 = vld [vmem:[#allocation7 + $0x25c] sm:$0xf0]  ;;  %v10418_v17 = vld [vmem:[#allocation7 + $0xa4] sm:$0xf]  ;;  %v10427_v21 = vld [vmem:[#allocation7 + $0xe4] sm:$0xf0] }
  0x51   :  { %969 = vmatpush.bf16.msrb.mxu3 %v7481_v46  ;;  %v7620_v46 = vld [vmem:[#allocation7 + $0x228] sm:$0xf]  ;;  %v7613_v50 = vor.u32 %v10474_v42, %v7612_v41  ;;  %v7484_v63 = vld [vmem:[#allocation7 + $0x120] sm:$0xf]  ;;  %v7422_v19 = vld [vmem:[#allocation7 + $0xe0] sm:$0xf0] }
  0x52   :  { %v10442_v2 = vld [vmem:[#allocation7 + $0x15c] sm:$0xf0]  ;;  %v10419_v22 = vld [vmem:[#allocation7 + $0xac] sm:$0xf]  ;;  %v10402_v29 = vld [vmem:[#allocation7 + $0x24] sm:$0xf] }
  0x53   :  { %931 = vmatpush.bf16.msrb.mxu0 %v7405_v52  ;;  %944 = vmatpush.bf16.msrb.mxu1 %v7409_v55  ;;  %v7621_v52 = vor.u32 %v10475_v47, %v7620_v46  ;;  %v10450_v55 = vld [vmem:[#allocation7 + $0x1a4] sm:$0xf]  ;;  %v7485_v11 = vor.u32 %v10442_v2, %v7484_v63  ;;  %v7430_v23 = vld [vmem:[#allocation7 + $0xe8] sm:$0xf0]  ;;  %v7356_v25 = vld [vmem:[#allocation7 + $0x20] sm:$0xf] }
  0x54   :  { %957 = vmatpush.bf16.msrb.mxu2 %v7413_v56  ;;  %v7625_v56 = vor.u32 %v10467_v48, %v7622_v49  ;;  %v7553_v0 = vor.u32 %v10450_v55, %v7550_v57  ;;  %v7358_v30 = vld [vmem:[#allocation7 + $0x60] sm:$0xf0]  ;;  %v7364_v31 = vld [vmem:[#allocation7 + $0x28] sm:$0xf]  ;;  %v10403_v34 = vld [vmem:[#allocation7 + $0x2c] sm:$0xf] }
  0x55   :  { %970 = vmatpush.bf16.msrb.mxu3 %v7417_v60  ;;  %v10451_v60 = vld [vmem:[#allocation7 + $0x1ac] sm:$0xf]  ;;  %v10411_v33 = vld [vmem:[#allocation7 + $0x64] sm:$0xf0]  ;;  %v7820_v36 = vld [vmem:[#allocation7 + $0x3b0] sm:$0xf]  ;;  %v7361_v43 = vor.u32 %v10402_v29, %v7358_v30 }
  0x56   :  { %v7561_v6 = vor.u32 %v10451_v60, %v7558_v61  ;;  %v7366_v35 = vld [vmem:[#allocation7 + $0x68] sm:$0xf0]  ;;  %v10524_v37 = vld [vmem:[#allocation7 + $0x3ec] sm:$0xf0]  ;;  %v7828_v41 = vld [vmem:[#allocation7 + $0x3b8] sm:$0xf] }
  0x57   :  { %932 = vmatpush.bf16.msrb.mxu0 %v7341_v4  ;;  %945 = vmatpush.bf16.msrb.mxu1 %v7345_v8  ;;  %v10434_v4 = vld [vmem:[#allocation7 + $0x124] sm:$0xf]  ;;  %v10443_v8 = vld [vmem:[#allocation7 + $0x164] sm:$0xf0]  ;;  %v10525_v42 = vld [vmem:[#allocation7 + $0x3f4] sm:$0xf0]  ;;  %v7369_v47 = vor.u32 %v10403_v34, %v7366_v35  ;;  %v7821_v48 = vor.u32 %v10524_v37, %v7820_v36 }
  0x58   :  { %958 = vmatpush.bf16.msrb.mxu2 %v7349_v9  ;;  %v10435_v9 = vld [vmem:[#allocation7 + $0x12c] sm:$0xf]  ;;  %v10517_v45 = vld [vmem:[#allocation7 + $0x3bc] sm:$0xf]  ;;  %v10500_v53 = vld [vmem:[#allocation7 + $0x334] sm:$0xf] }
  0x59   :  { %971 = vmatpush.bf16.msrb.mxu3 %v7353_v12  ;;  %v7489_v12 = vor.u32 %v10434_v4, %v7486_v5  ;;  %v7497_v18 = vor.u32 %v10435_v9, %v7494_v10  ;;  %v7830_v46 = vld [vmem:[#allocation7 + $0x3f8] sm:$0xf0]  ;;  %v7758_v55 = vld [vmem:[#allocation7 + $0x370] sm:$0xf0]  ;;  %v10509_v57 = vld [vmem:[#allocation7 + $0x374] sm:$0xf0] }
  0x5a   :  { %933 = vmatmul.bf16.vlgmr.msrb.gmra.mxu0 %v11398_v13  ;;  %946 = vmatmul.bf16.vlgmr.msrb.gmra.mxu1 %v11398_v13  ;;  %v7833_v54 = vor.u32 %v10517_v45, %v7830_v46  ;;  %v10501_v58 = vld [vmem:[#allocation7 + $0x33c] sm:$0xf]  ;;  %v7761_v61 = vor.u32 %v10500_v53, %v7758_v55  ;;  %v7692_v63 = vld [vmem:[#allocation7 + $0x2b0] sm:$0xf]  ;;  %v7694_v4 = vld [vmem:[#allocation7 + $0x2f0] sm:$0xf0] }
  0x5b   :  { %977 = vmatpush.bf16.msra.mxu0 %v7805_v14  ;;  %990 = vmatpush.bf16.msra.mxu1 %v7809_v15  ;;  %v7493_v14 = vor.u32 %v10443_v8, %v7492_v7  ;;  %v7420_v15 = vld [vmem:[#allocation7 + $0xa0] sm:$0xf]  ;;  %v7766_v59 = vld [vmem:[#allocation7 + $0x378] sm:$0xf0]  ;;  %v7700_v5 = vld [vmem:[#allocation7 + $0x2b8] sm:$0xf] }
  0x5c   :  { %1003 = vmatpush.bf16.msra.mxu2 %v7813_v16  ;;  %972 = vmatmul.bf16.vlgmr.msrb.gmra.mxu3 %v11398_v13  ;;  %v10426_v16 = vld [vmem:[#allocation7 + $0xdc] sm:$0xf0]  ;;  %v7769_v2 = vor.u32 %v10501_v58, %v7766_v59  ;;  %v10485_v7 = vld [vmem:[#allocation7 + $0x2bc] sm:$0xf]  ;;  %v7566_v29 = vld [vmem:[#allocation7 + $0x1f0] sm:$0xf0] }
  0x5d   :  { %1016 = vmatpush.bf16.msra.mxu3 %v7817_v20  ;;  %959 = vmatmul.bf16.vlgmr.msrb.gmra.mxu2 %v11398_v13  ;;  %v7428_v20 = vld [vmem:[#allocation7 + $0xa8] sm:$0xf]  ;;  %v7421_v24 = vor.u32 %v10426_v16, %v7420_v15  ;;  %v7702_v8 = vld [vmem:[#allocation7 + $0x2f8] sm:$0xf0]  ;;  %v10468_v15 = vld [vmem:[#allocation7 + $0x234] sm:$0xf] }
  0x5e   :  { %v7705_v16 = vor.u32 %v10485_v7, %v7702_v8  ;;  %v7572_v30 = vld [vmem:[#allocation7 + $0x1b8] sm:$0xf]  ;;  %v7500_v37 = vld [vmem:[#allocation7 + $0x130] sm:$0xf]  ;;  %v7510_v45 = vld [vmem:[#allocation7 + $0x178] sm:$0xf0] }
  0x5f   :  { %978 = vmatpush.bf16.msra.mxu0 %v7741_v26  ;;  %991 = vmatpush.bf16.msra.mxu1 %v7745_v27  ;;  %v10410_v26 = vld [vmem:[#allocation7 + $0x5c] sm:$0xf0]  ;;  %v7425_v27 = vor.u32 %v10418_v17, %v7422_v19  ;;  %v7630_v17 = vld [vmem:[#allocation7 + $0x270] sm:$0xf0]  ;;  %v10477_v19 = vld [vmem:[#allocation7 + $0x274] sm:$0xf0] }
  0x60   :  { %1004 = vmatpush.bf16.msra.mxu2 %v7749_v28  ;;  %v7429_v28 = vor.u32 %v10427_v21, %v7428_v20  ;;  %v10469_v20 = vld [vmem:[#allocation7 + $0x23c] sm:$0xf]  ;;  %v7438_v53 = vld [vmem:[#allocation7 + $0xf0] sm:$0xf0]  ;;  %v10429_v55 = vld [vmem:[#allocation7 + $0xf4] sm:$0xf0] }
  0x61   :  { %1017 = vmatpush.bf16.msra.mxu3 %v7753_v32  ;;  %v7433_v32 = vor.u32 %v10419_v22, %v7430_v23  ;;  %v7638_v21 = vld [vmem:[#allocation7 + $0x278] sm:$0xf0]  ;;  %v7633_v23 = vor.u32 %v10468_v15, %v7630_v17  ;;  %v10532_v15 = vld [vmem:[#allocation8 + $0x30] sm:$0xff] }
  0x62   :  { %v10540_v17 = vld [vmem:[#allocation8 + $0x70] sm:$0xff] }
  0x63   :  { %979 = vmatpush.bf16.msra.mxu0 %v7677_v38  ;;  %992 = vmatpush.bf16.msra.mxu1 %v7681_v39  ;;  %v10516_v38 = vld [vmem:[#allocation7 + $0x3b4] sm:$0xf]  ;;  %v7357_v39 = vor.u32 %v10410_v26, %v7356_v25  ;;  %v7564_v25 = vld [vmem:[#allocation7 + $0x1b0] sm:$0xf] }
  0x64   :  { %1005 = vmatpush.bf16.msra.mxu2 %v7685_v40  ;;  %v7822_v40 = vld [vmem:[#allocation7 + $0x3f0] sm:$0xf0]  ;;  %v10460_v26 = vld [vmem:[#allocation7 + $0x1ec] sm:$0xf0] }
  0x65   :  { %1018 = vmatpush.bf16.msra.mxu3 %v7689_v44  ;;  %v7365_v44 = vor.u32 %v10411_v33, %v7364_v31  ;;  %v7825_v49 = vor.u32 %v10516_v38, %v7822_v40  ;;  %v10461_v31 = vld [vmem:[#allocation7 + $0x1f4] sm:$0xf0]  ;;  %v7574_v33 = vld [vmem:[#allocation7 + $0x1f8] sm:$0xf0]  ;;  %v7565_v34 = vor.u32 %v10460_v26, %v7564_v25  ;;  %v10444_v38 = vld [vmem:[#allocation7 + $0x16c] sm:$0xf0] }
  0x66   :  { %v7573_v36 = vor.u32 %v10461_v31, %v7572_v30  ;;  %v7501_v46 = vor.u32 %v10444_v38, %v7500_v37  ;;  %v10538_v25 = vld [vmem:[#allocation8 + $0x60] sm:$0xff]  ;;  %v10528_v30 = vld [vmem:[#allocation8 + $0x10] sm:$0xff]  ;;  %v10553_v31 = vld [vmem:[#allocation8 + $0xd8] sm:$0xff] }
  0x67   :  { %980 = vmatpush.bf16.msra.mxu0 %v7613_v50  ;;  %993 = vmatpush.bf16.msra.mxu1 %v7617_v51  ;;  %v7829_v50 = vor.u32 %v10525_v42, %v7828_v41  ;;  %v7756_v51 = vld [vmem:[#allocation7 + $0x330] sm:$0xf]  ;;  %v7502_v41 = vld [vmem:[#allocation7 + $0x170] sm:$0xf0]  ;;  %v7508_v42 = vld [vmem:[#allocation7 + $0x138] sm:$0xf] }
  0x68   :  { %1006 = vmatpush.bf16.msra.mxu2 %v7621_v52  ;;  %v10508_v52 = vld [vmem:[#allocation7 + $0x36c] sm:$0xf0]  ;;  %v10546_v26 = vld [vmem:[#allocation8 + $0xa0] sm:$0xff]  ;;  %v10543_v38 = vld [vmem:[#allocation8 + $0x88] sm:$0xff] }
  0x69   :  { %1019 = vmatpush.bf16.msra.mxu3 %v7625_v56  ;;  %v7764_v56 = vld [vmem:[#allocation7 + $0x338] sm:$0xf]  ;;  %v7757_v60 = vor.u32 %v10508_v52, %v7756_v51  ;;  %v10420_v51 = vld [vmem:[#allocation7 + $0xb4] sm:$0xf] }
  0x6a   :  { %v7441_v59 = vor.u32 %v10420_v51, %v7438_v53  ;;  %v1089_v37 = vld [vmem:[%s11560_s3] sm:$0xff] }
  0x6b   :  { %981 = vmatpush.bf16.msra.mxu0 %v7549_v62  ;;  %994 = vmatpush.bf16.msra.mxu1 %v7553_v0  ;;  %v7765_v62 = vor.u32 %v10509_v57, %v7764_v56  ;;  %v10492_v0 = vld [vmem:[#allocation7 + $0x2ec] sm:$0xf0]  ;;  %v10421_v56 = vld [vmem:[#allocation7 + $0xbc] sm:$0xf]  ;;  %1092 = vst [vmem:[#allocation1] ss:$9 sm:$0xff] %v1089_v37 }
  0x6c   :  { %1007 = vmatpush.bf16.msra.mxu2 %v7557_v1  ;;  %v10484_v1 = vld [vmem:[#allocation7 + $0x2b4] sm:$0xf]  ;;  %v7693_v9 = vor.u32 %v10492_v0, %v7692_v63  ;;  %v7446_v57 = vld [vmem:[#allocation7 + $0xf8] sm:$0xf0]  ;;  %v10563_v51 = vld [vmem:[#allocation8 + $0x128] sm:$0xff] }
  0x6d   :  { %1020 = vmatpush.bf16.msra.mxu3 %v7561_v6  ;;  %v10493_v6 = vld [vmem:[#allocation7 + $0x2f4] sm:$0xf0]  ;;  %v7697_v10 = vor.u32 %v10484_v1, %v7694_v4  ;;  %v10404_v63 = vld [vmem:[#allocation7 + $0x34] sm:$0xf]  ;;  %v7449_v0 = vor.u32 %v10421_v56, %v7446_v57  ;;  %v10571_v53 = vld [vmem:[#allocation8 + $0x168] sm:$0xff] }
  0x6e   :  { %v7374_v1 = vld [vmem:[#allocation7 + $0x70] sm:$0xf0]  ;;  %v10413_v4 = vld [vmem:[#allocation7 + $0x74] sm:$0xf0]  ;;  %v10562_v57 = vld [vmem:[#allocation8 + $0x120] sm:$0xff] }
  0x6f   :  { %982 = vmatpush.bf16.msra.mxu0 %v7485_v11  ;;  %995 = vmatpush.bf16.msra.mxu1 %v7489_v12  ;;  %v7701_v11 = vor.u32 %v10493_v6, %v7700_v5  ;;  %v7628_v12 = vld [vmem:[#allocation7 + $0x230] sm:$0xf]  ;;  %v10405_v5 = vld [vmem:[#allocation7 + $0x3c] sm:$0xf]  ;;  %v7377_v8 = vor.u32 %v10404_v63, %v7374_v1  ;;  %v10586_v1 = vld [vmem:[#allocation8 + $0x1e0] sm:$0xff] }
  0x70   :  { %1008 = vmatpush.bf16.msra.mxu2 %v7493_v14  ;;  %v10476_v14 = vld [vmem:[#allocation7 + $0x26c] sm:$0xf0]  ;;  %v7382_v6 = vld [vmem:[#allocation7 + $0x78] sm:$0xf0] }
  0x71   :  { %1021 = vmatpush.bf16.msra.mxu3 %v7497_v18  ;;  %v7636_v18 = vld [vmem:[#allocation7 + $0x238] sm:$0xf]  ;;  %v7629_v22 = vor.u32 %v10476_v14, %v7628_v12 }
  0x72   :  { %v10541_v12 = vld [vmem:[#allocation8 + $0x78] sm:$0xff]  ;;  %v1095_v63 = vld [vmem:[#allocation1 + $0x12] sm:$0xff] }
  0x73   :  { %983 = vmatpush.bf16.msra.mxu0 %v7421_v24  ;;  %996 = vmatpush.bf16.msra.mxu1 %v7425_v27  ;;  %v7637_v24 = vor.u32 %v10477_v19, %v7636_v18  ;;  %v10452_v27 = vld [vmem:[#allocation7 + $0x1b4] sm:$0xf]  ;;  %v10549_v14 = vld [vmem:[#allocation8 + $0xb8] sm:$0xff]  ;;  %v10531_v19 = vld [vmem:[#allocation8 + $0x28] sm:$0xff] }
  0x74   :  { %1009 = vmatpush.bf16.msra.mxu2 %v7429_v28  ;;  %v7641_v28 = vor.u32 %v10469_v20, %v7638_v21  ;;  %v7569_v35 = vor.u32 %v10452_v27, %v7566_v29  ;;  %v10548_v18 = vld [vmem:[#allocation8 + $0xb0] sm:$0xff]  ;;  %v10539_v21 = vld [vmem:[#allocation8 + $0x68] sm:$0xff]  ;;  %v10554_v27 = vld [vmem:[#allocation8 + $0xe0] sm:$0xff] }
  0x75   :  { %1022 = vmatpush.bf16.msra.mxu3 %v7433_v32  ;;  %v10453_v32 = vld [vmem:[#allocation7 + $0x1bc] sm:$0xf]  ;;  %v10556_v20 = vld [vmem:[#allocation8 + $0xf0] sm:$0xff] }
  0x76   :  { %v7577_v40 = vor.u32 %v10453_v32, %v7574_v33  ;;  %v10545_v29 = vld [vmem:[#allocation8 + $0x98] sm:$0xff]  ;;  %v10536_v32 = vld [vmem:[#allocation8 + $0x50] sm:$0xff] }
  0x77   :  { %984 = vmatpush.bf16.msra.mxu0 %v7357_v39  ;;  %997 = vmatpush.bf16.msra.mxu1 %v7361_v43  ;;  %v10436_v39 = vld [vmem:[#allocation7 + $0x134] sm:$0xf]  ;;  %v10445_v43 = vld [vmem:[#allocation7 + $0x174] sm:$0xf0] }
  0x78   :  { %1010 = vmatpush.bf16.msra.mxu2 %v7365_v44  ;;  %v10437_v44 = vld [vmem:[#allocation7 + $0x13c] sm:$0xf]  ;;  %v10544_v33 = vld [vmem:[#allocation8 + $0x90] sm:$0xff] }
  0x79   :  { %1023 = vmatpush.bf16.msra.mxu3 %v7369_v47  ;;  %v7505_v47 = vor.u32 %v10436_v39, %v7502_v41  ;;  %v7513_v52 = vor.u32 %v10437_v44, %v7510_v45  ;;  %v10526_v39 = vld [vmem:[#allocation8] sm:$0xff]  ;;  %v1094_v56 = vld [vmem:[#allocation1 + $0x9] sm:$0xff] }
  0x7a   :  { %985 = vmatmul.bf16.vlgmr.msra.gmra.mxu0 %v11398_v13  ;;  %998 = vmatmul.bf16.vlgmr.msra.gmra.mxu1 %v11398_v13  ;;  %v10534_v41 = vld [vmem:[#allocation8 + $0x40] sm:$0xff] }
  0x7b   :  { %1029 = vmatpush.bf16.msrb.mxu0 %v7821_v48  ;;  %1042 = vmatpush.bf16.msrb.mxu1 %v7825_v49  ;;  %v7509_v48 = vor.u32 %v10445_v43, %v7508_v42  ;;  %v7436_v49 = vld [vmem:[#allocation7 + $0xb0] sm:$0xf]  ;;  %v10565_v42 = vld [vmem:[#allocation8 + $0x138] sm:$0xff]  ;;  %v10542_v44 = vld [vmem:[#allocation8 + $0x80] sm:$0xff] }
  0x7c   :  { %1055 = vmatpush.bf16.msrb.mxu2 %v7829_v50  ;;  %1024 = vmatmul.bf16.vlgmr.msra.gmra.mxu3 %v11398_v13  ;;  %v10428_v50 = vld [vmem:[#allocation7 + $0xec] sm:$0xf0]  ;;  %v10573_v43 = vld [vmem:[#allocation8 + $0x178] sm:$0xff]  ;;  %v10550_v45 = vld [vmem:[#allocation8 + $0xc0] sm:$0xff] }
  0x7d   :  { %1068 = vmatpush.bf16.msrb.mxu3 %v7833_v54  ;;  %1011 = vmatmul.bf16.vlgmr.msra.gmra.mxu2 %v11398_v13  ;;  %v7444_v54 = vld [vmem:[#allocation7 + $0xb8] sm:$0xf]  ;;  %v7437_v58 = vor.u32 %v10428_v50, %v7436_v49  ;;  %v10572_v49 = vld [vmem:[#allocation8 + $0x170] sm:$0xff] }
  0x7e   :  { %v10580_v50 = vld [vmem:[#allocation8 + $0x1b0] sm:$0xff] }
  0x7f   :  { %1030 = vmatpush.bf16.msrb.mxu0 %v7757_v60  ;;  %1043 = vmatpush.bf16.msrb.mxu1 %v7761_v61  ;;  %v7445_v60 = vor.u32 %v10429_v55, %v7444_v54  ;;  %v7372_v61 = vld [vmem:[#allocation7 + $0x30] sm:$0xf]  ;;  %v10579_v54 = vld [vmem:[#allocation8 + $0x1a8] sm:$0xff] }
  0x80   :  { %1056 = vmatpush.bf16.msrb.mxu2 %v7765_v62  ;;  %v10412_v62 = vld [vmem:[#allocation7 + $0x6c] sm:$0xf0] }
  0x81   :  { %1069 = vmatpush.bf16.msrb.mxu3 %v7769_v2  ;;  %v7380_v2 = vld [vmem:[#allocation7 + $0x38] sm:$0xf]  ;;  %v7373_v7 = vor.u32 %v10412_v62, %v7372_v61  ;;  %v1093_v55 = vld [vmem:[#allocation1] sm:$0xff]  ;;  %v1114_v61 = vpack.i.b16 %v1094_v56, %v1094_v56  ;;  %v10578_v62 = vld [vmem:[#allocation8 + $0x1a0] sm:$0xff] }
  0x83   :  { %1031 = vmatpush.bf16.msrb.mxu0 %v7693_v9  ;;  %1044 = vmatpush.bf16.msrb.mxu1 %v7697_v10  ;;  %v7381_v9 = vor.u32 %v10413_v4, %v7380_v2  ;;  %v7385_v10 = vor.u32 %v10405_v5, %v7382_v6  ;;  %v1096_v2 = vld [vmem:[#allocation1 + $0x1b] sm:$0xff]  ;;  %v10569_v4 = vld [vmem:[#allocation8 + $0x158] sm:$0xff]  ;;  %v1116_v6 = vperm.slane %v1114_v61, 0 }
  0x84   :  { %1057 = vmatpush.bf16.msrb.mxu2 %v7701_v11  ;;  %v10533_v11 = vld [vmem:[#allocation8 + $0x38] sm:$0xff] }
  0x85   :  { %1070 = vmatpush.bf16.msrb.mxu3 %v7705_v16  ;;  %v10557_v16 = vld [vmem:[#allocation8 + $0xf8] sm:$0xff] }
  0x87   :  { %1032 = vmatpush.bf16.msrb.mxu0 %v7629_v22  ;;  %1045 = vmatpush.bf16.msrb.mxu1 %v7633_v23  ;;  %v10547_v22 = vld [vmem:[#allocation8 + $0xa8] sm:$0xff]  ;;  %v10530_v23 = vld [vmem:[#allocation8 + $0x20] sm:$0xff] }
  0x88   :  { %1058 = vmatpush.bf16.msrb.mxu2 %v7637_v24  ;;  %v10555_v24 = vld [vmem:[#allocation8 + $0xe8] sm:$0xff] }
  0x89   :  { %1071 = vmatpush.bf16.msrb.mxu3 %v7641_v28  ;;  %v10537_v28 = vld [vmem:[#allocation8 + $0x58] sm:$0xff] }
  0x8b   :  { %1033 = vmatpush.bf16.msrb.mxu0 %v7565_v34  ;;  %1046 = vmatpush.bf16.msrb.mxu1 %v7569_v35  ;;  %v10527_v34 = vld [vmem:[#allocation8 + $0x8] sm:$0xff]  ;;  %v10552_v35 = vld [vmem:[#allocation8 + $0xd0] sm:$0xff] }
  0x8c   :  { %1059 = vmatpush.bf16.msrb.mxu2 %v7573_v36  ;;  %v10535_v36 = vld [vmem:[#allocation8 + $0x48] sm:$0xff] }
  0x8d   :  { %1072 = vmatpush.bf16.msrb.mxu3 %v7577_v40  ;;  %v10551_v40 = vld [vmem:[#allocation8 + $0xc8] sm:$0xff] }
  0x8f   :  { %1034 = vmatpush.bf16.msrb.mxu0 %v7501_v46  ;;  %1047 = vmatpush.bf16.msrb.mxu1 %v7505_v47  ;;  %v10581_v46 = vld [vmem:[#allocation8 + $0x1b8] sm:$0xff]  ;;  %v10564_v47 = vld [vmem:[#allocation8 + $0x130] sm:$0xff] }
  0x90   :  { %1060 = vmatpush.bf16.msrb.mxu2 %v7509_v48  ;;  %v10589_v48 = vld [vmem:[#allocation8 + $0x1f8] sm:$0xff] }
  0x91   :  { %1073 = vmatpush.bf16.msrb.mxu3 %v7513_v52  ;;  %v10588_v52 = vld [vmem:[#allocation8 + $0x1f0] sm:$0xff] }
  0x93   :  { %1035 = vmatpush.bf16.msrb.mxu0 %v7437_v58  ;;  %1048 = vmatpush.bf16.msrb.mxu1 %v7441_v59  ;;  %v10587_v58 = vld [vmem:[#allocation8 + $0x1e8] sm:$0xff]  ;;  %v10570_v59 = vld [vmem:[#allocation8 + $0x160] sm:$0xff] }
  0x94   :  { %1061 = vmatpush.bf16.msrb.mxu2 %v7445_v60  ;;  %v1111_v60 = vpack.i.b16 %v1093_v55, %v1093_v55  ;;  %v1090_v55 = vld [vmem:[%s11560_s3 + $0x8] sm:$0xff] }
  0x95   :  { %1074 = vmatpush.bf16.msrb.mxu3 %v7449_v0  ;;  %v10561_v0 = vld [vmem:[#allocation8 + $0x118] sm:$0xff] }
  0x96   :  { %v1113_v5 = vperm.slane %v1111_v60, 0  ;;  %v10604_v60 = vld [vmem:[#allocation8 + $0x270] sm:$0xff] }
  0x97   :  { %1036 = vmatpush.bf16.msrb.mxu0 %v7373_v7  ;;  %1049 = vmatpush.bf16.msrb.mxu1 %v7377_v8  ;;  %v1117_v7 = vpack.i.b16 %v1095_v63, %v1095_v63  ;;  %v10577_v8 = vld [vmem:[#allocation8 + $0x198] sm:$0xff]  ;;  %v10582_v63 = vld [vmem:[#allocation8 + $0x1c0] sm:$0xff] }
  0x98   :  { %1062 = vmatpush.bf16.msrb.mxu2 %v7381_v9  ;;  %v1120_v9 = vpack.i.b16 %v1096_v2, %v1096_v2 }
  0x99   :  { %1075 = vmatpush.bf16.msrb.mxu3 %v7385_v10 }
  0x9a   :  { %1037 = vmatmul.bf16.vlgmr.msrb.gmra.mxu0 %v11398_v13  ;;  %1050 = vmatmul.bf16.vlgmr.msrb.gmra.mxu1 %v11398_v13 }
  0x9b   :  { %2291 = vmatpush.bf16.msra.mxu0 %v10533_v11  ;;  %2304 = vmatpush.bf16.msra.mxu1 %v10541_v12  ;;  %v10560_v11 = vld [vmem:[#allocation8 + $0x110] sm:$0xff]  ;;  %v10585_v12 = vld [vmem:[#allocation8 + $0x1d8] sm:$0xff] }
  0x9c   :  { %1063 = vmatmul.bf16.vlgmr.msrb.gmra.mxu2 %v11398_v13  ;;  %1076 = vmatmul.bf16.vlgmr.msrb.gmra.mxu3 %v11398_v13  ;;  %v10529_v13 = vld [vmem:[#allocation8 + $0x18] sm:$0xff] }
  0x9d   :  { %2317 = vmatpush.bf16.msra.mxu2 %v10549_v14  ;;  %2330 = vmatpush.bf16.msra.mxu3 %v10557_v16 }
  0x9f   :  { %2292 = vmatpush.bf16.msra.mxu0 %v10532_v15  ;;  %2305 = vmatpush.bf16.msra.mxu1 %v10540_v17  ;;  %v10568_v15 = vld [vmem:[#allocation8 + $0x150] sm:$0xff]  ;;  %v1175_v17 = vunpack.c.l.bf16 %v1113_v5  ;;  %v10595_v5 = vld [vmem:[#allocation8 + $0x228] sm:$0xff] }
  0xa1   :  { %2318 = vmatpush.bf16.msra.mxu2 %v10548_v18  ;;  %2331 = vmatpush.bf16.msra.mxu3 %v10556_v20  ;;  %v1176_v18 = vunpack.c.l.bf16 %v1116_v6  ;;  %v10576_v20 = vld [vmem:[#allocation8 + $0x190] sm:$0xff]  ;;  %v10603_v6 = vld [vmem:[#allocation8 + $0x268] sm:$0xff] }
  0xa3   :  { %2293 = vmatpush.bf16.msra.mxu0 %v10531_v19  ;;  %2306 = vmatpush.bf16.msra.mxu1 %v10539_v21  ;;  %v1119_v19 = vperm.slane %v1117_v7, 0  ;;  %v10612_v7 = vld [vmem:[#allocation8 + $0x2b0] sm:$0xff] }
  0xa5   :  { %2319 = vmatpush.bf16.msra.mxu2 %v10547_v22  ;;  %2332 = vmatpush.bf16.msra.mxu3 %v10555_v24  ;;  %v1122_v22 = vperm.slane %v1120_v9, 0 }
  0xa7   :  { %2294 = vmatpush.bf16.msra.mxu0 %v10530_v23  ;;  %2307 = vmatpush.bf16.msra.mxu1 %v10538_v25  ;;  %v10559_v25 = vld [vmem:[#allocation8 + $0x108] sm:$0xff] }
  0xa9   :  { %2320 = vmatpush.bf16.msra.mxu2 %v10546_v26  ;;  %2333 = vmatpush.bf16.msra.mxu3 %v10554_v27  ;;  %v10584_v26 = vld [vmem:[#allocation8 + $0x1d0] sm:$0xff] }
  0xab   :  { %2295 = vmatpush.bf16.msra.mxu0 %v10529_v13  ;;  %2308 = vmatpush.bf16.msra.mxu1 %v10537_v28  ;;  %v10567_v13 = vld [vmem:[#allocation8 + $0x148] sm:$0xff] }
  0xad   :  { %2321 = vmatpush.bf16.msra.mxu2 %v10545_v29  ;;  %2334 = vmatpush.bf16.msra.mxu3 %v10553_v31  ;;  %v10575_v31 = vld [vmem:[#allocation8 + $0x188] sm:$0xff] }
  0xaf   :  { %2296 = vmatpush.bf16.msra.mxu0 %v10528_v30  ;;  %2309 = vmatpush.bf16.msra.mxu1 %v10536_v32  ;;  %v1177_v30 = vunpack.c.l.bf16 %v1119_v19 }
  0xb1   :  { %2322 = vmatpush.bf16.msra.mxu2 %v10544_v33  ;;  %2335 = vmatpush.bf16.msra.mxu3 %v10552_v35  ;;  %v1178_v33 = vunpack.c.l.bf16 %v1122_v22  ;;  %v10619_v22 = vld [vmem:[#allocation8 + $0x2e8] sm:$0xff] }
  0xb3   :  { %2297 = vmatpush.bf16.msra.mxu0 %v10527_v34  ;;  %2310 = vmatpush.bf16.msra.mxu1 %v10535_v36 }
  0xb5   :  { %2323 = vmatpush.bf16.msra.mxu2 %v10543_v38  ;;  %2336 = vmatpush.bf16.msra.mxu3 %v10551_v40  ;;  %v10558_v38 = vld [vmem:[#allocation8 + $0x100] sm:$0xff] }
  0xb7   :  { %2298 = vmatpush.bf16.msra.mxu0 %v10526_v39  ;;  %2311 = vmatpush.bf16.msra.mxu1 %v10534_v41  ;;  %v882_v10 = vpop.f32.mrf.mxu0  ;;  %v895_v14 = vpop.f32.mrf.mxu1  ;;  %v10566_v39 = vld [vmem:[#allocation8 + $0x140] sm:$0xff] }
  0xb8   :  { %v1081_v16 = vpack.c.bf16 %v895_v14, %v882_v10  ;;  %v10620_v10 = vld [vmem:[#allocation8 + $0x2f0] sm:$0xff] }
  0xb9   :  { %2324 = vmatpush.bf16.msra.mxu2 %v10542_v44  ;;  %2337 = vmatpush.bf16.msra.mxu3 %v10550_v45  ;;  %v10597_v44 = vld [vmem:[#allocation8 + $0x238] sm:$0xff] }
  0xba   :  { %v1159_v23 = vunpack.c.l.bf16 %v1081_v16  ;;  %v1160_v24 = vunpack.c.h.bf16 %v1081_v16  ;;  %v10605_v45 = vld [vmem:[#allocation8 + $0x278] sm:$0xff]  ;;  %v10602_v16 = vld [vmem:[#allocation8 + $0x260] sm:$0xff] }
  0xbb   :  { %2343 = vmatpush.bf16.msrb.mxu0 %v10565_v42  ;;  %2356 = vmatpush.bf16.msrb.mxu1 %v10573_v43 }
  0xbc   :  { %v1191_v27 = vadd.f32 %v1175_v17, %v1159_v23  ;;  %v1192_v28 = vadd.f32 %v1176_v18, %v1160_v24  ;;  %v10611_v18 = vld [vmem:[#allocation8 + $0x2a8] sm:$0xff] }
  0xbd   :  { %2369 = vmatpush.bf16.msrb.mxu2 %v10581_v46  ;;  %2382 = vmatpush.bf16.msrb.mxu3 %v10589_v48  ;;  %v1099_v46 = vld [vmem:[#allocation1 + $0x36] sm:$0xff] }
  0xbe   :  { %v1231_v34 = vmax.f32 %v1191_v27, 0.0  ;;  %v1232_v35 = vmax.f32 %v1192_v28, 0.0  ;;  %v10583_v48 = vld [vmem:[#allocation8 + $0x1c8] sm:$0xff]  ;;  %v10601_v27 = vld [vmem:[#allocation8 + $0x258] sm:$0xff] }
  0xbf   :  { %2344 = vmatpush.bf16.msrb.mxu0 %v10564_v47  ;;  %2357 = vmatpush.bf16.msrb.mxu1 %v10572_v49  ;;  %v921_v29 = vpop.f32.mrf.mxu3  ;;  %v884_v36 = vpop.f32.mrf.mxu0  ;;  %v1100_v47 = vld [vmem:[#allocation1 + $0x3f] sm:$0xff]  ;;  %v10574_v49 = vld [vmem:[#allocation8 + $0x180] sm:$0xff] }
  0xc0   :  { %v908_v21 = vpop.f32.mrf.mxu2  ;;  %v897_v37 = vpop.f32.mrf.mxu1  ;;  %v1247_v42 = vpack.c.bf16 %v1231_v34, %v1231_v34  ;;  %v1248_v43 = vpack.c.bf16 %v1232_v35, %v1232_v35 }
  0xc1   :  { %2370 = vmatpush.bf16.msrb.mxu2 %v10580_v50  ;;  %2383 = vmatpush.bf16.msrb.mxu3 %v10588_v52  ;;  %v1082_v32 = vpack.c.bf16 %v921_v29, %v908_v21  ;;  %v10610_v29 = vld [vmem:[#allocation8 + $0x2a0] sm:$0xff] }
  0xc2   :  { %2299 = vmatmul.bf16.vlgmr.msra.gmra.mxu0 %v1247_v42  ;;  %2312 = vmatmul.bf16.vlgmr.msra.gmra.mxu1 %v1248_v43  ;;  %v10592_v43 = vld [vmem:[#allocation8 + $0x210] sm:$0xff] }
  0xc3   :  { %2345 = vmatpush.bf16.msrb.mxu0 %v10563_v51  ;;  %2358 = vmatpush.bf16.msrb.mxu1 %v10571_v53  ;;  %v1161_v40 = vunpack.c.l.bf16 %v1082_v32  ;;  %v1162_v41 = vunpack.c.h.bf16 %v1082_v32  ;;  %v1097_v53 = vld [vmem:[#allocation1 + $0x24] sm:$0xff] }
  0xc5   :  { %2371 = vmatpush.bf16.msrb.mxu2 %v10579_v54  ;;  %2384 = vmatpush.bf16.msrb.mxu3 %v10587_v58  ;;  %v1193_v50 = vadd.f32 %v1177_v30, %v1161_v40  ;;  %v1194_v51 = vadd.f32 %v1178_v33, %v1162_v41  ;;  %v1098_v54 = vld [vmem:[#allocation1 + $0x2d] sm:$0xff] }
  0xc6   :  { %1102 = vst [vmem:[#allocation1] ss:$9 sm:$0xff] %v1090_v55  ;;  %v1126_v2 = vpack.i.b16 %v1098_v54, %v1098_v54  ;;  %v10618_v33 = vld [vmem:[#allocation8 + $0x2e0] sm:$0xff]  ;;  %v10591_v55 = vld [vmem:[#allocation8 + $0x208] sm:$0xff] }
  0xc7   :  { %2346 = vmatpush.bf16.msrb.mxu0 %v10562_v57  ;;  %2359 = vmatpush.bf16.msrb.mxu1 %v10570_v59  ;;  %v1233_v56 = vmax.f32 %v1193_v50, 0.0  ;;  %v1234_v57 = vmax.f32 %v1194_v51, 0.0  ;;  %v923_v58 = vpop.f32.mrf.mxu3  ;;  %v10596_v59 = vld [vmem:[#allocation8 + $0x230] sm:$0xff] }
  0xc8   :  { %v910_v52 = vpop.f32.mrf.mxu2  ;;  %v1128_v9 = vperm.slane %v1126_v2, 0 }
  0xc9   :  { %2372 = vmatpush.bf16.msrb.mxu2 %v10578_v62  ;;  %2385 = vmatpush.bf16.msrb.mxu3 %v10586_v1  ;;  %v1249_v61 = vpack.c.bf16 %v1233_v56, %v1233_v56  ;;  %v1250_v62 = vpack.c.bf16 %v1234_v57, %v1234_v57  ;;  %v1123_v1 = vpack.i.b16 %v1097_v53, %v1097_v53  ;;  %v10599_v56 = vld [vmem:[#allocation8 + $0x248] sm:$0xff] }
  0xca   :  { %v1180_v21 = vunpack.c.l.bf16 %v1128_v9  ;;  %v10636_v9 = vld [vmem:[#allocation8 + $0x370] sm:$0xff] }
  0xcb   :  { %2347 = vmatpush.bf16.msrb.mxu0 %v10561_v0  ;;  %2360 = vmatpush.bf16.msrb.mxu1 %v10569_v4  ;;  %v10613_v0 = vld [vmem:[#allocation8 + $0x2b8] sm:$0xff] }
  0xcc   :  { %v10621_v4 = vld [vmem:[#allocation8 + $0x2f8] sm:$0xff]  ;;  %2325 = vmatmul.bf16.vlgmr.msra.gmra.mxu2 %v1249_v61  ;;  %2338 = vmatmul.bf16.vlgmr.msra.gmra.mxu3 %v1250_v62  ;;  %v10590_v61 = vld [vmem:[#allocation8 + $0x200] sm:$0xff] }
  0xcd   :  { %2373 = vmatpush.bf16.msrb.mxu2 %v10577_v8  ;;  %2386 = vmatpush.bf16.msrb.mxu3 %v10585_v12  ;;  %v1125_v8 = vperm.slane %v1123_v1, 0  ;;  %v1132_v12 = vpack.i.b16 %v1100_v47, %v1100_v47  ;;  %v10609_v47 = vld [vmem:[#allocation8 + $0x298] sm:$0xff]  ;;  %v10598_v62 = vld [vmem:[#allocation8 + $0x240] sm:$0xff] }
  0xce   :  { %v10637_v1 = vld [vmem:[#allocation8 + $0x378] sm:$0xff] }
  0xcf   :  { %2348 = vmatpush.bf16.msrb.mxu0 %v10560_v11  ;;  %2361 = vmatpush.bf16.msrb.mxu1 %v10568_v15  ;;  %v1129_v11 = vpack.i.b16 %v1099_v46, %v1099_v46  ;;  %v10594_v15 = vld [vmem:[#allocation8 + $0x220] sm:$0xff]  ;;  %v1134_v24 = vperm.slane %v1132_v12, 0  ;;  %v1104_v2 = vld [vmem:[#allocation1 + $0x9] sm:$0xff] }
  0xd0   :  { %v10645_v12 = vld [vmem:[#allocation8 + $0x3b8] sm:$0xff] }
  0xd1   :  { %2374 = vmatpush.bf16.msrb.mxu2 %v10576_v20  ;;  %2387 = vmatpush.bf16.msrb.mxu3 %v10584_v26  ;;  %v1179_v20 = vunpack.c.l.bf16 %v1125_v8  ;;  %v1131_v23 = vperm.slane %v1129_v11, 0  ;;  %v1182_v36 = vunpack.c.l.bf16 %v1134_v24  ;;  %v10628_v8 = vld [vmem:[#allocation8 + $0x330] sm:$0xff]  ;;  %v10614_v11 = vld [vmem:[#allocation8 + $0x2c0] sm:$0xff] }
  0xd3   :  { %2349 = vmatpush.bf16.msrb.mxu0 %v10559_v25  ;;  %2362 = vmatpush.bf16.msrb.mxu1 %v10567_v13  ;;  %v10593_v13 = vld [vmem:[#allocation8 + $0x218] sm:$0xff]  ;;  %v1181_v35 = vunpack.c.l.bf16 %v1131_v23  ;;  %v10652_v23 = vld [vmem:[#allocation8 + $0x3f0] sm:$0xff] }
  0xd5   :  { %2375 = vmatpush.bf16.msrb.mxu2 %v10575_v31  ;;  %2388 = vmatpush.bf16.msrb.mxu3 %v10583_v48  ;;  %v10617_v48 = vld [vmem:[#allocation8 + $0x2d8] sm:$0xff] }
  0xd7   :  { %2350 = vmatpush.bf16.msrb.mxu0 %v10558_v38  ;;  %2363 = vmatpush.bf16.msrb.mxu1 %v10566_v39  ;;  %v934_v14 = vpop.f32.mrf.mxu0  ;;  %v947_v17 = vpop.f32.mrf.mxu1 }
  0xd8   :  { %v1083_v19 = vpack.c.bf16 %v947_v17, %v934_v14  ;;  %v10653_v14 = vld [vmem:[#allocation8 + $0x3f8] sm:$0xff] }
  0xd9   :  { %2376 = vmatpush.bf16.msrb.mxu2 %v10574_v49  ;;  %2389 = vmatpush.bf16.msrb.mxu3 %v10582_v63  ;;  %v1103_v63 = vld [vmem:[#allocation1] sm:$0xff] }
  0xda   :  { %v1163_v25 = vunpack.c.l.bf16 %v1083_v19  ;;  %v1164_v26 = vunpack.c.h.bf16 %v1083_v19  ;;  %v10627_v19 = vld [vmem:[#allocation8 + $0x328] sm:$0xff] }
  0xdb   :  { %2395 = vmatpush.bf16.msra.mxu0 %v10597_v44  ;;  %2408 = vmatpush.bf16.msra.mxu1 %v10605_v45  ;;  %v10600_v44 = vld [vmem:[#allocation8 + $0x250] sm:$0xff] }
  0xdc   :  { %v1195_v31 = vadd.f32 %v1179_v20, %v1163_v25  ;;  %v1196_v32 = vadd.f32 %v1180_v21, %v1164_v26  ;;  %v10635_v20 = vld [vmem:[#allocation8 + $0x368] sm:$0xff] }
  0xdd   :  { %2421 = vmatpush.bf16.msra.mxu2 %v10613_v0  ;;  %2434 = vmatpush.bf16.msra.mxu3 %v10621_v4  ;;  %v10629_v0 = vld [vmem:[#allocation8 + $0x338] sm:$0xff]  ;;  %v10607_v4 = vld [vmem:[#allocation8 + $0x288] sm:$0xff] }
  0xde   :  { %v1235_v37 = vmax.f32 %v1195_v31, 0.0  ;;  %v1236_v38 = vmax.f32 %v1196_v32, 0.0 }
  0xdf   :  { %2396 = vmatpush.bf16.msra.mxu0 %v10596_v59  ;;  %2409 = vmatpush.bf16.msra.mxu1 %v10604_v60  ;;  %v973_v30 = vpop.f32.mrf.mxu3  ;;  %v936_v39 = vpop.f32.mrf.mxu0  ;;  %v10608_v59 = vld [vmem:[#allocation8 + $0x290] sm:$0xff] }
  0xe0   :  { %v960_v28 = vpop.f32.mrf.mxu2  ;;  %v949_v42 = vpop.f32.mrf.mxu1  ;;  %v1251_v45 = vpack.c.bf16 %v1235_v37, %v1235_v37  ;;  %v1252_v46 = vpack.c.bf16 %v1236_v38, %v1236_v38  ;;  %v10616_v60 = vld [vmem:[#allocation8 + $0x2d0] sm:$0xff]  ;;  %v10625_v39 = vld [vmem:[#allocation8 + $0x318] sm:$0xff] }
  0xe1   :  { %2422 = vmatpush.bf16.msra.mxu2 %v10612_v7  ;;  %2435 = vmatpush.bf16.msra.mxu3 %v10620_v10  ;;  %v1084_v34 = vpack.c.bf16 %v973_v30, %v960_v28  ;;  %v1138_v7 = vpack.i.b16 %v1104_v2, %v1104_v2  ;;  %v10606_v10 = vld [vmem:[#allocation8 + $0x280] sm:$0xff] }
  0xe2   :  { %2351 = vmatmul.bf16.vlgmr.msrb.gmra.mxu0 %v1251_v45  ;;  %2364 = vmatmul.bf16.vlgmr.msrb.gmra.mxu1 %v1252_v46  ;;  %v10634_v30 = vld [vmem:[#allocation8 + $0x360] sm:$0xff] }
  0xe3   :  { %2397 = vmatpush.bf16.msra.mxu0 %v10595_v5  ;;  %2410 = vmatpush.bf16.msra.mxu1 %v10603_v6  ;;  %v1165_v40 = vunpack.c.l.bf16 %v1084_v34  ;;  %v1166_v41 = vunpack.c.h.bf16 %v1084_v34  ;;  %v10615_v5 = vld [vmem:[#allocation8 + $0x2c8] sm:$0xff]  ;;  %v1135_v6 = vpack.i.b16 %v1103_v63, %v1103_v63  ;;  %v1140_v17 = vperm.slane %v1138_v7, 0  ;;  %v10640_v7 = vld [vmem:[#allocation8 + $0x390] sm:$0xff] }
  0xe4   :  { %v10651_v34 = vld [vmem:[#allocation8 + $0x3e8] sm:$0xff] }
  0xe5   :  { %2423 = vmatpush.bf16.msra.mxu2 %v10611_v18  ;;  %2436 = vmatpush.bf16.msra.mxu3 %v10619_v22  ;;  %v1197_v49 = vadd.f32 %v1181_v35, %v1165_v40  ;;  %v1198_v50 = vadd.f32 %v1182_v36, %v1166_v41  ;;  %v1106_v18 = vld [vmem:[#allocation1 + $0x1b] sm:$0xff]  ;;  %v1184_v28 = vunpack.c.l.bf16 %v1140_v17  ;;  %v10633_v40 = vld [vmem:[#allocation8 + $0x358] sm:$0xff] }
  0xe6   :  { %v10644_v22 = vld [vmem:[#allocation8 + $0x3b0] sm:$0xff]  ;;  %v1144_v26 = vpack.i.b16 %v1106_v18, %v1106_v18  ;;  %v10631_v63 = vld [vmem:[#allocation8 + $0x348] sm:$0xff]  ;;  %v10638_v18 = vld [vmem:[#allocation8 + $0x380] sm:$0xff] }
  0xe7   :  { %2398 = vmatpush.bf16.msra.mxu0 %v10594_v15  ;;  %2411 = vmatpush.bf16.msra.mxu1 %v10602_v16  ;;  %v1237_v51 = vmax.f32 %v1197_v49, 0.0  ;;  %v1238_v52 = vmax.f32 %v1198_v50, 0.0  ;;  %v975_v54 = vpop.f32.mrf.mxu3  ;;  %v1105_v15 = vld [vmem:[#allocation1 + $0x12] sm:$0xff]  ;;  %v1137_v16 = vperm.slane %v1135_v6, 0 }
  0xe8   :  { %v962_v53 = vpop.f32.mrf.mxu2  ;;  %v1141_v25 = vpack.i.b16 %v1105_v15, %v1105_v15  ;;  %v1146_v36 = vperm.slane %v1144_v26, 0  ;;  %v10642_v50 = vld [vmem:[#allocation8 + $0x3a0] sm:$0xff]  ;;  %v10624_v54 = vld [vmem:[#allocation8 + $0x310] sm:$0xff]  ;;  %v10647_v15 = vld [vmem:[#allocation8 + $0x3c8] sm:$0xff] }
  0xe9   :  { %2424 = vmatpush.bf16.msra.mxu2 %v10610_v29  ;;  %2437 = vmatpush.bf16.msra.mxu3 %v10618_v33  ;;  %v1253_v57 = vpack.c.bf16 %v1237_v51, %v1237_v51  ;;  %v1254_v58 = vpack.c.bf16 %v1238_v52, %v1238_v52  ;;  %v10626_v29 = vld [vmem:[#allocation8 + $0x320] sm:$0xff]  ;;  %v10643_v33 = vld [vmem:[#allocation8 + $0x3a8] sm:$0xff] }
  0xea   :  { %v1143_v35 = vperm.slane %v1141_v25, 0  ;;  %v10650_v51 = vld [vmem:[#allocation8 + $0x3e0] sm:$0xff] }
  0xeb   :  { %2399 = vmatpush.bf16.msra.mxu0 %v10593_v13  ;;  %2412 = vmatpush.bf16.msra.mxu1 %v10601_v27  ;;  %v1183_v27 = vunpack.c.l.bf16 %v1137_v16 }
  0xec   :  { %2377 = vmatmul.bf16.vlgmr.msrb.gmra.mxu2 %v1253_v57  ;;  %2390 = vmatmul.bf16.vlgmr.msrb.gmra.mxu3 %v1254_v58 }
  0xed   :  { %2425 = vmatpush.bf16.msra.mxu2 %v10609_v47  ;;  %2438 = vmatpush.bf16.msra.mxu3 %v10617_v48  ;;  %v1185_v47 = vunpack.c.l.bf16 %v1143_v35  ;;  %v1186_v48 = vunpack.c.l.bf16 %v1146_v36 }
  0xef   :  { %2400 = vmatpush.bf16.msra.mxu0 %v10592_v43  ;;  %2413 = vmatpush.bf16.msra.mxu1 %v10600_v44 }
  0xf1   :  { %2426 = vmatpush.bf16.msra.mxu2 %v10608_v59  ;;  %2439 = vmatpush.bf16.msra.mxu3 %v10616_v60  ;;  %v10641_v60 = vld [vmem:[#allocation8 + $0x398] sm:$0xff] }
  0xf3   :  { %2401 = vmatpush.bf16.msra.mxu0 %v10591_v55  ;;  %2414 = vmatpush.bf16.msra.mxu1 %v10599_v56  ;;  %v10632_v55 = vld [vmem:[#allocation8 + $0x350] sm:$0xff] }
  0xf5   :  { %2427 = vmatpush.bf16.msra.mxu2 %v10607_v4  ;;  %2440 = vmatpush.bf16.msra.mxu3 %v10615_v5 }
  0xf7   :  { %2402 = vmatpush.bf16.msra.mxu0 %v10590_v61  ;;  %2415 = vmatpush.bf16.msra.mxu1 %v10598_v62  ;;  %v986_v21 = vpop.f32.mrf.mxu0  ;;  %v999_v24 = vpop.f32.mrf.mxu1  ;;  %v10649_v61 = vld [vmem:[#allocation8 + $0x3d8] sm:$0xff]  ;;  %v10623_v62 = vld [vmem:[#allocation8 + $0x308] sm:$0xff] }
  0xf8   :  { %v1085_v13 = vpack.c.bf16 %v999_v24, %v986_v21 }
  0xf9   :  { %2428 = vmatpush.bf16.msra.mxu2 %v10606_v10  ;;  %2441 = vmatpush.bf16.msra.mxu3 %v10614_v11  ;;  %v10630_v10 = vld [vmem:[#allocation8 + $0x340] sm:$0xff]  ;;  %v1107_v11 = vld [vmem:[#allocation1 + $0x24] sm:$0xff] }
  0xfa   :  { %v1167_v31 = vunpack.c.l.bf16 %v1085_v13  ;;  %v1168_v32 = vunpack.c.h.bf16 %v1085_v13  ;;  %v1147_v16 = vpack.i.b16 %v1107_v11, %v1107_v11 }
  0xfb   :  { %2447 = vmatpush.bf16.msrb.mxu0 %v10629_v0  ;;  %2460 = vmatpush.bf16.msrb.mxu1 %v10637_v1 }
  0xfc   :  { %v1199_v37 = vadd.f32 %v1183_v27, %v1167_v31  ;;  %v1200_v38 = vadd.f32 %v1184_v28, %v1168_v32 }
  0xfd   :  { %2473 = vmatpush.bf16.msrb.mxu2 %v10645_v12  ;;  %2486 = vmatpush.bf16.msrb.mxu3 %v10653_v14  ;;  %v1108_v12 = vld [vmem:[#allocation1 + $0x2d] sm:$0xff]  ;;  %v10639_v14 = vld [vmem:[#allocation8 + $0x388] sm:$0xff] }
  0xfe   :  { %v1239_v42 = vmax.f32 %v1199_v37, 0.0  ;;  %v1240_v43 = vmax.f32 %v1200_v38, 0.0  ;;  %v1150_v17 = vpack.i.b16 %v1108_v12, %v1108_v12 }
  0xff   :  { %2448 = vmatpush.bf16.msrb.mxu0 %v10628_v8  ;;  %2461 = vmatpush.bf16.msrb.mxu1 %v10636_v9  ;;  %v1025_v44 = vpop.f32.mrf.mxu3  ;;  %v988_v45 = vpop.f32.mrf.mxu0  ;;  %v10648_v8 = vld [vmem:[#allocation8 + $0x3d0] sm:$0xff]  ;;  %v10622_v9 = vld [vmem:[#allocation8 + $0x300] sm:$0xff] }
 0x100   :  { %v1012_v41 = vpop.f32.mrf.mxu2  ;;  %v1001_v49 = vpop.f32.mrf.mxu1  ;;  %v1255_v52 = vpack.c.bf16 %v1239_v42, %v1239_v42  ;;  %v1256_v53 = vpack.c.bf16 %v1240_v43, %v1240_v43  ;;  %v1152_v21 = vperm.slane %v1150_v17, 0  ;;  %v8734_v17 = vld [vmem:[#allocation7 + $0x740] sm:$0xf0] }
 0x101   :  { %2474 = vmatpush.bf16.msrb.mxu2 %v10644_v22  ;;  %2487 = vmatpush.bf16.msrb.mxu3 %v10652_v23  ;;  %v1086_v46 = vpack.c.bf16 %v1025_v44, %v1012_v41  ;;  %v1109_v22 = vld [vmem:[#allocation1 + $0x36] sm:$0xff]  ;;  %v1110_v23 = vld [vmem:[#allocation1 + $0x3f] sm:$0xff] }
 0x102   :  { %2403 = vmatmul.bf16.vlgmr.msra.gmra.mxu0 %v1255_v52  ;;  %2416 = vmatmul.bf16.vlgmr.msra.gmra.mxu1 %v1256_v53  ;;  %v1153_v26 = vpack.i.b16 %v1109_v22, %v1109_v22  ;;  %v1156_v13 = vpack.i.b16 %v1110_v23, %v1110_v23  ;;  %v10751_v22 = vld [vmem:[#allocation7 + $0x70c] sm:$0xf] }
 0x103   :  { %2449 = vmatpush.bf16.msrb.mxu0 %v10627_v19  ;;  %2462 = vmatpush.bf16.msrb.mxu1 %v10635_v20  ;;  %v1169_v56 = vunpack.c.l.bf16 %v1086_v46  ;;  %v1170_v57 = vunpack.c.h.bf16 %v1086_v46  ;;  %v10646_v19 = vld [vmem:[#allocation8 + $0x3c0] sm:$0xff]  ;;  %v1149_v20 = vperm.slane %v1147_v16, 0 }
 0x104   :  { %v1155_v32 = vperm.slane %v1153_v26, 0  ;;  %v10750_v16 = vld [vmem:[#allocation7 + $0x704] sm:$0xf] }
 0x105   :  { %2475 = vmatpush.bf16.msrb.mxu2 %v10643_v33  ;;  %2488 = vmatpush.bf16.msrb.mxu3 %v10651_v34  ;;  %v1201_v58 = vadd.f32 %v1185_v47, %v1169_v56  ;;  %v1202_v59 = vadd.f32 %v1186_v48, %v1170_v57  ;;  %v1187_v28 = vunpack.c.l.bf16 %v1149_v20  ;;  %v1158_v33 = vperm.slane %v1156_v13, 0  ;;  %v11178_v57 = vld [vmem:[#allocation10] ss:$0 sm:$0xff]  ;;  %v8740_v20 = vld [vmem:[#allocation7 + $0x708] sm:$0xf] }
 0x106   :  { %v1189_v42 = vunpack.c.l.bf16 %v1155_v32 }
 0x107   :  { %2450 = vmatpush.bf16.msrb.mxu0 %v10626_v29  ;;  %2463 = vmatpush.bf16.msrb.mxu1 %v10634_v30  ;;  %v1241_v0 = vmax.f32 %v1201_v58, 0.0  ;;  %v1242_v1 = vmax.f32 %v1202_v59, 0.0  ;;  %v1027_v4 = vpop.f32.mrf.mxu3  ;;  %v1188_v29 = vunpack.c.l.bf16 %v1152_v21  ;;  %v1190_v43 = vunpack.c.l.bf16 %v1158_v33  ;;  %v10759_v21 = vld [vmem:[#allocation7 + $0x744] sm:$0xf0]  ;;  %v8670_v33 = vld [vmem:[#allocation7 + $0x6c0] sm:$0xf0] }
 0x108   :  { %v1014_v2 = vpop.f32.mrf.mxu2  ;;  %v8804_v4 = vld [vmem:[#allocation7 + $0x788] sm:$0xf]  ;;  %v8741_v23 = vor.u32 %v10759_v21, %v8740_v20  ;;  %v8486_v20 = vld [vmem:[#allocation7 + $0x548] sm:$0xf0] }
 0x109   :  { %2476 = vmatpush.bf16.msrb.mxu2 %v10642_v50  ;;  %2489 = vmatpush.bf16.msrb.mxu3 %v10650_v51  ;;  %v1257_v5 = vpack.c.bf16 %v1241_v0, %v1241_v0  ;;  %v1258_v6 = vpack.c.bf16 %v1242_v1, %v1242_v1  ;;  %v10766_v0 = vld [vmem:[#allocation7 + $0x784] sm:$0xf] }
 0x10a   :  { %v8798_v2 = vld [vmem:[#allocation7 + $0x7c0] sm:$0xf0] }
 0x10b   :  { %2451 = vmatpush.bf16.msrb.mxu0 %v10625_v39  ;;  %2464 = vmatpush.bf16.msrb.mxu1 %v10633_v40 }
 0x10c   :  { %2429 = vmatmul.bf16.vlgmr.msra.gmra.mxu2 %v1257_v5  ;;  %2442 = vmatmul.bf16.vlgmr.msra.gmra.mxu3 %v1258_v6  ;;  %v10775_v5 = vld [vmem:[#allocation7 + $0x7c4] sm:$0xf0]  ;;  %v8801_v6 = vor.u32 %v10766_v0, %v8798_v2  ;;  %v8550_v2 = vld [vmem:[#allocation7 + $0x5c8] sm:$0xf0] }
 0x10d   :  { %2477 = vmatpush.bf16.msrb.mxu2 %v10641_v60  ;;  %2490 = vmatpush.bf16.msrb.mxu3 %v10649_v61 }
 0x10f   :  { %2452 = vmatpush.bf16.msrb.mxu0 %v10624_v54  ;;  %2465 = vmatpush.bf16.msrb.mxu1 %v10632_v55 }
 0x111   :  { %2478 = vmatpush.bf16.msrb.mxu2 %v10640_v7  ;;  %2491 = vmatpush.bf16.msrb.mxu3 %v10648_v8  ;;  %v8805_v7 = vor.u32 %v10775_v5, %v8804_v4  ;;  %v10767_v8 = vld [vmem:[#allocation7 + $0x78c] sm:$0xf] }
 0x113   :  { %2453 = vmatpush.bf16.msrb.mxu0 %v10623_v62  ;;  %2466 = vmatpush.bf16.msrb.mxu1 %v10631_v63  ;;  %v8796_v62 = vld [vmem:[#allocation7 + $0x780] sm:$0xf] }
 0x114   :  { %v10774_v63 = vld [vmem:[#allocation7 + $0x7bc] sm:$0xf0] }
 0x115   :  { %2479 = vmatpush.bf16.msrb.mxu2 %v10639_v14  ;;  %2492 = vmatpush.bf16.msrb.mxu3 %v10647_v15  ;;  %v8797_v1 = vor.u32 %v10774_v63, %v8796_v62  ;;  %v10758_v15 = vld [vmem:[#allocation7 + $0x73c] sm:$0xf0]  ;;  %v10711_v62 = vld [vmem:[#allocation7 + $0x5c4] sm:$0xf0]  ;;  %v10703_v63 = vld [vmem:[#allocation7 + $0x58c] sm:$0xf] }
 0x116   :  { %v8553_v4 = vor.u32 %v10703_v63, %v8550_v2  ;;  %v10752_v2 = vld [vmem:[#allocation7 + $0x714] sm:$0xf] }
 0x117   :  { %2454 = vmatpush.bf16.msrb.mxu0 %v10622_v9  ;;  %2467 = vmatpush.bf16.msrb.mxu1 %v10630_v10  ;;  %v1038_v24 = vpop.f32.mrf.mxu0  ;;  %v1051_v25 = vpop.f32.mrf.mxu1  ;;  %v8806_v9 = vld [vmem:[#allocation7 + $0x7c8] sm:$0xf0]  ;;  %v8732_v10 = vld [vmem:[#allocation7 + $0x700] sm:$0xf] }
 0x118   :  { %v1087_v27 = vpack.c.bf16 %v1051_v25, %v1038_v24  ;;  %v8809_v14 = vor.u32 %v10767_v8, %v8806_v9  ;;  %v8742_v24 = vld [vmem:[#allocation7 + $0x748] sm:$0xf0]  ;;  %v10694_v8 = vld [vmem:[#allocation7 + $0x53c] sm:$0xf0]  ;;  %v10686_v9 = vld [vmem:[#allocation7 + $0x504] sm:$0xf] }
 0x119   :  { %2480 = vmatpush.bf16.msrb.mxu2 %v10638_v18  ;;  %2493 = vmatpush.bf16.msrb.mxu3 %v10646_v19  ;;  %v8733_v18 = vor.u32 %v10758_v15, %v8732_v10  ;;  %v8737_v19 = vor.u32 %v10750_v16, %v8734_v17  ;;  %v8745_v25 = vor.u32 %v10751_v22, %v8742_v24  ;;  %v8412_v22 = vld [vmem:[#allocation7 + $0x480] sm:$0xf]  ;;  %v10670_v24 = vld [vmem:[#allocation7 + $0x484] sm:$0xf] }
 0x11a   :  { %v1171_v30 = vunpack.c.l.bf16 %v1087_v27  ;;  %v1172_v31 = vunpack.c.h.bf16 %v1087_v27 }
 0x11b   :  { %3271 = vmatpush.bf16.msra.mxu0 %v8797_v1  ;;  %3284 = vmatpush.bf16.msra.mxu1 %v8801_v6 }
 0x11c   :  { %v1203_v34 = vadd.f32 %v1187_v28, %v1171_v30  ;;  %v1204_v35 = vadd.f32 %v1188_v29, %v1172_v31  ;;  %v8668_v29 = vld [vmem:[#allocation7 + $0x680] sm:$0xf]  ;;  %v10734_v31 = vld [vmem:[#allocation7 + $0x684] sm:$0xf] }
 0x11d   :  { %3297 = vmatpush.bf16.msra.mxu2 %v8805_v7  ;;  %3310 = vmatpush.bf16.msra.mxu3 %v8809_v14  ;;  %v10742_v30 = vld [vmem:[#allocation7 + $0x6bc] sm:$0xf0]  ;;  %v10695_v14 = vld [vmem:[#allocation7 + $0x544] sm:$0xf0] }
 0x11e   :  { %v1243_v37 = vmax.f32 %v1203_v34, 0.0  ;;  %v1244_v38 = vmax.f32 %v1204_v35, 0.0  ;;  %v8669_v32 = vor.u32 %v10742_v30, %v8668_v29  ;;  %v8676_v34 = vld [vmem:[#allocation7 + $0x688] sm:$0xf]  ;;  %v8476_v7 = vld [vmem:[#allocation7 + $0x500] sm:$0xf] }
 0x11f   :  { %v1064_v36 = vpop.f32.mrf.mxu2  ;;  %v1077_v39 = vpop.f32.mrf.mxu3  ;;  %3272 = vmatpush.bf16.msra.mxu0 %v8733_v18  ;;  %3285 = vmatpush.bf16.msra.mxu1 %v8737_v19  ;;  %v10743_v35 = vld [vmem:[#allocation7 + $0x6c4] sm:$0xf0]  ;;  %v8477_v10 = vor.u32 %v10694_v8, %v8476_v7  ;;  %v10687_v19 = vld [vmem:[#allocation7 + $0x50c] sm:$0xf]  ;;  %v10761_v7 = vld [vmem:[#allocation7 + $0x754] sm:$0xf0] }
 0x120   :  { %v1040_v40 = vpop.f32.mrf.mxu0  ;;  %v1088_v41 = vpack.c.bf16 %v1077_v39, %v1064_v36  ;;  %v1053_v44 = vpop.f32.mrf.mxu1  ;;  %v1259_v45 = vpack.c.bf16 %v1243_v37, %v1243_v37  ;;  %v1260_v46 = vpack.c.bf16 %v1244_v38, %v1244_v38  ;;  %v8673_v36 = vor.u32 %v10734_v31, %v8670_v33  ;;  %v10735_v38 = vld [vmem:[#allocation7 + $0x68c] sm:$0xf]  ;;  %v10679_v29 = vld [vmem:[#allocation7 + $0x4c4] sm:$0xf0] }
 0x121   :  { %3298 = vmatpush.bf16.msra.mxu2 %v8741_v23  ;;  %3311 = vmatpush.bf16.msra.mxu3 %v8745_v25  ;;  %v8677_v37 = vor.u32 %v10743_v35, %v8676_v34  ;;  %v8678_v39 = vld [vmem:[#allocation7 + $0x6c8] sm:$0xf0]  ;;  %v10726_v44 = vld [vmem:[#allocation7 + $0x63c] sm:$0xf0]  ;;  %v8489_v21 = vor.u32 %v10687_v19, %v8486_v20  ;;  %v8686_v20 = vld [vmem:[#allocation7 + $0x6d0] sm:$0xf0] }
 0x122   :  { %v1173_v47 = vunpack.c.l.bf16 %v1088_v41  ;;  %v1174_v48 = vunpack.c.h.bf16 %v1088_v41  ;;  %2455 = vmatmul.bf16.vlgmr.msrb.gmra.mxu0 %v1259_v45  ;;  %2468 = vmatmul.bf16.vlgmr.msrb.gmra.mxu1 %v1260_v46  ;;  %v10718_v45 = vld [vmem:[#allocation7 + $0x604] sm:$0xf]  ;;  %v10678_v23 = vld [vmem:[#allocation7 + $0x4bc] sm:$0xf0]  ;;  %v8422_v33 = vld [vmem:[#allocation7 + $0x4c8] sm:$0xf0] }
 0x123   :  { %3273 = vmatpush.bf16.msra.mxu0 %v8669_v32  ;;  %3286 = vmatpush.bf16.msra.mxu1 %v8673_v36  ;;  %v8413_v25 = vor.u32 %v10678_v23, %v8412_v22  ;;  %v10671_v32 = vld [vmem:[#allocation7 + $0x48c] sm:$0xf]  ;;  %v8348_v34 = vld [vmem:[#allocation7 + $0x400] sm:$0xf]  ;;  %v10745_v22 = vld [vmem:[#allocation7 + $0x6d4] sm:$0xf0] }
 0x124   :  { %v1205_v49 = vadd.f32 %v1189_v42, %v1173_v47  ;;  %v1206_v50 = vadd.f32 %v1190_v43, %v1174_v48  ;;  %v8681_v42 = vor.u32 %v10735_v38, %v8678_v39  ;;  %v8604_v43 = vld [vmem:[#allocation7 + $0x600] sm:$0xf]  ;;  %v8606_v47 = vld [vmem:[#allocation7 + $0x640] sm:$0xf0]  ;;  %v8612_v48 = vld [vmem:[#allocation7 + $0x608] sm:$0xf]  ;;  %v8425_v35 = vor.u32 %v10671_v32, %v8422_v33 }
 0x125   :  { %3299 = vmatpush.bf16.msra.mxu2 %v8677_v37  ;;  %v8605_v46 = vor.u32 %v10726_v44, %v8604_v43  ;;  %v10662_v36 = vld [vmem:[#allocation7 + $0x43c] sm:$0xf0]  ;;  %v10654_v37 = vld [vmem:[#allocation7 + $0x404] sm:$0xf]  ;;  %v8356_v43 = vld [vmem:[#allocation7 + $0x408] sm:$0xf] }
 0x126   :  { %v1245_v51 = vmax.f32 %v1205_v49, 0.0  ;;  %v1246_v52 = vmax.f32 %v1206_v50, 0.0  ;;  %v10727_v49 = vld [vmem:[#allocation7 + $0x644] sm:$0xf0]  ;;  %3312 = vmatpush.bf16.msra.mxu3 %v8681_v42  ;;  %v8609_v50 = vor.u32 %v10718_v45, %v8606_v47  ;;  %v8350_v38 = vld [vmem:[#allocation7 + $0x440] sm:$0xf0]  ;;  %v8349_v39 = vor.u32 %v10662_v36, %v8348_v34 }
 0x127   :  { %v1066_v53 = vpop.f32.mrf.mxu2  ;;  %v1079_v54 = vpop.f32.mrf.mxu3  ;;  %3274 = vmatpush.bf16.msra.mxu0 %v8605_v46  ;;  %v8353_v42 = vor.u32 %v10654_v37, %v8350_v38  ;;  %v10663_v44 = vld [vmem:[#allocation7 + $0x444] sm:$0xf0]  ;;  %v10655_v45 = vld [vmem:[#allocation7 + $0x40c] sm:$0xf]  ;;  %v10728_v32 = vld [vmem:[#allocation7 + $0x64c] sm:$0xf0] }
 0x128   :  { %v1261_v55 = vpack.c.bf16 %v1245_v51, %v1245_v51  ;;  %v1262_v56 = vpack.c.bf16 %v1246_v52, %v1246_v52  ;;  %v8613_v51 = vor.u32 %v10727_v49, %v8612_v48  ;;  %v10719_v52 = vld [vmem:[#allocation7 + $0x60c] sm:$0xf]  ;;  %v8540_v54 = vld [vmem:[#allocation7 + $0x580] sm:$0xf]  ;;  %3287 = vmatpush.bf16.msra.mxu1 %v8609_v50  ;;  %v8357_v46 = vor.u32 %v10663_v44, %v8356_v43  ;;  %v8812_v48 = vld [vmem:[#allocation7 + $0x790] sm:$0xf] }
 0x129   :  { %v8614_v53 = vld [vmem:[#allocation7 + $0x648] sm:$0xf0]  ;;  %v10776_v49 = vld [vmem:[#allocation7 + $0x7cc] sm:$0xf0]  ;;  %v10720_v33 = vld [vmem:[#allocation7 + $0x614] sm:$0xf] }
 0x12a   :  { %2481 = vmatmul.bf16.vlgmr.msrb.gmra.mxu2 %v1261_v55  ;;  %2494 = vmatmul.bf16.vlgmr.msrb.gmra.mxu3 %v1262_v56  ;;  %v8617_v55 = vor.u32 %v10719_v52, %v8614_v53  ;;  %v10710_v56 = vld [vmem:[#allocation7 + $0x5bc] sm:$0xf0]  ;;  %v8358_v47 = vld [vmem:[#allocation7 + $0x448] sm:$0xf0]  ;;  %v8813_v53 = vor.u32 %v10776_v49, %v8812_v48  ;;  %v8628_v36 = vld [vmem:[#allocation7 + $0x618] sm:$0xf] }
 0x12b   :  { %3300 = vmatpush.bf16.msra.mxu2 %v8613_v51  ;;  %v8361_v52 = vor.u32 %v10655_v45, %v8358_v47  ;;  %v10729_v37 = vld [vmem:[#allocation7 + $0x654] sm:$0xf0]  ;;  %v8630_v43 = vld [vmem:[#allocation7 + $0x658] sm:$0xf0]  ;;  %v10712_v47 = vld [vmem:[#allocation7 + $0x5cc] sm:$0xf0] }
 0x12c   :  { %3313 = vmatpush.bf16.msra.mxu3 %v8617_v55  ;;  %v8814_v55 = vld [vmem:[#allocation7 + $0x7d0] sm:$0xf0] }
 0x12d   :  { %v10704_v48 = vld [vmem:[#allocation7 + $0x594] sm:$0xf] }
 0x130   :  { %3314 = vmatpush.bf16.msra.mxu3 %v8553_v4 }
 0x134   :  { %3315 = vmatpush.bf16.msra.mxu3 %v8489_v21  ;;  %v8692_v21 = vld [vmem:[#allocation7 + $0x698] sm:$0xf] }
 0x138   :  { %3316 = vmatpush.bf16.msra.mxu3 %v8425_v35  ;;  %v8622_v35 = vld [vmem:[#allocation7 + $0x650] sm:$0xf0] }
 0x139   :  { %v8625_v38 = vor.u32 %v10720_v33, %v8622_v35  ;;  %v8366_v33 = vld [vmem:[#allocation7 + $0x450] sm:$0xf0]  ;;  %v10665_v35 = vld [vmem:[#allocation7 + $0x454] sm:$0xf0] }
 0x13c   :  { %3317 = vmatpush.bf16.msra.mxu3 %v8361_v52  ;;  %v10713_v52 = vld [vmem:[#allocation7 + $0x5d4] sm:$0xf0] }
 0x13f   :  { %v2300_v58 = vpop.f32.mrf.mxu0  ;;  %v2313_v59 = vpop.f32.mrf.mxu1 }
 0x140   :  { %v2301_v60 = vadd.f32 %v11178_v57, %v2300_v58  ;;  %v10702_v57 = vld [vmem:[#allocation7 + $0x584] sm:$0xf] }
 0x141   :  { %v8542_v58 = vld [vmem:[#allocation7 + $0x5c0] sm:$0xf0] }
 0x142   :  { %v11422_v61 = vadd.f32 %v2313_v59, %v2301_v60  ;;  %v8541_v59 = vor.u32 %v10710_v56, %v8540_v54  ;;  %v8548_v60 = vld [vmem:[#allocation7 + $0x588] sm:$0xf]  ;;  %v8545_v0 = vor.u32 %v10702_v57, %v8542_v58  ;;  %v10768_v54 = vld [vmem:[#allocation7 + $0x794] sm:$0xf]  ;;  %v8820_v56 = vld [vmem:[#allocation7 + $0x798] sm:$0xf] }
 0x143   :  { %v8549_v1 = vor.u32 %v10711_v62, %v8548_v60  ;;  %v8817_v57 = vor.u32 %v10768_v54, %v8814_v55  ;;  %v10777_v58 = vld [vmem:[#allocation7 + $0x7d4] sm:$0xf0]  ;;  %v8822_v60 = vld [vmem:[#allocation7 + $0x7d8] sm:$0xf0] }
 0x144   :  { %3275 = vmatpush.bf16.msra.mxu0 %v8541_v59  ;;  %3288 = vmatpush.bf16.msra.mxu1 %v8545_v0  ;;  %v10769_v59 = vld [vmem:[#allocation7 + $0x79c] sm:$0xf]  ;;  %v8821_v62 = vor.u32 %v10777_v58, %v8820_v56  ;;  %v8748_v0 = vld [vmem:[#allocation7 + $0x710] sm:$0xf] }
 0x145   :  { %3301 = vmatpush.bf16.msra.mxu2 %v8549_v1  ;;  %v8825_v63 = vor.u32 %v10769_v59, %v8822_v60  ;;  %v10760_v1 = vld [vmem:[#allocation7 + $0x74c] sm:$0xf0]  ;;  %v10705_v56 = vld [vmem:[#allocation7 + $0x59c] sm:$0xf] }
 0x146   :  { %v8749_v4 = vor.u32 %v10760_v1, %v8748_v0  ;;  %v8492_v59 = vld [vmem:[#allocation7 + $0x510] sm:$0xf]  ;;  %v8494_v0 = vld [vmem:[#allocation7 + $0x550] sm:$0xf0]  ;;  %v8500_v1 = vld [vmem:[#allocation7 + $0x518] sm:$0xf] }
 0x147   :  { %v2302_v11 = vpop.f32.mrf.mxu0  ;;  %v2315_v12 = vpop.f32.mrf.mxu1  ;;  %3362 = vmatpush.bf16.msrb.mxu3 %v8825_v63  ;;  %v10696_v60 = vld [vmem:[#allocation7 + $0x54c] sm:$0xf0] }
 0x148   :  { %v8478_v11 = vld [vmem:[#allocation7 + $0x540] sm:$0xf0]  ;;  %v8484_v12 = vld [vmem:[#allocation7 + $0x508] sm:$0xf]  ;;  %3276 = vmatpush.bf16.msra.mxu0 %v8477_v10  ;;  %v10753_v10 = vld [vmem:[#allocation7 + $0x71c] sm:$0xf]  ;;  %v8493_v63 = vor.u32 %v10696_v60, %v8492_v59 }
 0x149   :  { %v8481_v17 = vor.u32 %v10686_v9, %v8478_v11  ;;  %v8485_v18 = vor.u32 %v10695_v14, %v8484_v12  ;;  %v8758_v11 = vld [vmem:[#allocation7 + $0x758] sm:$0xf0]  ;;  %v8684_v14 = vld [vmem:[#allocation7 + $0x690] sm:$0xf]  ;;  %v10770_v59 = vld [vmem:[#allocation7 + $0x7a4] sm:$0xf] }
 0x14a   :  { %v8761_v12 = vor.u32 %v10753_v10, %v8758_v11  ;;  %v8428_v11 = vld [vmem:[#allocation7 + $0x490] sm:$0xf]  ;;  %v8836_v60 = vld [vmem:[#allocation7 + $0x7a8] sm:$0xf] }
 0x14b   :  { %3289 = vmatpush.bf16.msra.mxu1 %v8481_v17  ;;  %3302 = vmatpush.bf16.msra.mxu2 %v8485_v18  ;;  %v10744_v17 = vld [vmem:[#allocation7 + $0x6cc] sm:$0xf0]  ;;  %v10736_v18 = vld [vmem:[#allocation7 + $0x694] sm:$0xf] }
 0x14c   :  { %3277 = vmatpush.bf16.msra.mxu0 %v8413_v25  ;;  %v8685_v19 = vor.u32 %v10744_v17, %v8684_v14  ;;  %3363 = vmatpush.bf16.msrb.mxu3 %v8761_v12  ;;  %v8689_v23 = vor.u32 %v10736_v18, %v8686_v20  ;;  %v10737_v25 = vld [vmem:[#allocation7 + $0x69c] sm:$0xf]  ;;  %v10680_v12 = vld [vmem:[#allocation7 + $0x4cc] sm:$0xf0]  ;;  %v10672_v14 = vld [vmem:[#allocation7 + $0x494] sm:$0xf] }
 0x14d   :  { %v8429_v17 = vor.u32 %v10680_v12, %v8428_v11  ;;  %v8430_v18 = vld [vmem:[#allocation7 + $0x4d0] sm:$0xf0]  ;;  %v10681_v20 = vld [vmem:[#allocation7 + $0x4d4] sm:$0xf0]  ;;  %v8772_v11 = vld [vmem:[#allocation7 + $0x728] sm:$0xf] }
 0x14e   :  { %v10763_v12 = vld [vmem:[#allocation7 + $0x764] sm:$0xf0] }
 0x14f   :  { %v11424_v26 = vpop.f32.mrf.mxu2  ;;  %v11426_v13 = vpop.f32.mrf.mxu3 }
 0x150   :  { %3278 = vmatpush.bf16.msra.mxu0 %v8349_v39  ;;  %v8629_v39 = vor.u32 %v10729_v37, %v8628_v36  ;;  %v2327_v44 = vadd.f32 %v11424_v26, %v11422_v61 }
 0x154   :  { %3323 = vmatpush.bf16.msrb.mxu0 %v8813_v53  ;;  %v2340_v53 = vadd.f32 %v11426_v13, %v2327_v44 }
 0x157   :  { %v2328_v27 = vpop.f32.mrf.mxu2  ;;  %v2341_v28 = vpop.f32.mrf.mxu3 }
 0x158   :  { %v8414_v27 = vld [vmem:[#allocation7 + $0x4c0] sm:$0xf0]  ;;  %v8420_v28 = vld [vmem:[#allocation7 + $0x488] sm:$0xf]  ;;  %3324 = vmatpush.bf16.msrb.mxu0 %v8749_v4 }
 0x159   :  { %v8417_v30 = vor.u32 %v10670_v24, %v8414_v27  ;;  %v8421_v31 = vor.u32 %v10679_v29, %v8420_v28  ;;  %v8693_v24 = vor.u32 %v10745_v22, %v8692_v21  ;;  %v8694_v27 = vld [vmem:[#allocation7 + $0x6d8] sm:$0xf0]  ;;  %v8433_v21 = vor.u32 %v10672_v14, %v8430_v18  ;;  %v10755_v14 = vld [vmem:[#allocation7 + $0x72c] sm:$0xf] }
 0x15b   :  { %3290 = vmatpush.bf16.msra.mxu1 %v8417_v30  ;;  %3303 = vmatpush.bf16.msra.mxu2 %v8421_v31  ;;  %v8697_v30 = vor.u32 %v10737_v25, %v8694_v27  ;;  %v8620_v31 = vld [vmem:[#allocation7 + $0x610] sm:$0xf] }
 0x15c   :  { %3325 = vmatpush.bf16.msrb.mxu0 %v8685_v19  ;;  %v8621_v34 = vor.u32 %v10728_v32, %v8620_v31  ;;  %v8436_v19 = vld [vmem:[#allocation7 + $0x498] sm:$0xf]  ;;  %v8364_v27 = vld [vmem:[#allocation7 + $0x410] sm:$0xf]  ;;  %v10656_v31 = vld [vmem:[#allocation7 + $0x414] sm:$0xf] }
 0x15d   :  { %3364 = vmatpush.bf16.msrb.mxu3 %v8697_v30  ;;  %v8437_v22 = vor.u32 %v10681_v20, %v8436_v19  ;;  %v10664_v30 = vld [vmem:[#allocation7 + $0x44c] sm:$0xf0]  ;;  %v8700_v20 = vld [vmem:[#allocation7 + $0x6a0] sm:$0xf] }
 0x15e   :  { %v8365_v32 = vor.u32 %v10664_v30, %v8364_v27  ;;  %v10747_v27 = vld [vmem:[#allocation7 + $0x6e4] sm:$0xf0]  ;;  %v10739_v30 = vld [vmem:[#allocation7 + $0x6ac] sm:$0xf] }
 0x15f   :  { %v11428_v40 = vpop.f32.mrf.mxu0  ;;  %v11430_v41 = vpop.f32.mrf.mxu1  ;;  %3291 = vmatpush.bf16.msra.mxu1 %v8353_v42  ;;  %3304 = vmatpush.bf16.msra.mxu2 %v8357_v46  ;;  %v10721_v42 = vld [vmem:[#allocation7 + $0x61c] sm:$0xf]  ;;  %v8556_v46 = vld [vmem:[#allocation7 + $0x590] sm:$0xf] }
 0x160   :  { %v8633_v45 = vor.u32 %v10721_v42, %v8630_v43  ;;  %3326 = vmatpush.bf16.msrb.mxu0 %v8621_v34  ;;  %v8557_v49 = vor.u32 %v10712_v47, %v8556_v46  ;;  %v2353_v13 = vadd.f32 %v11428_v40, %v2340_v53  ;;  %v8372_v34 = vld [vmem:[#allocation7 + $0x418] sm:$0xf] }
 0x161   :  { %v8373_v37 = vor.u32 %v10665_v35, %v8372_v34  ;;  %v8636_v34 = vld [vmem:[#allocation7 + $0x620] sm:$0xf] }
 0x162   :  { %3365 = vmatpush.bf16.msrb.mxu3 %v8633_v45  ;;  %v2366_v40 = vadd.f32 %v11430_v41, %v2353_v13  ;;  %v8369_v41 = vor.u32 %v10656_v31, %v8366_v33  ;;  %v8710_v31 = vld [vmem:[#allocation7 + $0x6e8] sm:$0xf0]  ;;  %v10730_v35 = vld [vmem:[#allocation7 + $0x65c] sm:$0xf0] }
 0x163   :  { %3336 = vmatpush.bf16.msrb.mxu1 %v8817_v57  ;;  %3349 = vmatpush.bf16.msrb.mxu2 %v8821_v62  ;;  %v8566_v57 = vld [vmem:[#allocation7 + $0x5d8] sm:$0xf0]  ;;  %v10688_v62 = vld [vmem:[#allocation7 + $0x514] sm:$0xf] }
 0x164   :  { %v8569_v58 = vor.u32 %v10705_v56, %v8566_v57  ;;  %3327 = vmatpush.bf16.msrb.mxu0 %v8557_v49  ;;  %v8497_v4 = vor.u32 %v10688_v62, %v8494_v0  ;;  %v8838_v0 = vld [vmem:[#allocation7 + $0x7e8] sm:$0xf0] }
 0x166   :  { %3366 = vmatpush.bf16.msrb.mxu3 %v8569_v58  ;;  %v10778_v58 = vld [vmem:[#allocation7 + $0x7dc] sm:$0xf0] }
 0x167   :  { %v2354_v5 = vpop.f32.mrf.mxu0  ;;  %v2367_v6 = vpop.f32.mrf.mxu1 }
 0x168   :  { %v8750_v5 = vld [vmem:[#allocation7 + $0x750] sm:$0xf0]  ;;  %v8756_v6 = vld [vmem:[#allocation7 + $0x718] sm:$0xf]  ;;  %3328 = vmatpush.bf16.msrb.mxu0 %v8493_v63  ;;  %v10771_v63 = vld [vmem:[#allocation7 + $0x7ac] sm:$0xf] }
 0x169   :  { %v8753_v8 = vor.u32 %v10752_v2, %v8750_v5  ;;  %v8757_v9 = vor.u32 %v10761_v7, %v8756_v6  ;;  %v10697_v2 = vld [vmem:[#allocation7 + $0x554] sm:$0xf0]  ;;  %v10689_v6 = vld [vmem:[#allocation7 + $0x51c] sm:$0xf] }
 0x16a   :  { %v8501_v5 = vor.u32 %v10697_v2, %v8500_v1  ;;  %v8502_v7 = vld [vmem:[#allocation7 + $0x558] sm:$0xf0] }
 0x16b   :  { %3337 = vmatpush.bf16.msrb.mxu1 %v8753_v8  ;;  %3350 = vmatpush.bf16.msrb.mxu2 %v8757_v9  ;;  %v8505_v8 = vor.u32 %v10689_v6, %v8502_v7  ;;  %v8764_v6 = vld [vmem:[#allocation7 + $0x720] sm:$0xf] }
 0x16c   :  { %3329 = vmatpush.bf16.msrb.mxu0 %v8429_v17  ;;  %v8774_v17 = vld [vmem:[#allocation7 + $0x768] sm:$0xf0] }
 0x16d   :  { %3367 = vmatpush.bf16.msrb.mxu3 %v8505_v8  ;;  %v8841_v8 = vor.u32 %v10771_v63, %v8838_v0  ;;  %v10691_v63 = vld [vmem:[#allocation7 + $0x52c] sm:$0xf] }
 0x16e   :  { %v8518_v0 = vld [vmem:[#allocation7 + $0x568] sm:$0xf0] }
 0x16f   :  { %v11432_v15 = vpop.f32.mrf.mxu2  ;;  %v11434_v16 = vpop.f32.mrf.mxu3  ;;  %3338 = vmatpush.bf16.msrb.mxu1 %v8689_v23  ;;  %3351 = vmatpush.bf16.msrb.mxu2 %v8693_v24  ;;  %v10673_v23 = vld [vmem:[#allocation7 + $0x49c] sm:$0xf] }
 0x170   :  { %v8438_v24 = vld [vmem:[#allocation7 + $0x4d8] sm:$0xf0]  ;;  %v2379_v36 = vadd.f32 %v11432_v15, %v2366_v40  ;;  %3330 = vmatpush.bf16.msrb.mxu0 %v8365_v32  ;;  %v10746_v40 = vld [vmem:[#allocation7 + $0x6dc] sm:$0xf0] }
 0x171   :  { %v8441_v25 = vor.u32 %v10673_v23, %v8438_v24  ;;  %v10738_v23 = vld [vmem:[#allocation7 + $0x6a4] sm:$0xf]  ;;  %v8701_v32 = vor.u32 %v10746_v40, %v8700_v20 }
 0x172   :  { %v2392_v45 = vadd.f32 %v11434_v16, %v2379_v36  ;;  %v8828_v16 = vld [vmem:[#allocation7 + $0x7a0] sm:$0xf]  ;;  %v8702_v24 = vld [vmem:[#allocation7 + $0x6e0] sm:$0xf0] }
 0x173   :  { %3339 = vmatpush.bf16.msrb.mxu1 %v8625_v38  ;;  %3352 = vmatpush.bf16.msrb.mxu2 %v8629_v39  ;;  %v10657_v38 = vld [vmem:[#allocation7 + $0x41c] sm:$0xf]  ;;  %v8705_v33 = vor.u32 %v10738_v23, %v8702_v24  ;;  %v10658_v20 = vld [vmem:[#allocation7 + $0x424] sm:$0xf]  ;;  %v8388_v23 = vld [vmem:[#allocation7 + $0x428] sm:$0xf] }
 0x174   :  { %3368 = vmatpush.bf16.msrb.mxu3 %v8441_v25  ;;  %v8374_v39 = vld [vmem:[#allocation7 + $0x458] sm:$0xf0]  ;;  %v8708_v25 = vld [vmem:[#allocation7 + $0x6a8] sm:$0xf]  ;;  %v8382_v40 = vld [vmem:[#allocation7 + $0x460] sm:$0xf0] }
 0x175   :  { %v8377_v42 = vor.u32 %v10657_v38, %v8374_v39  ;;  %v8709_v36 = vor.u32 %v10747_v27, %v8708_v25  ;;  %v8638_v38 = vld [vmem:[#allocation7 + $0x660] sm:$0xf0]  ;;  %v8644_v39 = vld [vmem:[#allocation7 + $0x628] sm:$0xf]  ;;  %v10659_v25 = vld [vmem:[#allocation7 + $0x42c] sm:$0xf] }
 0x176   :  { %v10667_v24 = vld [vmem:[#allocation7 + $0x464] sm:$0xf0]  ;;  %v8390_v27 = vld [vmem:[#allocation7 + $0x468] sm:$0xf0] }
 0x177   :  { %v2380_v50 = vpop.f32.mrf.mxu2  ;;  %v2393_v51 = vpop.f32.mrf.mxu3 }
 0x178   :  { %v8558_v50 = vld [vmem:[#allocation7 + $0x5d0] sm:$0xf0]  ;;  %v8564_v51 = vld [vmem:[#allocation7 + $0x598] sm:$0xf]  ;;  %3369 = vmatpush.bf16.msrb.mxu3 %v8377_v42  ;;  %v10731_v42 = vld [vmem:[#allocation7 + $0x664] sm:$0xf0] }
 0x179   :  { %v8561_v54 = vor.u32 %v10704_v48, %v8558_v50  ;;  %v8565_v55 = vor.u32 %v10713_v52, %v8564_v51 }
 0x17b   :  { %3340 = vmatpush.bf16.msrb.mxu1 %v8561_v54  ;;  %3353 = vmatpush.bf16.msrb.mxu2 %v8565_v55 }
 0x17f   :  { %v11436_v28 = vpop.f32.mrf.mxu0  ;;  %v11438_v29 = vpop.f32.mrf.mxu1  ;;  %3341 = vmatpush.bf16.msrb.mxu1 %v8497_v4  ;;  %3354 = vmatpush.bf16.msrb.mxu2 %v8501_v5  ;;  %v8829_v4 = vor.u32 %v10778_v58, %v8828_v16 }
 0x180   :  { %v2405_v46 = vadd.f32 %v11436_v28, %v2392_v45  ;;  %v8830_v28 = vld [vmem:[#allocation7 + $0x7e0] sm:$0xf0]  ;;  %v8637_v45 = vor.u32 %v10730_v35, %v8636_v34  ;;  %v8852_v34 = vld [vmem:[#allocation7 + $0x7b8] sm:$0xf] }
 0x181   :  { %v8833_v5 = vor.u32 %v10770_v59, %v8830_v28  ;;  %v10690_v59 = vld [vmem:[#allocation7 + $0x524] sm:$0xf] }
 0x182   :  { %v2418_v47 = vadd.f32 %v11438_v29, %v2405_v46  ;;  %v10779_v29 = vld [vmem:[#allocation7 + $0x7e4] sm:$0xf0]  ;;  %v8510_v28 = vld [vmem:[#allocation7 + $0x560] sm:$0xf0] }
 0x183   :  { %3342 = vmatpush.bf16.msrb.mxu1 %v8433_v21  ;;  %3355 = vmatpush.bf16.msrb.mxu2 %v8437_v22  ;;  %v8837_v7 = vor.u32 %v10779_v29, %v8836_v60  ;;  %v8773_v21 = vor.u32 %v10763_v12, %v8772_v11  ;;  %v8777_v22 = vor.u32 %v10755_v14, %v8774_v17  ;;  %v8516_v60 = vld [vmem:[#allocation7 + $0x528] sm:$0xf]  ;;  %v10675_v11 = vld [vmem:[#allocation7 + $0x4ac] sm:$0xf]  ;;  %v8380_v14 = vld [vmem:[#allocation7 + $0x420] sm:$0xf] }
 0x184   :  { %v10699_v29 = vld [vmem:[#allocation7 + $0x564] sm:$0xf0]  ;;  %v8454_v12 = vld [vmem:[#allocation7 + $0x4e8] sm:$0xf0] }
 0x187   :  { %v2406_v61 = vpop.f32.mrf.mxu0  ;;  %v2419_v26 = vpop.f32.mrf.mxu1  ;;  %3343 = vmatpush.bf16.msrb.mxu1 %v8369_v41  ;;  %3356 = vmatpush.bf16.msrb.mxu2 %v8373_v37  ;;  %v8713_v41 = vor.u32 %v10739_v30, %v8710_v31  ;;  %v10722_v37 = vld [vmem:[#allocation7 + $0x624] sm:$0xf]  ;;  %v8844_v30 = vld [vmem:[#allocation7 + $0x7b0] sm:$0xf] }
 0x188   :  { %v8641_v46 = vor.u32 %v10722_v37, %v8638_v38  ;;  %v10780_v31 = vld [vmem:[#allocation7 + $0x7ec] sm:$0xf0]  ;;  %v10773_v37 = vld [vmem:[#allocation7 + $0x7bc] sm:$0xf] }
 0x189   :  { %v8854_v38 = vld [vmem:[#allocation7 + $0x7f8] sm:$0xf0] }
 0x18f   :  { %v2430_v9 = vpop.f32.mrf.mxu2  ;;  %v2443_v10 = vpop.f32.mrf.mxu3 }
 0x190   :  { %v2431_v49 = vadd.f32 %v2430_v9, %v2418_v47  ;;  %v10754_v9 = vld [vmem:[#allocation7 + $0x724] sm:$0xf]  ;;  %v8572_v47 = vld [vmem:[#allocation7 + $0x5a0] sm:$0xf] }
 0x192   :  { %v2444_v50 = vadd.f32 %v2443_v10, %v2431_v49  ;;  %v8766_v10 = vld [vmem:[#allocation7 + $0x760] sm:$0xf0] }
 0x193   :  { %v8769_v19 = vor.u32 %v10754_v9, %v8766_v10  ;;  %v8452_v9 = vld [vmem:[#allocation7 + $0x4a8] sm:$0xf] }
 0x194   :  { %v10683_v10 = vld [vmem:[#allocation7 + $0x4e4] sm:$0xf0] }
 0x197   :  { %v2432_v43 = vpop.f32.mrf.mxu2  ;;  %v2445_v44 = vpop.f32.mrf.mxu3 }
 0x198   :  { %v10723_v43 = vld [vmem:[#allocation7 + $0x62c] sm:$0xf] }
 0x199   :  { %v8646_v44 = vld [vmem:[#allocation7 + $0x668] sm:$0xf0] }
 0x19a   :  { %v8649_v49 = vor.u32 %v10723_v43, %v8646_v44  ;;  %v8845_v43 = vor.u32 %v10780_v31, %v8844_v30  ;;  %v8524_v30 = vld [vmem:[#allocation7 + $0x530] sm:$0xf] }
 0x19b   :  { %v10700_v31 = vld [vmem:[#allocation7 + $0x56c] sm:$0xf0] }
 0x19f   :  { %v2456_v48 = vpop.f32.mrf.mxu0  ;;  %v2469_v15 = vpop.f32.mrf.mxu1 }
 0x1a0   :  { %v2457_v51 = vadd.f32 %v2456_v48, %v2444_v50  ;;  %v10714_v48 = vld [vmem:[#allocation7 + $0x5dc] sm:$0xf0]  ;;  %v10706_v50 = vld [vmem:[#allocation7 + $0x5a4] sm:$0xf] }
 0x1a2   :  { %v2470_v54 = vadd.f32 %v2469_v15, %v2457_v51  ;;  %v8645_v15 = vor.u32 %v10731_v42, %v8644_v39  ;;  %v8574_v51 = vld [vmem:[#allocation7 + $0x5e0] sm:$0xf0]  ;;  %v8389_v39 = vor.u32 %v10667_v24, %v8388_v23  ;;  %v8393_v42 = vor.u32 %v10659_v25, %v8390_v27  ;;  %v10709_v23 = vld [vmem:[#allocation7 + $0x5bc] sm:$0xf] }
 0x1a3   :  { %v8598_v24 = vld [vmem:[#allocation7 + $0x5f8] sm:$0xf0] }
 0x1a7   :  { %v2458_v52 = vpop.f32.mrf.mxu0  ;;  %v2471_v53 = vpop.f32.mrf.mxu1 }
 0x1a8   :  { %v8580_v52 = vld [vmem:[#allocation7 + $0x5a8] sm:$0xf] }
 0x1a9   :  { %v10715_v53 = vld [vmem:[#allocation7 + $0x5e4] sm:$0xf0] }
 0x1aa   :  { %v8581_v16 = vor.u32 %v10715_v53, %v8580_v52  ;;  %v10757_v52 = vld [vmem:[#allocation7 + $0x73c] sm:$0xf] }
 0x1ab   :  { %v8790_v53 = vld [vmem:[#allocation7 + $0x778] sm:$0xf0] }
 0x1ad   :  { %v2482_v55 = vpop.f32.mrf.mxu2  ;;  %v2495_v56 = vpop.f32.mrf.mxu3 }
 0x1ae   :  { %v2483_v57 = vadd.f32 %v2482_v55, %v2470_v54  ;;  %v10707_v54 = vld [vmem:[#allocation7 + $0x5ac] sm:$0xf] }
 0x1af   :  { %v8582_v55 = vld [vmem:[#allocation7 + $0x5e8] sm:$0xf0] }
 0x1b0   :  { %v2496_v61 = vadd.f32 %v2495_v56, %v2483_v57  ;;  %v8573_v56 = vor.u32 %v10714_v48, %v8572_v47  ;;  %v8577_v57 = vor.u32 %v10706_v50, %v8574_v51  ;;  %v8585_v58 = vor.u32 %v10707_v54, %v8582_v55  ;;  %v8788_v50 = vld [vmem:[#allocation7 + $0x738] sm:$0xf] }
 0x1b1   :  { %v8857_v48 = vor.u32 %v10773_v37, %v8854_v38  ;;  %v10765_v51 = vld [vmem:[#allocation7 + $0x774] sm:$0xf0]  ;;  %v10693_v37 = vld [vmem:[#allocation7 + $0x53c] sm:$0xf] }
 0x1b2   :  { %v2499_v26 = vadd.f32 %v2496_v61, %v11394_v3  ;;  %v10762_v3 = vld [vmem:[#allocation7 + $0x75c] sm:$0xf0]  ;;  %v8534_v38 = vld [vmem:[#allocation7 + $0x578] sm:$0xf0] }
 0x1b3   :  { %v8765_v18 = vor.u32 %v10762_v3, %v8764_v6  ;;  %v8508_v61 = vld [vmem:[#allocation7 + $0x520] sm:$0xf]  ;;  %v8517_v6 = vor.u32 %v10699_v29, %v8516_v60  ;;  %v8521_v3 = vor.u32 %v10691_v63, %v8518_v0  ;;  %v10741_v60 = vld [vmem:[#allocation7 + $0x6bc] sm:$0xf] }
 0x1b4   :  { %v11450_v62 = vmax.f32 %v2499_v26, 0.0  ;;  %v10698_v26 = vld [vmem:[#allocation7 + $0x55c] sm:$0xf0]  ;;  %v8726_v29 = vld [vmem:[#allocation7 + $0x6f8] sm:$0xf0] }
 0x1b5   :  { %v2484_v1 = vpop.f32.mrf.mxu2  ;;  %v2497_v2 = vpop.f32.mrf.mxu3 }
 0x1b6   :  { %v11454_v13 = vpack.c.bf16 %v11450_v62, %v11450_v62  ;;  %v8509_v1 = vor.u32 %v10698_v26, %v8508_v61  ;;  %v8513_v2 = vor.u32 %v10690_v59, %v8510_v28  ;;  %v8789_v61 = vor.u32 %v10765_v51, %v8788_v50  ;;  %v8724_v59 = vld [vmem:[#allocation7 + $0x6b8] sm:$0xf]  ;;  %v10677_v50 = vld [vmem:[#allocation7 + $0x4bc] sm:$0xf] }
 0x1b7   :  { %v8793_v26 = vor.u32 %v10757_v52, %v8790_v53  ;;  %v10749_v28 = vld [vmem:[#allocation7 + $0x6f4] sm:$0xf0]  ;;  %v8470_v51 = vld [vmem:[#allocation7 + $0x4f8] sm:$0xf0] }
 0x1b8   :  { %3279 = vmatmul.bf16.vlgmr.msra.gmra.mxu0 %v11454_v13  ;;  %3292 = vmatmul.bf16.vlgmr.msra.gmra.mxu1 %v11454_v13 }
 0x1b9   :  { %3305 = vmatmul.bf16.vlgmr.msra.gmra.mxu2 %v11454_v13  ;;  %3318 = vmatmul.bf16.vlgmr.msra.gmra.mxu3 %v11454_v13 }
 0x1ba   :  { %3375 = vmatpush.bf16.msra.mxu0 %v8829_v4  ;;  %3388 = vmatpush.bf16.msra.mxu1 %v8833_v5  ;;  %v8444_v4 = vld [vmem:[#allocation7 + $0x4a0] sm:$0xf] }
 0x1bb   :  { %3401 = vmatpush.bf16.msra.mxu2 %v8837_v7  ;;  %3414 = vmatpush.bf16.msra.mxu3 %v8841_v8  ;;  %v10682_v5 = vld [vmem:[#allocation7 + $0x4dc] sm:$0xf0]  ;;  %v10674_v7 = vld [vmem:[#allocation7 + $0x4a4] sm:$0xf] }
 0x1bc   :  { %v8446_v8 = vld [vmem:[#allocation7 + $0x4e0] sm:$0xf0]  ;;  %v8445_v17 = vor.u32 %v10682_v5, %v8444_v4  ;;  %v8725_v4 = vor.u32 %v10749_v28, %v8724_v59  ;;  %v8729_v5 = vor.u32 %v10741_v60, %v8726_v29  ;;  %v10661_v59 = vld [vmem:[#allocation7 + $0x43c] sm:$0xf] }
 0x1bd   :  { %v8406_v28 = vld [vmem:[#allocation7 + $0x478] sm:$0xf0] }
 0x1be   :  { %3376 = vmatpush.bf16.msra.mxu0 %v8765_v18  ;;  %3389 = vmatpush.bf16.msra.mxu1 %v8769_v19  ;;  %v8449_v18 = vor.u32 %v10674_v7, %v8446_v8  ;;  %v10666_v19 = vld [vmem:[#allocation7 + $0x45c] sm:$0xf0]  ;;  %v8660_v7 = vld [vmem:[#allocation7 + $0x638] sm:$0xf] }
 0x1bf   :  { %3402 = vmatpush.bf16.msra.mxu2 %v8773_v21  ;;  %3415 = vmatpush.bf16.msra.mxu3 %v8777_v22  ;;  %v8453_v21 = vor.u32 %v10683_v10, %v8452_v9  ;;  %v8457_v22 = vor.u32 %v10675_v11, %v8454_v12  ;;  %v8381_v35 = vor.u32 %v10666_v19, %v8380_v14  ;;  %v10733_v8 = vld [vmem:[#allocation7 + $0x674] sm:$0xf0]  ;;  %v10725_v9 = vld [vmem:[#allocation7 + $0x63c] sm:$0xf]  ;;  %v8588_v14 = vld [vmem:[#allocation7 + $0x5b0] sm:$0xf] }
 0x1c0   :  { %v8662_v10 = vld [vmem:[#allocation7 + $0x678] sm:$0xf0] }
 0x1c1   :  { %v8665_v19 = vor.u32 %v10725_v9, %v8662_v10  ;;  %v10787_v9 = vld [vmem:[#allocation8 + $0x428] sm:$0xff] }
 0x1c2   :  { %3377 = vmatpush.bf16.msra.mxu0 %v8701_v32  ;;  %3390 = vmatpush.bf16.msra.mxu1 %v8705_v33  ;;  %v10772_v32 = vld [vmem:[#allocation7 + $0x7b4] sm:$0xf]  ;;  %v10795_v10 = vld [vmem:[#allocation8 + $0x468] sm:$0xff] }
 0x1c3   :  { %3403 = vmatpush.bf16.msra.mxu2 %v8709_v36  ;;  %3416 = vmatpush.bf16.msra.mxu3 %v8713_v41  ;;  %v8846_v33 = vld [vmem:[#allocation7 + $0x7f0] sm:$0xf0]  ;;  %v8385_v36 = vor.u32 %v10658_v20, %v8382_v40  ;;  %v10781_v41 = vld [vmem:[#allocation7 + $0x7f4] sm:$0xf0] }
 0x1c4   :  { %v8849_v44 = vor.u32 %v10772_v32, %v8846_v33  ;;  %v8853_v47 = vor.u32 %v10781_v41, %v8852_v34  ;;  %v10708_v20 = vld [vmem:[#allocation7 + $0x5b4] sm:$0xf]  ;;  %v8601_v33 = vor.u32 %v10709_v23, %v8598_v24  ;;  %v10701_v41 = vld [vmem:[#allocation7 + $0x574] sm:$0xf0] }
 0x1c5   :  { %v8590_v40 = vld [vmem:[#allocation7 + $0x5f0] sm:$0xf0] }
 0x1c6   :  { %3378 = vmatpush.bf16.msra.mxu0 %v8637_v45  ;;  %3391 = vmatpush.bf16.msra.mxu1 %v8641_v46  ;;  %v8780_v45 = vld [vmem:[#allocation7 + $0x730] sm:$0xf]  ;;  %v8593_v27 = vor.u32 %v10708_v20, %v8590_v40  ;;  %v10692_v34 = vld [vmem:[#allocation7 + $0x534] sm:$0xf]  ;;  %v10793_v20 = vld [vmem:[#allocation8 + $0x458] sm:$0xff] }
 0x1c7   :  { %3404 = vmatpush.bf16.msra.mxu2 %v8645_v15  ;;  %3417 = vmatpush.bf16.msra.mxu3 %v8649_v49  ;;  %v10764_v46 = vld [vmem:[#allocation7 + $0x76c] sm:$0xf0]  ;;  %v10756_v15 = vld [vmem:[#allocation7 + $0x734] sm:$0xf]  ;;  %v10801_v40 = vld [vmem:[#allocation8 + $0x498] sm:$0xff] }
 0x1c8   :  { %3331 = vmatmul.bf16.vlgmr.msrb.gmra.mxu0 %v11454_v13  ;;  %3344 = vmatmul.bf16.vlgmr.msrb.gmra.mxu1 %v11454_v13  ;;  %v8782_v49 = vld [vmem:[#allocation7 + $0x770] sm:$0xf0]  ;;  %v8781_v54 = vor.u32 %v10764_v46, %v8780_v45  ;;  %v8537_v46 = vor.u32 %v10693_v37, %v8534_v38  ;;  %v10798_v37 = vld [vmem:[#allocation8 + $0x480] sm:$0xff] }
 0x1c9   :  { %3357 = vmatmul.bf16.vlgmr.msrb.gmra.mxu2 %v11454_v13  ;;  %3370 = vmatmul.bf16.vlgmr.msrb.gmra.mxu3 %v11454_v13  ;;  %v8785_v55 = vor.u32 %v10756_v15, %v8782_v49  ;;  %v8468_v15 = vld [vmem:[#allocation7 + $0x4b8] sm:$0xf]  ;;  %v10792_v23 = vld [vmem:[#allocation8 + $0x450] sm:$0xff]  ;;  %v10806_v38 = vld [vmem:[#allocation8 + $0x4c0] sm:$0xff] }
 0x1ca   :  { %3379 = vmatpush.bf16.msra.mxu0 %v8573_v56  ;;  %3392 = vmatpush.bf16.msra.mxu1 %v8577_v57  ;;  %v8716_v56 = vld [vmem:[#allocation7 + $0x6b0] sm:$0xf]  ;;  %v10685_v49 = vld [vmem:[#allocation7 + $0x4f4] sm:$0xf0] }
 0x1cb   :  { %3405 = vmatpush.bf16.msra.mxu2 %v8581_v16  ;;  %3418 = vmatpush.bf16.msra.mxu3 %v8585_v58  ;;  %v10748_v57 = vld [vmem:[#allocation7 + $0x6ec] sm:$0xf0]  ;;  %v10740_v16 = vld [vmem:[#allocation7 + $0x6b4] sm:$0xf] }
 0x1cc   :  { %v8718_v58 = vld [vmem:[#allocation7 + $0x6f0] sm:$0xf0]  ;;  %v8717_v63 = vor.u32 %v10748_v57, %v8716_v56  ;;  %v8469_v56 = vor.u32 %v10685_v49, %v8468_v15  ;;  %v8473_v57 = vor.u32 %v10677_v50, %v8470_v51  ;;  %v10835_v15 = vld [vmem:[#allocation8 + $0x5a8] sm:$0xff]  ;;  %v10818_v50 = vld [vmem:[#allocation8 + $0x520] sm:$0xff] }
 0x1cd   :  { %v8721_v0 = vor.u32 %v10740_v16, %v8718_v58  ;;  %v8404_v16 = vld [vmem:[#allocation7 + $0x438] sm:$0xf]  ;;  %v10800_v24 = vld [vmem:[#allocation8 + $0x490] sm:$0xff]  ;;  %v10843_v49 = vld [vmem:[#allocation8 + $0x5e8] sm:$0xff] }
 0x1ce   :  { %3380 = vmatpush.bf16.msra.mxu0 %v8509_v1  ;;  %3393 = vmatpush.bf16.msra.mxu1 %v8513_v2  ;;  %v8652_v1 = vld [vmem:[#allocation7 + $0x630] sm:$0xf]  ;;  %v10669_v58 = vld [vmem:[#allocation7 + $0x474] sm:$0xf0]  ;;  %v10826_v51 = vld [vmem:[#allocation8 + $0x560] sm:$0xff] }
 0x1cf   :  { %3406 = vmatpush.bf16.msra.mxu2 %v8517_v6  ;;  %3419 = vmatpush.bf16.msra.mxu3 %v8521_v3  ;;  %v10732_v2 = vld [vmem:[#allocation7 + $0x66c] sm:$0xf0]  ;;  %v10724_v6 = vld [vmem:[#allocation7 + $0x634] sm:$0xf] }
 0x1d0   :  { %v8654_v3 = vld [vmem:[#allocation7 + $0x670] sm:$0xf0]  ;;  %v8653_v11 = vor.u32 %v10732_v2, %v8652_v1  ;;  %v10789_v1 = vld [vmem:[#allocation8 + $0x438] sm:$0xff] }
 0x1d1   :  { %v8657_v12 = vor.u32 %v10724_v6, %v8654_v3  ;;  %v10797_v2 = vld [vmem:[#allocation8 + $0x478] sm:$0xff]  ;;  %v10788_v6 = vld [vmem:[#allocation8 + $0x430] sm:$0xff] }
 0x1d2   :  { %3381 = vmatpush.bf16.msra.mxu0 %v8445_v17  ;;  %3394 = vmatpush.bf16.msra.mxu1 %v8449_v18  ;;  %v10716_v17 = vld [vmem:[#allocation7 + $0x5ec] sm:$0xf0]  ;;  %v8661_v18 = vor.u32 %v10733_v8, %v8660_v7 }
 0x1d3   :  { %3407 = vmatpush.bf16.msra.mxu2 %v8453_v21  ;;  %3420 = vmatpush.bf16.msra.mxu3 %v8457_v22  ;;  %v8596_v21 = vld [vmem:[#allocation7 + $0x5b8] sm:$0xf]  ;;  %v8589_v25 = vor.u32 %v10716_v17, %v8588_v14  ;;  %v10796_v3 = vld [vmem:[#allocation8 + $0x470] sm:$0xff]  ;;  %v10786_v14 = vld [vmem:[#allocation8 + $0x420] sm:$0xff] }
 0x1d4   :  { %v10717_v22 = vld [vmem:[#allocation7 + $0x5f4] sm:$0xf0]  ;;  %v10804_v7 = vld [vmem:[#allocation8 + $0x4b0] sm:$0xff]  ;;  %v10794_v17 = vld [vmem:[#allocation8 + $0x460] sm:$0xff] }
 0x1d5   :  { %v8597_v32 = vor.u32 %v10717_v22, %v8596_v21  ;;  %v10812_v8 = vld [vmem:[#allocation8 + $0x4f0] sm:$0xff]  ;;  %v10809_v21 = vld [vmem:[#allocation8 + $0x4d8] sm:$0xff] }
 0x1d6   :  { %3382 = vmatpush.bf16.msra.mxu0 %v8381_v35  ;;  %3395 = vmatpush.bf16.msra.mxu1 %v8385_v36  ;;  %v8526_v35 = vld [vmem:[#allocation7 + $0x570] sm:$0xf0]  ;;  %v8532_v36 = vld [vmem:[#allocation7 + $0x538] sm:$0xf] }
 0x1d7   :  { %3408 = vmatpush.bf16.msra.mxu2 %v8389_v39  ;;  %3421 = vmatpush.bf16.msra.mxu3 %v8393_v42  ;;  %v8525_v39 = vor.u32 %v10700_v31, %v8524_v30  ;;  %v8529_v42 = vor.u32 %v10692_v34, %v8526_v35  ;;  %v8533_v45 = vor.u32 %v10701_v41, %v8532_v36  ;;  %v10784_v22 = vld [vmem:[#allocation8 + $0x410] sm:$0xff]  ;;  %v10791_v30 = vld [vmem:[#allocation8 + $0x448] sm:$0xff]  ;;  %v10790_v34 = vld [vmem:[#allocation8 + $0x440] sm:$0xff] }
 0x1d8   :  { %v10799_v31 = vld [vmem:[#allocation8 + $0x488] sm:$0xff]  ;;  %v10821_v35 = vld [vmem:[#allocation8 + $0x538] sm:$0xff] }
 0x1d9   :  { %3383 = vmatmul.bf16.vlgmr.msra.gmra.mxu0 %v11454_v13  ;;  %3396 = vmatmul.bf16.vlgmr.msra.gmra.mxu1 %v11454_v13  ;;  %v10829_v36 = vld [vmem:[#allocation8 + $0x578] sm:$0xff] }
 0x1da   :  { %3427 = vmatpush.bf16.msrb.mxu0 %v8845_v43  ;;  %3440 = vmatpush.bf16.msrb.mxu1 %v8849_v44  ;;  %v8460_v43 = vld [vmem:[#allocation7 + $0x4b0] sm:$0xf]  ;;  %v8858_v41 = vld [vmem:[%s11560_s3 + $0x10] sm:$0xff] }
 0x1db   :  { %3453 = vmatpush.bf16.msrb.mxu2 %v8853_v47  ;;  %3466 = vmatpush.bf16.msrb.mxu3 %v8857_v48  ;;  %v10684_v44 = vld [vmem:[#allocation7 + $0x4ec] sm:$0xf0]  ;;  %v10676_v47 = vld [vmem:[#allocation7 + $0x4b4] sm:$0xf]  ;;  %3491 = vst [vmem:[#allocation1] ss:$9 sm:$0xff] %v8858_v41 }
 0x1dc   :  { %3409 = vmatmul.bf16.vlgmr.msra.gmra.mxu2 %v11454_v13  ;;  %3422 = vmatmul.bf16.vlgmr.msra.gmra.mxu3 %v11454_v13  ;;  %v8462_v48 = vld [vmem:[#allocation7 + $0x4f0] sm:$0xf0]  ;;  %v8461_v52 = vor.u32 %v10684_v44, %v8460_v43 }
 0x1dd   :  { %v8465_v53 = vor.u32 %v10676_v47, %v8462_v48  ;;  %v10820_v43 = vld [vmem:[#allocation8 + $0x530] sm:$0xff]  ;;  %v10819_v47 = vld [vmem:[#allocation8 + $0x528] sm:$0xff] }
 0x1de   :  { %3428 = vmatpush.bf16.msrb.mxu0 %v8781_v54  ;;  %3441 = vmatpush.bf16.msrb.mxu1 %v8785_v55  ;;  %v8396_v54 = vld [vmem:[#allocation7 + $0x430] sm:$0xf]  ;;  %v10827_v48 = vld [vmem:[#allocation8 + $0x568] sm:$0xff] }
 0x1df   :  { %3454 = vmatpush.bf16.msrb.mxu2 %v8789_v61  ;;  %3467 = vmatpush.bf16.msrb.mxu3 %v8793_v26  ;;  %v10668_v55 = vld [vmem:[#allocation7 + $0x46c] sm:$0xf0]  ;;  %v10660_v61 = vld [vmem:[#allocation7 + $0x434] sm:$0xf] }
 0x1e0   :  { %v8398_v26 = vld [vmem:[#allocation7 + $0x470] sm:$0xf0]  ;;  %v8397_v60 = vor.u32 %v10668_v55, %v8396_v54  ;;  %v10817_v54 = vld [vmem:[#allocation8 + $0x518] sm:$0xff] }
 0x1e1   :  { %v8401_v29 = vor.u32 %v10660_v61, %v8398_v26  ;;  %v10828_v44 = vld [vmem:[#allocation8 + $0x570] sm:$0xff]  ;;  %v10825_v55 = vld [vmem:[#allocation8 + $0x558] sm:$0xff] }
 0x1e2   :  { %3429 = vmatpush.bf16.msrb.mxu0 %v8717_v63  ;;  %3442 = vmatpush.bf16.msrb.mxu1 %v8721_v0  ;;  %v8405_v63 = vor.u32 %v10669_v58, %v8404_v16  ;;  %v8409_v0 = vor.u32 %v10661_v59, %v8406_v28  ;;  %v10816_v61 = vld [vmem:[#allocation8 + $0x510] sm:$0xff]  ;;  %v10815_v59 = vld [vmem:[#allocation8 + $0x508] sm:$0xff] }
 0x1e3   :  { %3455 = vmatpush.bf16.msrb.mxu2 %v8725_v4  ;;  %3468 = vmatpush.bf16.msrb.mxu3 %v8729_v5  ;;  %v10805_v4 = vld [vmem:[#allocation8 + $0x4b8] sm:$0xff]  ;;  %v10824_v26 = vld [vmem:[#allocation8 + $0x550] sm:$0xff]  ;;  %v10823_v28 = vld [vmem:[#allocation8 + $0x548] sm:$0xff] }
 0x1e4   :  { %v10813_v5 = vld [vmem:[#allocation8 + $0x4f8] sm:$0xff]  ;;  %v10832_v16 = vld [vmem:[#allocation8 + $0x590] sm:$0xff] }
 0x1e5   :  { %v10840_v58 = vld [vmem:[#allocation8 + $0x5d0] sm:$0xff] }
 0x1e6   :  { %3430 = vmatpush.bf16.msrb.mxu0 %v8653_v11  ;;  %3443 = vmatpush.bf16.msrb.mxu1 %v8657_v12  ;;  %v10803_v11 = vld [vmem:[#allocation8 + $0x4a8] sm:$0xff] }
 0x1e7   :  { %3456 = vmatpush.bf16.msrb.mxu2 %v8661_v18  ;;  %3469 = vmatpush.bf16.msrb.mxu3 %v8665_v19  ;;  %v10811_v12 = vld [vmem:[#allocation8 + $0x4e8] sm:$0xff]  ;;  %v10802_v18 = vld [vmem:[#allocation8 + $0x4a0] sm:$0xff]  ;;  %v10785_v19 = vld [vmem:[#allocation8 + $0x418] sm:$0xff] }
 0x1ea   :  { %3431 = vmatpush.bf16.msrb.mxu0 %v8589_v25  ;;  %3444 = vmatpush.bf16.msrb.mxu1 %v8593_v27  ;;  %v10808_v25 = vld [vmem:[#allocation8 + $0x4d0] sm:$0xff]  ;;  %v10783_v27 = vld [vmem:[#allocation8 + $0x408] sm:$0xff] }
 0x1eb   :  { %3457 = vmatpush.bf16.msrb.mxu2 %v8597_v32  ;;  %3470 = vmatpush.bf16.msrb.mxu3 %v8601_v33  ;;  %v10807_v32 = vld [vmem:[#allocation8 + $0x4c8] sm:$0xff]  ;;  %v10782_v33 = vld [vmem:[#allocation8 + $0x400] sm:$0xff] }
 0x1ee   :  { %3432 = vmatpush.bf16.msrb.mxu0 %v8525_v39  ;;  %3445 = vmatpush.bf16.msrb.mxu1 %v8529_v42  ;;  %v10837_v39 = vld [vmem:[#allocation8 + $0x5b8] sm:$0xff] }
 0x1ef   :  { %3458 = vmatpush.bf16.msrb.mxu2 %v8533_v45  ;;  %3471 = vmatpush.bf16.msrb.mxu3 %v8537_v46  ;;  %v10845_v42 = vld [vmem:[#allocation8 + $0x5f8] sm:$0xff]  ;;  %v10836_v45 = vld [vmem:[#allocation8 + $0x5b0] sm:$0xff] }
 0x1f0   :  { %v10844_v46 = vld [vmem:[#allocation8 + $0x5f0] sm:$0xff] }
 0x1f2   :  { %3433 = vmatpush.bf16.msrb.mxu0 %v8461_v52  ;;  %3446 = vmatpush.bf16.msrb.mxu1 %v8465_v53  ;;  %v10834_v52 = vld [vmem:[#allocation8 + $0x5a0] sm:$0xff] }
 0x1f3   :  { %3459 = vmatpush.bf16.msrb.mxu2 %v8469_v56  ;;  %3472 = vmatpush.bf16.msrb.mxu3 %v8473_v57  ;;  %v10842_v53 = vld [vmem:[#allocation8 + $0x5e0] sm:$0xff]  ;;  %v10833_v56 = vld [vmem:[#allocation8 + $0x598] sm:$0xff] }
 0x1f4   :  { %v10841_v57 = vld [vmem:[#allocation8 + $0x5d8] sm:$0xff] }
 0x1f6   :  { %3434 = vmatpush.bf16.msrb.mxu0 %v8397_v60  ;;  %3447 = vmatpush.bf16.msrb.mxu1 %v8401_v29  ;;  %v3492_v60 = vld [vmem:[#allocation1] sm:$0xff] }
 0x1f7   :  { %3460 = vmatpush.bf16.msrb.mxu2 %v8405_v63  ;;  %3473 = vmatpush.bf16.msrb.mxu3 %v8409_v0  ;;  %v10831_v29 = vld [vmem:[#allocation8 + $0x588] sm:$0xff]  ;;  %v3493_v0 = vld [vmem:[#allocation1 + $0x9] sm:$0xff] }
 0x1f8   :  { %v10839_v63 = vld [vmem:[#allocation8 + $0x5c8] sm:$0xff] }
 0x1f9   :  { %3435 = vmatmul.bf16.vlgmr.msrb.gmra.mxu0 %v11454_v13  ;;  %3448 = vmatmul.bf16.vlgmr.msrb.gmra.mxu1 %v11454_v13 }
 0x1fa   :  { %4692 = vmatpush.bf16.msra.mxu0 %v10789_v1  ;;  %4705 = vmatpush.bf16.msra.mxu1 %v10797_v2  ;;  %v10814_v1 = vld [vmem:[#allocation8 + $0x500] sm:$0xff] }
 0x1fb   :  { %3461 = vmatmul.bf16.vlgmr.msrb.gmra.mxu2 %v11454_v13  ;;  %3474 = vmatmul.bf16.vlgmr.msrb.gmra.mxu3 %v11454_v13  ;;  %v10810_v13 = vld [vmem:[#allocation8 + $0x4e0] sm:$0xff] }
 0x1fc   :  { %4718 = vmatpush.bf16.msra.mxu2 %v10805_v4  ;;  %4731 = vmatpush.bf16.msra.mxu3 %v10813_v5  ;;  %v10822_v2 = vld [vmem:[#allocation8 + $0x540] sm:$0xff]  ;;  %v3495_v5 = vld [vmem:[#allocation1 + $0x1b] sm:$0xff] }
 0x1fd   :  { %v3494_v4 = vld [vmem:[#allocation1 + $0x12] sm:$0xff] }
 0x1fe   :  { %4693 = vmatpush.bf16.msra.mxu0 %v10788_v6  ;;  %4706 = vmatpush.bf16.msra.mxu1 %v10796_v3  ;;  %v3496_v6 = vld [vmem:[#allocation1 + $0x24] sm:$0xff]  ;;  %v3510_v3 = vpack.i.b16 %v3492_v60, %v3492_v60 }
 0x200   :  { %4719 = vmatpush.bf16.msra.mxu2 %v10804_v7  ;;  %4732 = vmatpush.bf16.msra.mxu3 %v10812_v8  ;;  %v3513_v7 = vpack.i.b16 %v3493_v0, %v3493_v0  ;;  %v3497_v8 = vld [vmem:[#allocation1 + $0x2d] sm:$0xff]  ;;  %v10851_v0 = vld [vmem:[#allocation8 + $0x628] sm:$0xff] }
 0x202   :  { %4694 = vmatpush.bf16.msra.mxu0 %v10787_v9  ;;  %4707 = vmatpush.bf16.msra.mxu1 %v10795_v10  ;;  %v10830_v9 = vld [vmem:[#allocation8 + $0x580] sm:$0xff] }
 0x203   :  { %v10838_v10 = vld [vmem:[#allocation8 + $0x5c0] sm:$0xff] }
 0x204   :  { %4720 = vmatpush.bf16.msra.mxu2 %v10803_v11  ;;  %4733 = vmatpush.bf16.msra.mxu3 %v10811_v12  ;;  %v11475_v11 = vld [vmem:[#allocation1 + $0x36] sm:$0xff]  ;;  %v11477_v12 = vld [vmem:[#allocation1 + $0x3f] sm:$0xff] }
 0x206   :  { %4695 = vmatpush.bf16.msra.mxu0 %v10786_v14  ;;  %4708 = vmatpush.bf16.msra.mxu1 %v10794_v17  ;;  %v8859_v14 = vld [vmem:[%s11560_s3 + $0x18] sm:$0xff]  ;;  %v3512_v17 = vperm.slane %v3510_v3, 0 }
 0x207   :  { %3501 = vst [vmem:[#allocation1] ss:$9 sm:$0xff] %v8859_v14  ;;  %v10850_v14 = vld [vmem:[#allocation8 + $0x620] sm:$0xff] }
 0x208   :  { %4721 = vmatpush.bf16.msra.mxu2 %v10802_v18  ;;  %4734 = vmatpush.bf16.msra.mxu3 %v10810_v13  ;;  %v3515_v18 = vperm.slane %v3513_v7, 0 }
 0x20a   :  { %4696 = vmatpush.bf16.msra.mxu0 %v10785_v19  ;;  %4709 = vmatpush.bf16.msra.mxu1 %v10793_v20  ;;  %v3516_v20 = vpack.i.b16 %v3494_v4, %v3494_v4 }
 0x20c   :  { %4722 = vmatpush.bf16.msra.mxu2 %v10801_v40  ;;  %4735 = vmatpush.bf16.msra.mxu3 %v10809_v21  ;;  %v3519_v40 = vpack.i.b16 %v3495_v5, %v3495_v5 }
 0x20e   :  { %4697 = vmatpush.bf16.msra.mxu0 %v10784_v22  ;;  %4710 = vmatpush.bf16.msra.mxu1 %v10792_v23  ;;  %v3574_v22 = vunpack.c.l.bf16 %v3512_v17  ;;  %v3575_v23 = vunpack.c.l.bf16 %v3515_v18  ;;  %v10858_v17 = vld [vmem:[#allocation8 + $0x660] sm:$0xff] }
 0x210   :  { %4723 = vmatpush.bf16.msra.mxu2 %v10800_v24  ;;  %4736 = vmatpush.bf16.msra.mxu3 %v10808_v25 }
 0x212   :  { %4698 = vmatpush.bf16.msra.mxu0 %v10783_v27  ;;  %4711 = vmatpush.bf16.msra.mxu1 %v10791_v30  ;;  %v3518_v27 = vperm.slane %v3516_v20, 0  ;;  %v3521_v30 = vperm.slane %v3519_v40, 0 }
 0x214   :  { %4724 = vmatpush.bf16.msra.mxu2 %v10799_v31  ;;  %4737 = vmatpush.bf16.msra.mxu3 %v10807_v32 }
 0x216   :  { %4699 = vmatpush.bf16.msra.mxu0 %v10782_v33  ;;  %4712 = vmatpush.bf16.msra.mxu1 %v10790_v34 }
 0x218   :  { %4725 = vmatpush.bf16.msra.mxu2 %v10798_v37  ;;  %4738 = vmatpush.bf16.msra.mxu3 %v10806_v38  ;;  %v3576_v37 = vunpack.c.l.bf16 %v3518_v27  ;;  %v3577_v38 = vunpack.c.l.bf16 %v3521_v30 }
 0x21a   :  { %4744 = vmatpush.bf16.msrb.mxu0 %v10821_v35  ;;  %4757 = vmatpush.bf16.msrb.mxu1 %v10829_v36 }
 0x21c   :  { %4770 = vmatpush.bf16.msrb.mxu2 %v10837_v39  ;;  %4783 = vmatpush.bf16.msrb.mxu3 %v10845_v42 }
 0x21e   :  { %4745 = vmatpush.bf16.msrb.mxu0 %v10820_v43  ;;  %4758 = vmatpush.bf16.msrb.mxu1 %v10828_v44  ;;  %v10853_v43 = vld [vmem:[#allocation8 + $0x638] sm:$0xff] }
 0x21f   :  { %v10861_v44 = vld [vmem:[#allocation8 + $0x678] sm:$0xff] }
 0x220   :  { %4771 = vmatpush.bf16.msrb.mxu2 %v10836_v45  ;;  %4784 = vmatpush.bf16.msrb.mxu3 %v10844_v46 }
 0x222   :  { %4746 = vmatpush.bf16.msrb.mxu0 %v10819_v47  ;;  %4759 = vmatpush.bf16.msrb.mxu1 %v10827_v48  ;;  %v3522_v47 = vpack.i.b16 %v3496_v6, %v3496_v6  ;;  %v3525_v48 = vpack.i.b16 %v3497_v8, %v3497_v8  ;;  %v10868_v8 = vld [vmem:[#allocation8 + $0x6b0] sm:$0xff] }
 0x224   :  { %4772 = vmatpush.bf16.msrb.mxu2 %v10835_v15  ;;  %4785 = vmatpush.bf16.msrb.mxu3 %v10843_v49 }
 0x226   :  { %4747 = vmatpush.bf16.msrb.mxu0 %v10818_v50  ;;  %4760 = vmatpush.bf16.msrb.mxu1 %v10826_v51 }
 0x228   :  { %4773 = vmatpush.bf16.msrb.mxu2 %v10834_v52  ;;  %4786 = vmatpush.bf16.msrb.mxu3 %v10842_v53  ;;  %v10852_v52 = vld [vmem:[#allocation8 + $0x630] sm:$0xff] }
 0x229   :  { %v10860_v53 = vld [vmem:[#allocation8 + $0x670] sm:$0xff] }
 0x22a   :  { %4748 = vmatpush.bf16.msrb.mxu0 %v10817_v54  ;;  %4761 = vmatpush.bf16.msrb.mxu1 %v10825_v55  ;;  %v3524_v54 = vperm.slane %v3522_v47, 0  ;;  %v3527_v55 = vperm.slane %v3525_v48, 0  ;;  %v10856_v47 = vld [vmem:[#allocation8 + $0x650] sm:$0xff] }
 0x22c   :  { %4774 = vmatpush.bf16.msrb.mxu2 %v10833_v56  ;;  %4787 = vmatpush.bf16.msrb.mxu3 %v10841_v57  ;;  %v3578_v5 = vunpack.c.l.bf16 %v3524_v54  ;;  %v3579_v6 = vunpack.c.l.bf16 %v3527_v55  ;;  %v10873_v54 = vld [vmem:[#allocation8 + $0x6d8] sm:$0xff]  ;;  %v3504_v55 = vld [vmem:[#allocation1 + $0x12] sm:$0xff] }
 0x22e   :  { %4749 = vmatpush.bf16.msrb.mxu0 %v10816_v61  ;;  %4762 = vmatpush.bf16.msrb.mxu1 %v10824_v26 }
 0x230   :  { %4775 = vmatpush.bf16.msrb.mxu2 %v10832_v16  ;;  %4788 = vmatpush.bf16.msrb.mxu3 %v10840_v58  ;;  %v10869_v16 = vld [vmem:[#allocation8 + $0x6b8] sm:$0xff] }
 0x231   :  { %v10877_v58 = vld [vmem:[#allocation8 + $0x6f8] sm:$0xff] }
 0x232   :  { %4750 = vmatpush.bf16.msrb.mxu0 %v10815_v59  ;;  %4763 = vmatpush.bf16.msrb.mxu1 %v10823_v28  ;;  %v3528_v59 = vpack.i.b16 %v11475_v11, %v11475_v11 }
 0x234   :  { %4776 = vmatpush.bf16.msrb.mxu2 %v10831_v29  ;;  %4789 = vmatpush.bf16.msrb.mxu3 %v10839_v63 }
 0x235   :  { %v3280_v13 = vpop.f32.mrf.mxu0  ;;  %v3293_v19 = vpop.f32.mrf.mxu1 }
 0x236   :  { %4751 = vmatpush.bf16.msrb.mxu0 %v10814_v1  ;;  %4764 = vmatpush.bf16.msrb.mxu1 %v10822_v2  ;;  %v3479_v21 = vpack.c.bf16 %v3293_v19, %v3280_v13  ;;  %v10859_v1 = vld [vmem:[#allocation8 + $0x668] sm:$0xff]  ;;  %v3531_v2 = vpack.i.b16 %v11477_v12, %v11477_v12 }
 0x238   :  { %4777 = vmatpush.bf16.msrb.mxu2 %v10830_v9  ;;  %4790 = vmatpush.bf16.msrb.mxu3 %v10838_v10  ;;  %v3558_v24 = vunpack.c.l.bf16 %v3479_v21  ;;  %v3559_v25 = vunpack.c.h.bf16 %v3479_v21  ;;  %v10876_v9 = vld [vmem:[#allocation8 + $0x6f0] sm:$0xff]  ;;  %v3530_v10 = vperm.slane %v3528_v59, 0  ;;  %v3533_v11 = vperm.slane %v3531_v2, 0  ;;  %v10867_v21 = vld [vmem:[#allocation8 + $0x6a8] sm:$0xff] }
 0x239   :  { %v10872_v2 = vld [vmem:[#allocation8 + $0x6d0] sm:$0xff] }
 0x23a   :  { %v3590_v31 = vadd.f32 %v3574_v22, %v3558_v24  ;;  %v3591_v32 = vadd.f32 %v3575_v23, %v3559_v25  ;;  %v10875_v22 = vld [vmem:[#allocation8 + $0x6e8] sm:$0xff]  ;;  %v3580_v24 = vunpack.c.l.bf16 %v3530_v10  ;;  %v3581_v25 = vunpack.c.l.bf16 %v3533_v11  ;;  %v10893_v10 = vld [vmem:[#allocation8 + $0x778] sm:$0xff] }
 0x23c   :  { %v3630_v33 = vmax.f32 %v3590_v31, 0.0  ;;  %v3631_v34 = vmax.f32 %v3591_v32, 0.0  ;;  %v3306_v35 = vpop.f32.mrf.mxu2  ;;  %v3319_v36 = vpop.f32.mrf.mxu3  ;;  %v3502_v31 = vld [vmem:[#allocation1] sm:$0xff]  ;;  %v3503_v32 = vld [vmem:[#allocation1 + $0x9] sm:$0xff] }
 0x23d   :  { %v3480_v41 = vpack.c.bf16 %v3319_v36, %v3306_v35  ;;  %v3282_v39 = vpop.f32.mrf.mxu0  ;;  %v3295_v42 = vpop.f32.mrf.mxu1  ;;  %v10849_v35 = vld [vmem:[#allocation8 + $0x618] sm:$0xff] }
 0x23e   :  { %v3646_v45 = vpack.c.bf16 %v3630_v33, %v3630_v33  ;;  %v3647_v46 = vpack.c.bf16 %v3631_v34, %v3631_v34  ;;  %v10857_v36 = vld [vmem:[#allocation8 + $0x658] sm:$0xff]  ;;  %v10874_v39 = vld [vmem:[#allocation8 + $0x6e0] sm:$0xff]  ;;  %v3534_v42 = vpack.i.b16 %v3502_v31, %v3502_v31 }
 0x23f   :  { %v3560_v15 = vunpack.c.l.bf16 %v3480_v41  ;;  %v3561_v49 = vunpack.c.h.bf16 %v3480_v41 }
 0x240   :  { %4700 = vmatmul.bf16.vlgmr.msra.gmra.mxu0 %v3646_v45  ;;  %4713 = vmatmul.bf16.vlgmr.msra.gmra.mxu1 %v3647_v46  ;;  %v10848_v46 = vld [vmem:[#allocation8 + $0x610] sm:$0xff] }
 0x241   :  { %v3592_v50 = vadd.f32 %v3576_v37, %v3560_v15  ;;  %v3593_v51 = vadd.f32 %v3577_v38, %v3561_v49  ;;  %4796 = vmatpush.bf16.msra.mxu0 %v10853_v43  ;;  %4809 = vmatpush.bf16.msra.mxu1 %v10861_v44  ;;  %v10866_v38 = vld [vmem:[#allocation8 + $0x6a0] sm:$0xff]  ;;  %v3537_v43 = vpack.i.b16 %v3503_v32, %v3503_v32  ;;  %v10865_v49 = vld [vmem:[#allocation8 + $0x698] sm:$0xff] }
 0x242   :  { %v10862_v32 = vld [vmem:[#allocation8 + $0x680] sm:$0xff] }
 0x243   :  { %v3632_v56 = vmax.f32 %v3592_v50, 0.0  ;;  %v3633_v57 = vmax.f32 %v3593_v51, 0.0 }
 0x244   :  { %v3308_v61 = vpop.f32.mrf.mxu2  ;;  %v3321_v26 = vpop.f32.mrf.mxu3 }
 0x245   :  { %v3648_v28 = vpack.c.bf16 %v3632_v56, %v3632_v56  ;;  %v3649_v60 = vpack.c.bf16 %v3633_v57, %v3633_v57  ;;  %4797 = vmatpush.bf16.msra.mxu0 %v10852_v52  ;;  %4810 = vmatpush.bf16.msra.mxu1 %v10860_v53  ;;  %v3332_v29 = vpop.f32.mrf.mxu0  ;;  %v3345_v63 = vpop.f32.mrf.mxu1  ;;  %v3536_v52 = vperm.slane %v3534_v42, 0  ;;  %v3539_v53 = vperm.slane %v3537_v43, 0  ;;  %v3505_v56 = vld [vmem:[#allocation1 + $0x1b] sm:$0xff] }
 0x246   :  { %v3481_v4 = vpack.c.bf16 %v3345_v63, %v3332_v29  ;;  %v10847_v26 = vld [vmem:[#allocation8 + $0x608] sm:$0xff] }
 0x247   :  { %4726 = vmatmul.bf16.vlgmr.msra.gmra.mxu2 %v3648_v28  ;;  %4739 = vmatmul.bf16.vlgmr.msra.gmra.mxu3 %v3649_v60  ;;  %v3540_v28 = vpack.i.b16 %v3504_v55, %v3504_v55  ;;  %v3543_v60 = vpack.i.b16 %v3505_v56, %v3505_v56  ;;  %v3582_v63 = vunpack.c.l.bf16 %v3536_v52  ;;  %v10891_v42 = vld [vmem:[#allocation8 + $0x768] sm:$0xff]  ;;  %v3507_v55 = vld [vmem:[#allocation1 + $0x2d] sm:$0xff] }
 0x248   :  { %v3562_v3 = vunpack.c.l.bf16 %v3481_v4  ;;  %v3563_v7 = vunpack.c.h.bf16 %v3481_v4  ;;  %4822 = vmatpush.bf16.msra.mxu2 %v10869_v16  ;;  %4835 = vmatpush.bf16.msra.mxu3 %v10877_v58  ;;  %v10855_v16 = vld [vmem:[#allocation8 + $0x648] sm:$0xff]  ;;  %v10881_v56 = vld [vmem:[#allocation8 + $0x718] sm:$0xff] }
 0x249   :  { %4798 = vmatpush.bf16.msra.mxu0 %v10851_v0  ;;  %4811 = vmatpush.bf16.msra.mxu1 %v10859_v1  ;;  %v3583_v0 = vunpack.c.l.bf16 %v3539_v53  ;;  %v10864_v1 = vld [vmem:[#allocation8 + $0x690] sm:$0xff]  ;;  %v10899_v52 = vld [vmem:[#allocation8 + $0x7a8] sm:$0xff] }
 0x24a   :  { %v3594_v18 = vadd.f32 %v3578_v5, %v3562_v3  ;;  %v3595_v13 = vadd.f32 %v3579_v6, %v3563_v7  ;;  %v10846_v6 = vld [vmem:[#allocation8 + $0x600] sm:$0xff]  ;;  %v3542_v7 = vperm.slane %v3540_v28, 0  ;;  %v10907_v53 = vld [vmem:[#allocation8 + $0x7e8] sm:$0xff]  ;;  %v10888_v28 = vld [vmem:[#allocation8 + $0x750] sm:$0xff] }
 0x24b   :  { %v10854_v3 = vld [vmem:[#allocation8 + $0x640] sm:$0xff] }
 0x24c   :  { %v3634_v12 = vmax.f32 %v3594_v18, 0.0  ;;  %v3635_v19 = vmax.f32 %v3595_v13, 0.0  ;;  %4823 = vmatpush.bf16.msra.mxu2 %v10868_v8  ;;  %4836 = vmatpush.bf16.msra.mxu3 %v10876_v9  ;;  %v3358_v20 = vpop.f32.mrf.mxu2  ;;  %v3371_v40 = vpop.f32.mrf.mxu3  ;;  %v3545_v8 = vperm.slane %v3543_v60, 0  ;;  %v10885_v9 = vld [vmem:[#allocation8 + $0x738] sm:$0xff]  ;;  %v10871_v18 = vld [vmem:[#allocation8 + $0x6c8] sm:$0xff] }
 0x24d   :  { %v3482_v23 = vpack.c.bf16 %v3371_v40, %v3358_v20  ;;  %4799 = vmatpush.bf16.msra.mxu0 %v10850_v14  ;;  %4812 = vmatpush.bf16.msra.mxu1 %v10858_v17  ;;  %v3334_v27 = vpop.f32.mrf.mxu0  ;;  %v3347_v30 = vpop.f32.mrf.mxu1  ;;  %v10863_v17 = vld [vmem:[#allocation8 + $0x688] sm:$0xff] }
 0x24e   :  { %v3650_v33 = vpack.c.bf16 %v3634_v12, %v3634_v12  ;;  %v3651_v34 = vpack.c.bf16 %v3635_v19, %v3635_v19  ;;  %v10892_v27 = vld [vmem:[#allocation8 + $0x770] sm:$0xff] }
 0x24f   :  { %v3564_v41 = vunpack.c.l.bf16 %v3482_v23  ;;  %v3565_v37 = vunpack.c.h.bf16 %v3482_v23 }
 0x250   :  { %4824 = vmatpush.bf16.msra.mxu2 %v10867_v21  ;;  %4837 = vmatpush.bf16.msra.mxu3 %v10875_v22  ;;  %v3584_v21 = vunpack.c.l.bf16 %v3542_v7  ;;  %v3585_v22 = vunpack.c.l.bf16 %v3545_v8 }
 0x251   :  { %v3596_v44 = vadd.f32 %v3580_v24, %v3564_v41  ;;  %v3597_v45 = vadd.f32 %v3581_v25, %v3565_v37  ;;  %4752 = vmatmul.bf16.vlgmr.msrb.gmra.mxu0 %v3650_v33  ;;  %4765 = vmatmul.bf16.vlgmr.msrb.gmra.mxu1 %v3651_v34  ;;  %v10884_v25 = vld [vmem:[#allocation8 + $0x730] sm:$0xff]  ;;  %v10870_v33 = vld [vmem:[#allocation8 + $0x6c0] sm:$0xff]  ;;  %v10909_v41 = vld [vmem:[#allocation8 + $0x7f8] sm:$0xff] }
 0x252   :  { %4800 = vmatpush.bf16.msra.mxu0 %v10849_v35  ;;  %4813 = vmatpush.bf16.msra.mxu1 %v10857_v36  ;;  %v10901_v36 = vld [vmem:[#allocation8 + $0x7b8] sm:$0xff] }
 0x253   :  { %v3636_v48 = vmax.f32 %v3596_v44, 0.0  ;;  %v3637_v15 = vmax.f32 %v3597_v45, 0.0 }
 0x254   :  { %4825 = vmatpush.bf16.msra.mxu2 %v10866_v38  ;;  %4838 = vmatpush.bf16.msra.mxu3 %v10874_v39  ;;  %v3360_v50 = vpop.f32.mrf.mxu2  ;;  %v3373_v51 = vpop.f32.mrf.mxu3  ;;  %v10883_v39 = vld [vmem:[#allocation8 + $0x728] sm:$0xff] }
 0x255   :  { %v3652_v57 = vpack.c.bf16 %v3636_v48, %v3636_v48  ;;  %v3653_v61 = vpack.c.bf16 %v3637_v15, %v3637_v15  ;;  %v10908_v48 = vld [vmem:[#allocation8 + $0x7f0] sm:$0xff]  ;;  %v10882_v50 = vld [vmem:[#allocation8 + $0x720] sm:$0xff] }
 0x256   :  { %4801 = vmatpush.bf16.msra.mxu0 %v10848_v46  ;;  %4814 = vmatpush.bf16.msra.mxu1 %v10856_v47  ;;  %v3384_v58 = vpop.f32.mrf.mxu0  ;;  %v3397_v59 = vpop.f32.mrf.mxu1  ;;  %v10900_v47 = vld [vmem:[#allocation8 + $0x7b0] sm:$0xff]  ;;  %v10890_v51 = vld [vmem:[#allocation8 + $0x760] sm:$0xff] }
 0x257   :  { %4778 = vmatmul.bf16.vlgmr.msrb.gmra.mxu2 %v3652_v57  ;;  %4791 = vmatmul.bf16.vlgmr.msrb.gmra.mxu3 %v3653_v61  ;;  %v3483_v29 = vpack.c.bf16 %v3397_v59, %v3384_v58  ;;  %v10889_v57 = vld [vmem:[#allocation8 + $0x758] sm:$0xff]  ;;  %v10906_v58 = vld [vmem:[#allocation8 + $0x7e0] sm:$0xff]  ;;  %v10880_v59 = vld [vmem:[#allocation8 + $0x710] sm:$0xff] }
 0x258   :  { %4826 = vmatpush.bf16.msra.mxu2 %v10865_v49  ;;  %4839 = vmatpush.bf16.msra.mxu3 %v10873_v54  ;;  %v3506_v54 = vld [vmem:[#allocation1 + $0x24] sm:$0xff] }
 0x259   :  { %v3566_v4 = vunpack.c.l.bf16 %v3483_v29  ;;  %v3567_v5 = vunpack.c.h.bf16 %v3483_v29  ;;  %v3546_v61 = vpack.i.b16 %v3506_v54, %v3506_v54 }
 0x25a   :  { %4802 = vmatpush.bf16.msra.mxu0 %v10847_v26  ;;  %4815 = vmatpush.bf16.msra.mxu1 %v10855_v16  ;;  %v3549_v26 = vpack.i.b16 %v3507_v55, %v3507_v55  ;;  %v10898_v16 = vld [vmem:[#allocation8 + $0x7a0] sm:$0xff] }
 0x25b   :  { %v3598_v11 = vadd.f32 %v3582_v63, %v3566_v4  ;;  %v3599_v14 = vadd.f32 %v3583_v0, %v3567_v5  ;;  %v3548_v60 = vperm.slane %v3546_v61, 0  ;;  %v3508_v63 = vld [vmem:[#allocation1 + $0x36] sm:$0xff]  ;;  %v3509_v0 = vld [vmem:[#allocation1 + $0x3f] sm:$0xff] }
 0x25c   :  { %4827 = vmatpush.bf16.msra.mxu2 %v10864_v1  ;;  %4840 = vmatpush.bf16.msra.mxu3 %v10872_v2  ;;  %v3551_v29 = vperm.slane %v3549_v26, 0  ;;  %v10897_v1 = vld [vmem:[#allocation8 + $0x798] sm:$0xff]  ;;  %v10879_v4 = vld [vmem:[#allocation8 + $0x708] sm:$0xff]  ;;  %v3552_v7 = vpack.i.b16 %v3508_v63, %v3508_v63  ;;  %v3555_v8 = vpack.i.b16 %v3509_v0, %v3509_v0  ;;  %v9824_v55 = vld [vmem:[#allocation7 + $0xbc0] sm:$0xf0] }
 0x25d   :  { %v3638_v13 = vmax.f32 %v3598_v11, 0.0  ;;  %v3639_v12 = vmax.f32 %v3599_v14, 0.0  ;;  %v10905_v2 = vld [vmem:[#allocation8 + $0x7d8] sm:$0xff]  ;;  %v10887_v5 = vld [vmem:[#allocation8 + $0x748] sm:$0xff]  ;;  %v10896_v14 = vld [vmem:[#allocation8 + $0x790] sm:$0xff] }
 0x25e   :  { %4803 = vmatpush.bf16.msra.mxu0 %v10846_v6  ;;  %4816 = vmatpush.bf16.msra.mxu1 %v10854_v3  ;;  %v3386_v23 = vpop.f32.mrf.mxu0  ;;  %v3399_v24 = vpop.f32.mrf.mxu1  ;;  %v3587_v11 = vunpack.c.l.bf16 %v3551_v29  ;;  %v11006_v29 = vld [vmem:[#allocation7 + $0xb04] sm:$0xf] }
 0x25f   :  { %v3410_v19 = vpop.f32.mrf.mxu2  ;;  %v3423_v20 = vpop.f32.mrf.mxu3  ;;  %v3654_v30 = vpack.c.bf16 %v3638_v13, %v3638_v13  ;;  %v3655_v31 = vpack.c.bf16 %v3639_v12, %v3639_v12  ;;  %v10878_v12 = vld [vmem:[#allocation8 + $0x700] sm:$0xff]  ;;  %v10895_v23 = vld [vmem:[#allocation8 + $0x788] sm:$0xff] }
 0x260   :  { %v3484_v40 = vpack.c.bf16 %v3423_v20, %v3410_v19  ;;  %4828 = vmatpush.bf16.msra.mxu2 %v10863_v17  ;;  %4841 = vmatpush.bf16.msra.mxu3 %v10871_v18  ;;  %v10904_v17 = vld [vmem:[#allocation8 + $0x7d0] sm:$0xff]  ;;  %v10886_v19 = vld [vmem:[#allocation8 + $0x740] sm:$0xff]  ;;  %v3554_v20 = vperm.slane %v3552_v7, 0  ;;  %v10903_v24 = vld [vmem:[#allocation8 + $0x7c8] sm:$0xff] }
 0x261   :  { %4804 = vmatmul.bf16.vlgmr.msra.gmra.mxu0 %v3654_v30  ;;  %4817 = vmatmul.bf16.vlgmr.msra.gmra.mxu1 %v3655_v31  ;;  %v9760_v0 = vld [vmem:[#allocation7 + $0xb40] sm:$0xf0]  ;;  %v11007_v7 = vld [vmem:[#allocation7 + $0xb0c] sm:$0xf] }
 0x262   :  { %4848 = vmatpush.bf16.msrb.mxu0 %v10885_v9  ;;  %4861 = vmatpush.bf16.msrb.mxu1 %v10893_v10  ;;  %v3568_v34 = vunpack.c.l.bf16 %v3484_v40  ;;  %v3569_v35 = vunpack.c.h.bf16 %v3484_v40  ;;  %v3586_v10 = vunpack.c.l.bf16 %v3548_v60  ;;  %v3557_v40 = vperm.slane %v3555_v8, 0  ;;  %v11014_v60 = vld [vmem:[#allocation7 + $0xb3c] sm:$0xf0]  ;;  %v9768_v8 = vld [vmem:[#allocation7 + $0xb48] sm:$0xf0] }
 0x264   :  { %v3600_v37 = vadd.f32 %v3584_v21, %v3568_v34  ;;  %v3601_v38 = vadd.f32 %v3585_v22, %v3569_v35  ;;  %4829 = vmatpush.bf16.msra.mxu2 %v10862_v32  ;;  %4842 = vmatpush.bf16.msra.mxu3 %v10870_v33  ;;  %v3588_v33 = vunpack.c.l.bf16 %v3554_v20  ;;  %v3589_v34 = vunpack.c.l.bf16 %v3557_v40  ;;  %v10991_v40 = vld [vmem:[#allocation7 + $0xa8c] sm:$0xf] }
 0x266   :  { %4849 = vmatpush.bf16.msrb.mxu0 %v10884_v25  ;;  %4862 = vmatpush.bf16.msrb.mxu1 %v10892_v27  ;;  %v3640_v43 = vmax.f32 %v3600_v37, 0.0  ;;  %v3641_v44 = vmax.f32 %v3601_v38, 0.0 }
 0x267   :  { %v3412_v45 = vpop.f32.mrf.mxu2  ;;  %v3425_v46 = vpop.f32.mrf.mxu3 }
 0x268   :  { %4874 = vmatpush.bf16.msrb.mxu2 %v10901_v36  ;;  %4887 = vmatpush.bf16.msrb.mxu3 %v10909_v41  ;;  %v3656_v15 = vpack.c.bf16 %v3640_v43, %v3640_v43  ;;  %v3657_v49 = vpack.c.bf16 %v3641_v44, %v3641_v44  ;;  %v10902_v43 = vld [vmem:[#allocation8 + $0x7c0] sm:$0xff] }
 0x26a   :  { %4850 = vmatpush.bf16.msrb.mxu0 %v10883_v39  ;;  %4863 = vmatpush.bf16.msrb.mxu1 %v10891_v42  ;;  %v10894_v42 = vld [vmem:[#allocation8 + $0x780] sm:$0xff] }
 0x26b   :  { %4830 = vmatmul.bf16.vlgmr.msra.gmra.mxu2 %v3656_v15  ;;  %4843 = vmatmul.bf16.vlgmr.msra.gmra.mxu3 %v3657_v49 }
 0x26c   :  { %4875 = vmatpush.bf16.msrb.mxu2 %v10900_v47  ;;  %4888 = vmatpush.bf16.msrb.mxu3 %v10908_v48 }
 0x26e   :  { %4851 = vmatpush.bf16.msrb.mxu0 %v10882_v50  ;;  %4864 = vmatpush.bf16.msrb.mxu1 %v10890_v51  ;;  %v9822_v51 = vld [vmem:[#allocation7 + $0xb80] sm:$0xf] }
 0x270   :  { %4876 = vmatpush.bf16.msrb.mxu2 %v10899_v52  ;;  %4889 = vmatpush.bf16.msrb.mxu3 %v10907_v53  ;;  %v11030_v52 = vld [vmem:[#allocation7 + $0xbbc] sm:$0xf0]  ;;  %v11022_v53 = vld [vmem:[#allocation7 + $0xb84] sm:$0xf] }
 0x271   :  { %v9823_v54 = vor.u32 %v11030_v52, %v9822_v51  ;;  %v9827_v61 = vor.u32 %v11022_v53, %v9824_v55  ;;  %v10950_v55 = vld [vmem:[#allocation7 + $0x93c] sm:$0xf0] }
 0x272   :  { %4852 = vmatpush.bf16.msrb.mxu0 %v10881_v56  ;;  %4865 = vmatpush.bf16.msrb.mxu1 %v10889_v57  ;;  %v9830_v56 = vld [vmem:[#allocation7 + $0xb88] sm:$0xf] }
 0x273   :  { %v11031_v57 = vld [vmem:[#allocation7 + $0xbc4] sm:$0xf0] }
 0x274   :  { %4877 = vmatpush.bf16.msrb.mxu2 %v10898_v16  ;;  %4890 = vmatpush.bf16.msrb.mxu3 %v10906_v58  ;;  %v9831_v26 = vor.u32 %v11031_v57, %v9830_v56  ;;  %v11023_v16 = vld [vmem:[#allocation7 + $0xb8c] sm:$0xf]  ;;  %v10942_v56 = vld [vmem:[#allocation7 + $0x904] sm:$0xf] }
 0x275   :  { %v9832_v58 = vld [vmem:[#allocation7 + $0xbc8] sm:$0xf0] }
 0x276   :  { %4853 = vmatpush.bf16.msrb.mxu0 %v10880_v59  ;;  %4866 = vmatpush.bf16.msrb.mxu1 %v10888_v28  ;;  %v3436_v6 = vpop.f32.mrf.mxu0  ;;  %v3449_v3 = vpop.f32.mrf.mxu1  ;;  %v9835_v59 = vor.u32 %v11023_v16, %v9832_v58  ;;  %v9758_v28 = vld [vmem:[#allocation7 + $0xb00] sm:$0xf]  ;;  %v10951_v16 = vld [vmem:[#allocation7 + $0x944] sm:$0xf0] }
 0x277   :  { %v3485_v9 = vpack.c.bf16 %v3449_v3, %v3436_v6  ;;  %v9759_v63 = vor.u32 %v11014_v60, %v9758_v28  ;;  %v9763_v6 = vor.u32 %v11006_v29, %v9760_v0  ;;  %v10943_v28 = vld [vmem:[#allocation7 + $0x90c] sm:$0xf] }
 0x278   :  { %4878 = vmatpush.bf16.msrb.mxu2 %v10897_v1  ;;  %4891 = vmatpush.bf16.msrb.mxu3 %v10905_v2  ;;  %v9766_v1 = vld [vmem:[#allocation7 + $0xb08] sm:$0xf]  ;;  %v9512_v60 = vld [vmem:[#allocation7 + $0x948] sm:$0xf0] }
 0x279   :  { %v3570_v18 = vunpack.c.l.bf16 %v3485_v9  ;;  %v3571_v13 = vunpack.c.h.bf16 %v3485_v9  ;;  %v11015_v2 = vld [vmem:[#allocation7 + $0xb44] sm:$0xf0]  ;;  %v9771_v9 = vor.u32 %v11007_v7, %v9768_v8  ;;  %v9515_v0 = vor.u32 %v10943_v28, %v9512_v60  ;;  %v9440_v7 = vld [vmem:[#allocation7 + $0x8c0] sm:$0xf0] }
 0x27a   :  { %4854 = vmatpush.bf16.msrb.mxu0 %v10879_v4  ;;  %4867 = vmatpush.bf16.msrb.mxu1 %v10887_v5  ;;  %v9767_v3 = vor.u32 %v11015_v2, %v9766_v1  ;;  %v9438_v1 = vld [vmem:[#allocation7 + $0x880] sm:$0xf]  ;;  %v9446_v8 = vld [vmem:[#allocation7 + $0x888] sm:$0xf] }
 0x27b   :  { %v3602_v21 = vadd.f32 %v3586_v10, %v3570_v18  ;;  %v3603_v22 = vadd.f32 %v3587_v11, %v3571_v13  ;;  %v9694_v10 = vld [vmem:[#allocation7 + $0xa80] sm:$0xf]  ;;  %v9696_v18 = vld [vmem:[#allocation7 + $0xac0] sm:$0xf0]  ;;  %v9702_v13 = vld [vmem:[#allocation7 + $0xa88] sm:$0xf] }
 0x27c   :  { %4879 = vmatpush.bf16.msrb.mxu2 %v10896_v14  ;;  %4892 = vmatpush.bf16.msrb.mxu3 %v10904_v17  ;;  %v10998_v11 = vld [vmem:[#allocation7 + $0xabc] sm:$0xf0]  ;;  %v10990_v14 = vld [vmem:[#allocation7 + $0xa84] sm:$0xf] }
 0x27d   :  { %v3642_v25 = vmax.f32 %v3602_v21, 0.0  ;;  %v3643_v27 = vmax.f32 %v3603_v22, 0.0  ;;  %v9695_v17 = vor.u32 %v10998_v11, %v9694_v10  ;;  %v9704_v21 = vld [vmem:[#allocation7 + $0xac8] sm:$0xf0]  ;;  %v10934_v2 = vld [vmem:[#allocation7 + $0x8bc] sm:$0xf0] }
 0x27e   :  { %v3462_v30 = vpop.f32.mrf.mxu2  ;;  %v3475_v31 = vpop.f32.mrf.mxu3  ;;  %4855 = vmatpush.bf16.msrb.mxu0 %v10878_v12  ;;  %4868 = vmatpush.bf16.msrb.mxu1 %v10886_v19  ;;  %v10999_v12 = vld [vmem:[#allocation7 + $0xac4] sm:$0xf0]  ;;  %v9699_v19 = vor.u32 %v10990_v14, %v9696_v18  ;;  %v9707_v22 = vor.u32 %v10991_v40, %v9704_v21  ;;  %v10927_v14 = vld [vmem:[#allocation7 + $0x88c] sm:$0xf]  ;;  %v10910_v40 = vld [vmem:[#allocation7 + $0x804] sm:$0xf] }
 0x27f   :  { %v3486_v32 = vpack.c.bf16 %v3475_v31, %v3462_v30  ;;  %v3438_v35 = vpop.f32.mrf.mxu0  ;;  %v3451_v36 = vpop.f32.mrf.mxu1  ;;  %v3658_v41 = vpack.c.bf16 %v3642_v25, %v3642_v25  ;;  %v3659_v37 = vpack.c.bf16 %v3643_v27, %v3643_v27  ;;  %v9703_v20 = vor.u32 %v10999_v12, %v9702_v13  ;;  %v10974_v25 = vld [vmem:[#allocation7 + $0xa04] sm:$0xf]  ;;  %v9638_v31 = vld [vmem:[#allocation7 + $0xa08] sm:$0xf] }
 0x280   :  { %4880 = vmatpush.bf16.msrb.mxu2 %v10895_v23  ;;  %4893 = vmatpush.bf16.msrb.mxu3 %v10903_v24  ;;  %v9630_v23 = vld [vmem:[#allocation7 + $0xa00] sm:$0xf]  ;;  %v9632_v30 = vld [vmem:[#allocation7 + $0xa40] sm:$0xf0]  ;;  %v10975_v35 = vld [vmem:[#allocation7 + $0xa0c] sm:$0xf] }
 0x281   :  { %v3572_v38 = vunpack.c.l.bf16 %v3486_v32  ;;  %v3573_v39 = vunpack.c.h.bf16 %v3486_v32  ;;  %4856 = vmatmul.bf16.vlgmr.msrb.gmra.mxu0 %v3658_v41  ;;  %4869 = vmatmul.bf16.vlgmr.msrb.gmra.mxu1 %v3659_v37  ;;  %v10982_v24 = vld [vmem:[#allocation7 + $0xa3c] sm:$0xf0]  ;;  %v10983_v32 = vld [vmem:[#allocation7 + $0xa44] sm:$0xf0]  ;;  %v9640_v36 = vld [vmem:[#allocation7 + $0xa48] sm:$0xf0] }
 0x282   :  { %5672 = vmatpush.bf16.msra.mxu0 %v9823_v54  ;;  %5685 = vmatpush.bf16.msra.mxu1 %v9827_v61  ;;  %v9631_v27 = vor.u32 %v10982_v24, %v9630_v23  ;;  %v9502_v54 = vld [vmem:[#allocation7 + $0x900] sm:$0xf]  ;;  %v9504_v61 = vld [vmem:[#allocation7 + $0x940] sm:$0xf0]  ;;  %v9382_v23 = vld [vmem:[#allocation7 + $0x808] sm:$0xf] }
 0x283   :  { %v3604_v44 = vadd.f32 %v3588_v33, %v3572_v38  ;;  %v3605_v45 = vadd.f32 %v3589_v34, %v3573_v39  ;;  %v9635_v33 = vor.u32 %v10974_v25, %v9632_v30  ;;  %v9639_v34 = vor.u32 %v10983_v32, %v9638_v31  ;;  %v9566_v39 = vld [vmem:[#allocation7 + $0x980] sm:$0xf]  ;;  %v10919_v24 = vld [vmem:[#allocation7 + $0x844] sm:$0xf0]  ;;  %v10911_v30 = vld [vmem:[#allocation7 + $0x80c] sm:$0xf] }
 0x284   :  { %4881 = vmatpush.bf16.msrb.mxu2 %v10894_v42  ;;  %4894 = vmatpush.bf16.msrb.mxu3 %v10902_v43  ;;  %v9643_v38 = vor.u32 %v10975_v35, %v9640_v36  ;;  %v10966_v42 = vld [vmem:[#allocation7 + $0x9bc] sm:$0xf0]  ;;  %v10958_v43 = vld [vmem:[#allocation7 + $0x984] sm:$0xf]  ;;  %v9503_v57 = vor.u32 %v10950_v55, %v9502_v54  ;;  %v9507_v58 = vor.u32 %v10942_v56, %v9504_v61  ;;  %v9384_v31 = vld [vmem:[#allocation7 + $0x848] sm:$0xf0] }
 0x285   :  { %v3644_v46 = vmax.f32 %v3604_v44, 0.0  ;;  %v3645_v47 = vmax.f32 %v3605_v45, 0.0  ;;  %v9567_v44 = vor.u32 %v10966_v42, %v9566_v39  ;;  %v9568_v45 = vld [vmem:[#allocation7 + $0x9c0] sm:$0xf0]  ;;  %v9838_v32 = vld [vmem:[#allocation7 + $0xb90] sm:$0xf]  ;;  %v9387_v36 = vor.u32 %v10911_v30, %v9384_v31 }
 0x286   :  { %v3464_v48 = vpop.f32.mrf.mxu2  ;;  %v3477_v15 = vpop.f32.mrf.mxu3  ;;  %5673 = vmatpush.bf16.msra.mxu0 %v9759_v63  ;;  %5686 = vmatpush.bf16.msra.mxu1 %v9763_v6  ;;  %v10926_v6 = vld [vmem:[#allocation7 + $0x884] sm:$0xf]  ;;  %v9776_v54 = vld [vmem:[#allocation7 + $0xb50] sm:$0xf0]  ;;  %v9782_v55 = vld [vmem:[#allocation7 + $0xb18] sm:$0xf] }
 0x287   :  { %v3660_v49 = vpack.c.bf16 %v3644_v46, %v3644_v46  ;;  %v3661_v50 = vpack.c.bf16 %v3645_v47, %v3645_v47  ;;  %v9574_v46 = vld [vmem:[#allocation7 + $0x988] sm:$0xf]  ;;  %v9571_v48 = vor.u32 %v10958_v43, %v9568_v45  ;;  %v9443_v10 = vor.u32 %v10926_v6, %v9440_v7  ;;  %v9846_v43 = vld [vmem:[#allocation7 + $0xb98] sm:$0xf]  ;;  %v11025_v45 = vld [vmem:[#allocation7 + $0xb9c] sm:$0xf] }
 0x288   :  { %5698 = vmatpush.bf16.msra.mxu2 %v9831_v26  ;;  %5711 = vmatpush.bf16.msra.mxu3 %v9835_v59  ;;  %v10967_v47 = vld [vmem:[#allocation7 + $0x9c4] sm:$0xf0]  ;;  %v9718_v7 = vld [vmem:[#allocation7 + $0xa98] sm:$0xf] }
 0x289   :  { %4882 = vmatmul.bf16.vlgmr.msrb.gmra.mxu2 %v3660_v49  ;;  %4895 = vmatmul.bf16.vlgmr.msrb.gmra.mxu3 %v3661_v50  ;;  %v9575_v15 = vor.u32 %v10967_v47, %v9574_v46  ;;  %v10959_v49 = vld [vmem:[#allocation7 + $0x98c] sm:$0xf]  ;;  %v9510_v26 = vld [vmem:[#allocation7 + $0x908] sm:$0xf]  ;;  %v9848_v47 = vld [vmem:[#allocation7 + $0xbd8] sm:$0xf0] }
 0x28a   :  { %5674 = vmatpush.bf16.msra.mxu0 %v9695_v17  ;;  %5687 = vmatpush.bf16.msra.mxu1 %v9699_v19  ;;  %v9576_v50 = vld [vmem:[#allocation7 + $0x9c8] sm:$0xf0]  ;;  %v9511_v59 = vor.u32 %v10951_v16, %v9510_v26  ;;  %v9374_v19 = vld [vmem:[#allocation7 + $0x800] sm:$0xf]  ;;  %v11017_v26 = vld [vmem:[#allocation7 + $0xb54] sm:$0xf0] }
 0x28b   :  { %v9579_v53 = vor.u32 %v10959_v49, %v9576_v50  ;;  %v9448_v17 = vld [vmem:[#allocation7 + $0x8c8] sm:$0xf0]  ;;  %v9851_v49 = vor.u32 %v11025_v45, %v9848_v47  ;;  %v11009_v16 = vld [vmem:[#allocation7 + $0xb1c] sm:$0xf] }
 0x28c   :  { %5699 = vmatpush.bf16.msra.mxu2 %v9767_v3  ;;  %5712 = vmatpush.bf16.msra.mxu3 %v9771_v9  ;;  %v9439_v3 = vor.u32 %v10934_v2, %v9438_v1  ;;  %v10935_v9 = vld [vmem:[#allocation7 + $0x8c4] sm:$0xf0]  ;;  %v9451_v12 = vor.u32 %v10927_v14, %v9448_v17  ;;  %v11000_v1 = vld [vmem:[#allocation7 + $0xacc] sm:$0xf0]  ;;  %v10992_v2 = vld [vmem:[#allocation7 + $0xa94] sm:$0xf] }
 0x28d   :  { %v9447_v11 = vor.u32 %v10935_v9, %v9446_v8  ;;  %v11001_v8 = vld [vmem:[#allocation7 + $0xad4] sm:$0xf0]  ;;  %v9720_v14 = vld [vmem:[#allocation7 + $0xad8] sm:$0xf0] }
 0x28e   :  { %5675 = vmatpush.bf16.msra.mxu0 %v9631_v27  ;;  %5688 = vmatpush.bf16.msra.mxu1 %v9635_v33  ;;  %v9383_v27 = vor.u32 %v10919_v24, %v9382_v23  ;;  %v11179_v33 = vld [vmem:[#allocation10 + $0x1] ss:$0 sm:$0xff]  ;;  %v9592_v45 = vld [vmem:[#allocation7 + $0x9d8] sm:$0xf0] }
 0x290   :  { %5700 = vmatpush.bf16.msra.mxu2 %v9703_v20  ;;  %5713 = vmatpush.bf16.msra.mxu3 %v9707_v22  ;;  %v10918_v20 = vld [vmem:[#allocation7 + $0x83c] sm:$0xf0]  ;;  %v9376_v22 = vld [vmem:[#allocation7 + $0x840] sm:$0xf0] }
 0x291   :  { %v9375_v21 = vor.u32 %v10918_v20, %v9374_v19  ;;  %v9379_v25 = vor.u32 %v10910_v40, %v9376_v22  ;;  %v10976_v19 = vld [vmem:[#allocation7 + $0xa14] sm:$0xf]  ;;  %v10985_v22 = vld [vmem:[#allocation7 + $0xa54] sm:$0xf0] }
 0x292   :  { %5676 = vmatpush.bf16.msra.mxu0 %v9567_v44  ;;  %5689 = vmatpush.bf16.msra.mxu1 %v9571_v48  ;;  %v11033_v44 = vld [vmem:[#allocation7 + $0xbd4] sm:$0xf0]  ;;  %v9774_v48 = vld [vmem:[#allocation7 + $0xb10] sm:$0xf]  ;;  %v9648_v40 = vld [vmem:[#allocation7 + $0xa50] sm:$0xf0] }
 0x293   :  { %v9847_v46 = vor.u32 %v11033_v44, %v9846_v43  ;;  %v9651_v24 = vor.u32 %v10976_v19, %v9648_v40  ;;  %v10961_v44 = vld [vmem:[#allocation7 + $0x99c] sm:$0xf]  ;;  %v9390_v19 = vld [vmem:[#allocation7 + $0x810] sm:$0xf]  ;;  %v10912_v40 = vld [vmem:[#allocation7 + $0x814] sm:$0xf] }
 0x294   :  { %5701 = vmatpush.bf16.msra.mxu2 %v9639_v34  ;;  %5714 = vmatpush.bf16.msra.mxu3 %v9643_v38  ;;  %v9840_v38 = vld [vmem:[#allocation7 + $0xbd0] sm:$0xf0] }
 0x296   :  { %5677 = vmatpush.bf16.msra.mxu0 %v9503_v57  ;;  %5690 = vmatpush.bf16.msra.mxu1 %v9507_v58  ;;  %v9784_v58 = vld [vmem:[#allocation7 + $0xb58] sm:$0xf0] }
 0x297   :  { %v9787_v28 = vor.u32 %v11009_v16, %v9784_v58  ;;  %v10945_v58 = vld [vmem:[#allocation7 + $0x91c] sm:$0xf] }
 0x298   :  { %5702 = vmatpush.bf16.msra.mxu2 %v9575_v15  ;;  %5715 = vmatpush.bf16.msra.mxu3 %v9579_v53  ;;  %v11016_v15 = vld [vmem:[#allocation7 + $0xb4c] sm:$0xf0]  ;;  %v11008_v53 = vld [vmem:[#allocation7 + $0xb14] sm:$0xf] }
 0x299   :  { %v9775_v50 = vor.u32 %v11016_v15, %v9774_v48  ;;  %v9779_v61 = vor.u32 %v11008_v53, %v9776_v54  ;;  %v9595_v48 = vor.u32 %v10961_v44, %v9592_v45  ;;  %v9518_v15 = vld [vmem:[#allocation7 + $0x910] sm:$0xf]  ;;  %v9520_v54 = vld [vmem:[#allocation7 + $0x950] sm:$0xf0] }
 0x29a   :  { %5678 = vmatpush.bf16.msra.mxu0 %v9439_v3  ;;  %5691 = vmatpush.bf16.msra.mxu1 %v9443_v10  ;;  %v9712_v3 = vld [vmem:[#allocation7 + $0xad0] sm:$0xf0]  ;;  %v9719_v10 = vor.u32 %v11001_v8, %v9718_v7  ;;  %v9462_v8 = vld [vmem:[#allocation7 + $0x898] sm:$0xf] }
 0x29b   :  { %v9715_v9 = vor.u32 %v10992_v2, %v9712_v3  ;;  %v10936_v2 = vld [vmem:[#allocation7 + $0x8cc] sm:$0xf0]  ;;  %v9456_v7 = vld [vmem:[#allocation7 + $0x8d0] sm:$0xf0] }
 0x29c   :  { %5703 = vmatpush.bf16.msra.mxu2 %v9511_v59  ;;  %5716 = vmatpush.bf16.msra.mxu3 %v9515_v0  ;;  %v9783_v59 = vor.u32 %v11017_v26, %v9782_v55  ;;  %v9710_v0 = vld [vmem:[#allocation7 + $0xa90] sm:$0xf]  ;;  %v9526_v55 = vld [vmem:[#allocation7 + $0x918] sm:$0xf] }
 0x29d   :  { %v9711_v6 = vor.u32 %v11000_v1, %v9710_v0  ;;  %v9454_v1 = vld [vmem:[#allocation7 + $0x890] sm:$0xf] }
 0x29e   :  { %5679 = vmatpush.bf16.msra.mxu0 %v9375_v21  ;;  %5692 = vmatpush.bf16.msra.mxu1 %v9379_v25  ;;  %v9654_v21 = vld [vmem:[#allocation7 + $0xa18] sm:$0xf]  ;;  %v10977_v25 = vld [vmem:[#allocation7 + $0xa1c] sm:$0xf]  ;;  %v9455_v3 = vor.u32 %v10936_v2, %v9454_v1  ;;  %v9798_v1 = vld [vmem:[#allocation7 + $0xb28] sm:$0xf] }
 0x29f   :  { %v11019_v2 = vld [vmem:[#allocation7 + $0xb64] sm:$0xf0] }
 0x2a0   :  { %5704 = vmatpush.bf16.msra.mxu2 %v9447_v11  ;;  %5717 = vmatpush.bf16.msra.mxu3 %v9451_v12  ;;  %v10993_v11 = vld [vmem:[#allocation7 + $0xa9c] sm:$0xf]  ;;  %v10984_v12 = vld [vmem:[#allocation7 + $0xa4c] sm:$0xf0] }
 0x2a4   :  { %5705 = vmatpush.bf16.msra.mxu2 %v9383_v27  ;;  %5718 = vmatpush.bf16.msra.mxu3 %v9387_v36  ;;  %v9656_v27 = vld [vmem:[#allocation7 + $0xa58] sm:$0xf0]  ;;  %v10968_v36 = vld [vmem:[#allocation7 + $0x9cc] sm:$0xf0] }
 0x2a8   :  { %5750 = vmatpush.bf16.msrb.mxu2 %v9847_v46  ;;  %5763 = vmatpush.bf16.msrb.mxu3 %v9851_v49  ;;  %v10952_v49 = vld [vmem:[#allocation7 + $0x94c] sm:$0xf0] }
 0x2a9   :  { %v9519_v53 = vor.u32 %v10952_v49, %v9518_v15  ;;  %v11026_v15 = vld [vmem:[#allocation7 + $0xba4] sm:$0xf]  ;;  %v9862_v49 = vld [vmem:[#allocation7 + $0xba8] sm:$0xf] }
 0x2ac   :  { %5751 = vmatpush.bf16.msrb.mxu2 %v9783_v59  ;;  %5764 = vmatpush.bf16.msrb.mxu3 %v9787_v28  ;;  %v9528_v59 = vld [vmem:[#allocation7 + $0x958] sm:$0xf0] }
 0x2ad   :  { %v9531_v28 = vor.u32 %v10945_v58, %v9528_v59  ;;  %v9790_v58 = vld [vmem:[#allocation7 + $0xb20] sm:$0xf] }
 0x2b0   :  { %5752 = vmatpush.bf16.msrb.mxu2 %v9719_v10 }
 0x2bd   :  { %v11486_v4 = vpop.f32.mrf.mxu0  ;;  %v11488_v5 = vpop.f32.mrf.mxu1 }
 0x2be   :  { %v4702_v60 = vadd.f32 %v11179_v33, %v11486_v4  ;;  %v9723_v4 = vor.u32 %v10993_v11, %v9720_v14  ;;  %v9655_v33 = vor.u32 %v10985_v22, %v9654_v21  ;;  %v10929_v14 = vld [vmem:[#allocation7 + $0x89c] sm:$0xf]  ;;  %v9392_v22 = vld [vmem:[#allocation7 + $0x850] sm:$0xf0] }
 0x2c0   :  { %v4715_v20 = vadd.f32 %v11488_v5, %v4702_v60  ;;  %5765 = vmatpush.bf16.msrb.mxu3 %v9723_v4  ;;  %v10960_v5 = vld [vmem:[#allocation7 + $0x994] sm:$0xf]  ;;  %5753 = vmatpush.bf16.msrb.mxu2 %v9655_v33  ;;  %v9464_v4 = vld [vmem:[#allocation7 + $0x8d8] sm:$0xf0] }
 0x2c5   :  { %v4703_v41 = vpop.f32.mrf.mxu0  ;;  %v4716_v37 = vpop.f32.mrf.mxu1 }
 0x2c6   :  { %v11032_v41 = vld [vmem:[#allocation7 + $0xbcc] sm:$0xf0]  ;;  %v11024_v37 = vld [vmem:[#allocation7 + $0xb94] sm:$0xf] }
 0x2c7   :  { %v9839_v39 = vor.u32 %v11032_v41, %v9838_v32  ;;  %v9843_v42 = vor.u32 %v11024_v37, %v9840_v38  ;;  %v9584_v37 = vld [vmem:[#allocation7 + $0x9d0] sm:$0xf0]  ;;  %v9590_v38 = vld [vmem:[#allocation7 + $0x998] sm:$0xf] }
 0x2c8   :  { %v9587_v43 = vor.u32 %v10960_v5, %v9584_v37 }
 0x2c9   :  { %5724 = vmatpush.bf16.msrb.mxu0 %v9839_v39  ;;  %5737 = vmatpush.bf16.msrb.mxu1 %v9843_v42  ;;  %v10969_v39 = vld [vmem:[#allocation7 + $0x9d4] sm:$0xf0] }
 0x2ca   :  { %v11490_v51 = vpop.f32.mrf.mxu2  ;;  %v11492_v52 = vpop.f32.mrf.mxu3 }
 0x2cb   :  { %v4728_v30 = vadd.f32 %v11490_v51, %v4715_v20  ;;  %v9591_v51 = vor.u32 %v10969_v39, %v9590_v38  ;;  %v10920_v20 = vld [vmem:[#allocation7 + $0x84c] sm:$0xf0] }
 0x2cc   :  { %v9391_v21 = vor.u32 %v10920_v20, %v9390_v19  ;;  %v10995_v19 = vld [vmem:[#allocation7 + $0xaac] sm:$0xf] }
 0x2cd   :  { %5725 = vmatpush.bf16.msrb.mxu0 %v9775_v50  ;;  %5738 = vmatpush.bf16.msrb.mxu1 %v9779_v61  ;;  %v4741_v42 = vadd.f32 %v11492_v52, %v4728_v30  ;;  %v10944_v50 = vld [vmem:[#allocation7 + $0x914] sm:$0xf]  ;;  %v10953_v61 = vld [vmem:[#allocation7 + $0x954] sm:$0xf0]  ;;  %v9400_v30 = vld [vmem:[#allocation7 + $0x858] sm:$0xf0] }
 0x2ce   :  { %v11494_v29 = vpop.f32.mrf.mxu0  ;;  %v11496_v63 = vpop.f32.mrf.mxu1  ;;  %5754 = vmatpush.bf16.msrb.mxu2 %v9591_v51  ;;  %v9523_v26 = vor.u32 %v10944_v50, %v9520_v54  ;;  %v9527_v16 = vor.u32 %v10953_v61, %v9526_v55  ;;  %v9864_v54 = vld [vmem:[#allocation7 + $0xbe8] sm:$0xf0] }
 0x2cf   :  { %v4754_v52 = vadd.f32 %v11494_v29, %v4741_v42  ;;  %v9736_v20 = vld [vmem:[#allocation7 + $0xae8] sm:$0xf0] }
 0x2d1   :  { %5726 = vmatpush.bf16.msrb.mxu0 %v9711_v6  ;;  %5739 = vmatpush.bf16.msrb.mxu1 %v9715_v9  ;;  %v10928_v6 = vld [vmem:[#allocation7 + $0x894] sm:$0xf]  ;;  %v10937_v9 = vld [vmem:[#allocation7 + $0x8d4] sm:$0xf0]  ;;  %v4767_v29 = vadd.f32 %v11496_v63, %v4754_v52  ;;  %v9395_v63 = vor.u32 %v10912_v40, %v9392_v22  ;;  %v9662_v22 = vld [vmem:[#allocation7 + $0xa20] sm:$0xf] }
 0x2d2   :  { %v4729_v18 = vpop.f32.mrf.mxu2  ;;  %v4742_v13 = vpop.f32.mrf.mxu3  ;;  %5755 = vmatpush.bf16.msrb.mxu2 %v9527_v16  ;;  %v9459_v10 = vor.u32 %v10928_v6, %v9456_v7  ;;  %v9463_v11 = vor.u32 %v10937_v9, %v9462_v8  ;;  %v11011_v6 = vld [vmem:[#allocation7 + $0xb2c] sm:$0xf]  ;;  %v9726_v9 = vld [vmem:[#allocation7 + $0xaa0] sm:$0xf] }
 0x2d3   :  { %v9646_v13 = vld [vmem:[#allocation7 + $0xa10] sm:$0xf] }
 0x2d4   :  { %v9647_v23 = vor.u32 %v10984_v12, %v9646_v13  ;;  %v9467_v13 = vor.u32 %v10929_v14, %v9464_v4  ;;  %v10994_v14 = vld [vmem:[#allocation7 + $0xaa4] sm:$0xf] }
 0x2d5   :  { %5740 = vmatpush.bf16.msrb.mxu1 %v9651_v24  ;;  %v10921_v24 = vld [vmem:[#allocation7 + $0x854] sm:$0xf0]  ;;  %v9728_v4 = vld [vmem:[#allocation7 + $0xae0] sm:$0xf0] }
 0x2d6   :  { %v4755_v34 = vpop.f32.mrf.mxu0  ;;  %v4768_v35 = vpop.f32.mrf.mxu1  ;;  %5727 = vmatpush.bf16.msrb.mxu0 %v9647_v23  ;;  %v9398_v23 = vld [vmem:[#allocation7 + $0x818] sm:$0xf]  ;;  %5756 = vmatpush.bf16.msrb.mxu2 %v9463_v11 }
 0x2d7   :  { %v9659_v34 = vor.u32 %v10977_v25, %v9656_v27  ;;  %v9582_v35 = vld [vmem:[#allocation7 + $0x990] sm:$0xf]  ;;  %v9399_v25 = vor.u32 %v10921_v24, %v9398_v23  ;;  %v10913_v27 = vld [vmem:[#allocation7 + $0x81c] sm:$0xf]  ;;  %v10986_v23 = vld [vmem:[#allocation7 + $0xa5c] sm:$0xf0] }
 0x2d8   :  { %v9583_v41 = vor.u32 %v10968_v36, %v9582_v35 }
 0x2d9   :  { %5766 = vmatpush.bf16.msrb.mxu3 %v9659_v34  ;;  %5741 = vmatpush.bf16.msrb.mxu1 %v9587_v43 }
 0x2da   :  { %v11498_v56 = vpop.f32.mrf.mxu2  ;;  %v11500_v57 = vpop.f32.mrf.mxu3  ;;  %5728 = vmatpush.bf16.msrb.mxu0 %v9583_v41  ;;  %5757 = vmatpush.bf16.msrb.mxu2 %v9399_v25  ;;  %v10978_v25 = vld [vmem:[#allocation7 + $0xa24] sm:$0xf] }
 0x2db   :  { %v4780_v12 = vadd.f32 %v11498_v56, %v4767_v29  ;;  %v11002_v29 = vld [vmem:[#allocation7 + $0xadc] sm:$0xf0] }
 0x2dc   :  { %v9727_v40 = vor.u32 %v11002_v29, %v9726_v9  ;;  %v10914_v9 = vld [vmem:[#allocation7 + $0x824] sm:$0xf] }
 0x2dd   :  { %5767 = vmatpush.bf16.msrb.mxu3 %v9595_v48  ;;  %5742 = vmatpush.bf16.msrb.mxu1 %v9523_v26  ;;  %v11034_v48 = vld [vmem:[#allocation7 + $0xbdc] sm:$0xf0]  ;;  %v9408_v29 = vld [vmem:[#allocation7 + $0x860] sm:$0xf0] }
 0x2de   :  { %v11503_v17 = vpop.f32.mrf.mxu0  ;;  %v11505_v18 = vpop.f32.mrf.mxu1  ;;  %5729 = vmatpush.bf16.msrb.mxu0 %v9519_v53  ;;  %v11027_v53 = vld [vmem:[#allocation7 + $0xbac] sm:$0xf] }
 0x2e1   :  { %5768 = vmatpush.bf16.msrb.mxu3 %v9531_v28  ;;  %5743 = vmatpush.bf16.msrb.mxu1 %v9459_v10  ;;  %v9867_v28 = vor.u32 %v11027_v53, %v9864_v54  ;;  %v9799_v10 = vor.u32 %v11019_v2, %v9798_v1  ;;  %v10947_v53 = vld [vmem:[#allocation7 + $0x92c] sm:$0xf] }
 0x2e2   :  { %v4781_v31 = vpop.f32.mrf.mxu2  ;;  %v4794_v32 = vpop.f32.mrf.mxu3  ;;  %5730 = vmatpush.bf16.msrb.mxu0 %v9455_v3  ;;  %v9800_v3 = vld [vmem:[#allocation7 + $0xb68] sm:$0xf0] }
 0x2e3   :  { %v9403_v31 = vor.u32 %v10913_v27, %v9400_v30  ;;  %v4793_v32 = vadd.f32 %v11500_v57, %v4780_v12  ;;  %v9803_v11 = vor.u32 %v11011_v6, %v9800_v3  ;;  %v11003_v12 = vld [vmem:[#allocation7 + $0xae4] sm:$0xf0]  ;;  %v9664_v27 = vld [vmem:[#allocation7 + $0xa60] sm:$0xf0]  ;;  %v9544_v54 = vld [vmem:[#allocation7 + $0x968] sm:$0xf0] }
 0x2e4   :  { %v9670_v30 = vld [vmem:[#allocation7 + $0xa28] sm:$0xf]  ;;  %v10931_v1 = vld [vmem:[#allocation7 + $0x8ac] sm:$0xf]  ;;  %v9406_v6 = vld [vmem:[#allocation7 + $0x820] sm:$0xf] }
 0x2e5   :  { %5769 = vmatpush.bf16.msrb.mxu3 %v9467_v13  ;;  %5744 = vmatpush.bf16.msrb.mxu1 %v9395_v63  ;;  %v4806_v34 = vadd.f32 %v11503_v17, %v4793_v32  ;;  %v9856_v17 = vld [vmem:[#allocation7 + $0xbe0] sm:$0xf0]  ;;  %v9734_v13 = vld [vmem:[#allocation7 + $0xaa8] sm:$0xf]  ;;  %v9739_v63 = vor.u32 %v10995_v19, %v9736_v20  ;;  %v10979_v32 = vld [vmem:[#allocation7 + $0xa2c] sm:$0xf] }
 0x2e6   :  { %v4807_v46 = vpop.f32.mrf.mxu0  ;;  %v4820_v47 = vpop.f32.mrf.mxu1  ;;  %5731 = vmatpush.bf16.msrb.mxu0 %v9391_v21  ;;  %v9859_v16 = vor.u32 %v11026_v15, %v9856_v17  ;;  %v9731_v21 = vor.u32 %v10994_v14, %v9728_v4  ;;  %v9735_v24 = vor.u32 %v11003_v12, %v9734_v13  ;;  %v10946_v15 = vld [vmem:[#allocation7 + $0x924] sm:$0xf]  ;;  %v9480_v2 = vld [vmem:[#allocation7 + $0x8e8] sm:$0xf0]  ;;  %v9414_v14 = vld [vmem:[#allocation7 + $0x828] sm:$0xf] }
 0x2e7   :  { %v4819_v35 = vadd.f32 %v11505_v18, %v4806_v34  ;;  %v9854_v47 = vld [vmem:[#allocation7 + $0xba0] sm:$0xf]  ;;  %v11035_v18 = vld [vmem:[#allocation7 + $0xbe4] sm:$0xf0]  ;;  %v9667_v34 = vor.u32 %v10978_v25, %v9664_v27  ;;  %v9536_v17 = vld [vmem:[#allocation7 + $0x960] sm:$0xf0] }
 0x2e8   :  { %v9855_v26 = vor.u32 %v11034_v48, %v9854_v47  ;;  %v9863_v59 = vor.u32 %v11035_v18, %v9862_v49  ;;  %v9542_v49 = vld [vmem:[#allocation7 + $0x928] sm:$0xf]  ;;  %v10915_v13 = vld [vmem:[#allocation7 + $0x82c] sm:$0xf]  ;;  %v9870_v19 = vld [vmem:[#allocation7 + $0xbb0] sm:$0xf] }
 0x2e9   :  { %5770 = vmatpush.bf16.msrb.mxu3 %v9403_v31  ;;  %v10987_v31 = vld [vmem:[#allocation7 + $0xa64] sm:$0xf0]  ;;  %v9416_v12 = vld [vmem:[#allocation7 + $0x868] sm:$0xf0]  ;;  %v11036_v20 = vld [vmem:[#allocation7 + $0xbec] sm:$0xf0] }
 0x2ea   :  { %v10955_v18 = vld [vmem:[#allocation7 + $0x964] sm:$0xf0]  ;;  %v11029_v25 = vld [vmem:[#allocation7 + $0xbbc] sm:$0xf] }
 0x2eb   :  { %v10923_v4 = vld [vmem:[#allocation7 + $0x864] sm:$0xf0]  ;;  %v9880_v27 = vld [vmem:[#allocation7 + $0xbf8] sm:$0xf0] }
 0x2ee   :  { %v4831_v60 = vpop.f32.mrf.mxu2  ;;  %v4844_v0 = vpop.f32.mrf.mxu3 }
 0x2ef   :  { %v4832_v41 = vadd.f32 %v4831_v60, %v4819_v35  ;;  %v11010_v60 = vld [vmem:[#allocation7 + $0xb24] sm:$0xf]  ;;  %v9598_v35 = vld [vmem:[#allocation7 + $0x9a0] sm:$0xf] }
 0x2f1   :  { %v4845_v37 = vadd.f32 %v4844_v0, %v4832_v41  ;;  %v9792_v0 = vld [vmem:[#allocation7 + $0xb60] sm:$0xf0] }
 0x2f2   :  { %v9795_v8 = vor.u32 %v11010_v60, %v9792_v0  ;;  %v9478_v60 = vld [vmem:[#allocation7 + $0x8a8] sm:$0xf] }
 0x2f3   :  { %v10939_v0 = vld [vmem:[#allocation7 + $0x8e4] sm:$0xf0] }
 0x2f6   :  { %v4833_v33 = vpop.f32.mrf.mxu2  ;;  %v4846_v56 = vpop.f32.mrf.mxu3 }
 0x2f7   :  { %v9672_v33 = vld [vmem:[#allocation7 + $0xa68] sm:$0xf0]  ;;  %v9663_v56 = vor.u32 %v10986_v23, %v9662_v22  ;;  %v9878_v22 = vld [vmem:[#allocation7 + $0xbb8] sm:$0xf] }
 0x2f8   :  { %v9675_v41 = vor.u32 %v10979_v32, %v9672_v33  ;;  %v9871_v32 = vor.u32 %v11036_v20, %v9870_v19  ;;  %v9550_v19 = vld [vmem:[#allocation7 + $0x930] sm:$0xf] }
 0x2f9   :  { %v10956_v20 = vld [vmem:[#allocation7 + $0x96c] sm:$0xf0] }
 0x2fe   :  { %v4857_v36 = vpop.f32.mrf.mxu0  ;;  %v4870_v5 = vpop.f32.mrf.mxu1 }
 0x2ff   :  { %v4858_v38 = vadd.f32 %v4857_v36, %v4845_v37  ;;  %v10970_v36 = vld [vmem:[#allocation7 + $0x9dc] sm:$0xf0]  ;;  %v10962_v37 = vld [vmem:[#allocation7 + $0x9a4] sm:$0xf] }
 0x301   :  { %v4871_v43 = vadd.f32 %v4870_v5, %v4858_v38  ;;  %v9671_v5 = vor.u32 %v10987_v31, %v9670_v30  ;;  %v9600_v38 = vld [vmem:[#allocation7 + $0x9e0] sm:$0xf0]  ;;  %v9415_v30 = vor.u32 %v10923_v4, %v9414_v14  ;;  %v9419_v31 = vor.u32 %v10915_v13, %v9416_v12  ;;  %v10965_v14 = vld [vmem:[#allocation7 + $0x9bc] sm:$0xf] }
 0x302   :  { %v9624_v4 = vld [vmem:[#allocation7 + $0x9f8] sm:$0xf0] }
 0x306   :  { %v4859_v39 = vpop.f32.mrf.mxu0  ;;  %v4872_v42 = vpop.f32.mrf.mxu1 }
 0x307   :  { %v9606_v39 = vld [vmem:[#allocation7 + $0x9a8] sm:$0xf] }
 0x308   :  { %v10971_v42 = vld [vmem:[#allocation7 + $0x9e4] sm:$0xf0] }
 0x309   :  { %v9607_v47 = vor.u32 %v10971_v42, %v9606_v39  ;;  %v11013_v39 = vld [vmem:[#allocation7 + $0xb3c] sm:$0xf] }
 0x30a   :  { %v9816_v42 = vld [vmem:[#allocation7 + $0xb78] sm:$0xf0] }
 0x30c   :  { %v4883_v51 = vpop.f32.mrf.mxu2  ;;  %v4896_v57 = vpop.f32.mrf.mxu3 }
 0x30d   :  { %v4884_v44 = vadd.f32 %v4883_v51, %v4871_v43  ;;  %v10963_v43 = vld [vmem:[#allocation7 + $0x9ac] sm:$0xf] }
 0x30e   :  { %v9608_v51 = vld [vmem:[#allocation7 + $0x9e8] sm:$0xf0] }
 0x30f   :  { %v4897_v45 = vadd.f32 %v4896_v57, %v4884_v44  ;;  %v9599_v57 = vor.u32 %v10970_v36, %v9598_v35  ;;  %v9603_v44 = vor.u32 %v10962_v37, %v9600_v38  ;;  %v9611_v48 = vor.u32 %v10963_v43, %v9608_v51  ;;  %v9814_v37 = vld [vmem:[#allocation7 + $0xb38] sm:$0xf] }
 0x310   :  { %v9883_v36 = vor.u32 %v11029_v25, %v9880_v27  ;;  %v11021_v38 = vld [vmem:[#allocation7 + $0xb74] sm:$0xf0]  ;;  %v10949_v25 = vld [vmem:[#allocation7 + $0x93c] sm:$0xf] }
 0x311   :  { %v4900_v46 = vadd.f32 %v4897_v45, %v11450_v62  ;;  %v11018_v62 = vld [vmem:[#allocation7 + $0xb5c] sm:$0xf0]  ;;  %v9560_v27 = vld [vmem:[#allocation7 + $0x978] sm:$0xf0] }
 0x312   :  { %v9791_v7 = vor.u32 %v11018_v62, %v9790_v58  ;;  %v9534_v45 = vld [vmem:[#allocation7 + $0x920] sm:$0xf]  ;;  %v9543_v58 = vor.u32 %v10955_v18, %v9542_v49  ;;  %v9547_v62 = vor.u32 %v10947_v53, %v9544_v54  ;;  %v10997_v49 = vld [vmem:[#allocation7 + $0xabc] sm:$0xf] }
 0x313   :  { %v11517_v50 = vmax.f32 %v4900_v46, 0.0  ;;  %v10954_v46 = vld [vmem:[#allocation7 + $0x95c] sm:$0xf0]  ;;  %v9752_v18 = vld [vmem:[#allocation7 + $0xaf8] sm:$0xf0] }
 0x314   :  { %v4885_v55 = vpop.f32.mrf.mxu2  ;;  %v4898_v61 = vpop.f32.mrf.mxu3 }
 0x315   :  { %v11521_v52 = vpack.c.bf16 %v11517_v50, %v11517_v50  ;;  %v9535_v55 = vor.u32 %v10954_v46, %v9534_v45  ;;  %v9539_v61 = vor.u32 %v10946_v15, %v9536_v17  ;;  %v9815_v45 = vor.u32 %v11021_v38, %v9814_v37  ;;  %v9750_v15 = vld [vmem:[#allocation7 + $0xab8] sm:$0xf]  ;;  %v10933_v37 = vld [vmem:[#allocation7 + $0x8bc] sm:$0xf] }
 0x316   :  { %v9819_v46 = vor.u32 %v11013_v39, %v9816_v42  ;;  %v11005_v17 = vld [vmem:[#allocation7 + $0xaf4] sm:$0xf0]  ;;  %v9496_v38 = vld [vmem:[#allocation7 + $0x8f8] sm:$0xf0] }
 0x317   :  { %5680 = vmatmul.bf16.vlgmr.msra.gmra.mxu0 %v11521_v52  ;;  %5693 = vmatmul.bf16.vlgmr.msra.gmra.mxu1 %v11521_v52 }
 0x318   :  { %5706 = vmatmul.bf16.vlgmr.msra.gmra.mxu2 %v11521_v52  ;;  %5719 = vmatmul.bf16.vlgmr.msra.gmra.mxu3 %v11521_v52 }
 0x319   :  { %5776 = vmatpush.bf16.msra.mxu0 %v9855_v26  ;;  %5789 = vmatpush.bf16.msra.mxu1 %v9859_v16  ;;  %v9470_v26 = vld [vmem:[#allocation7 + $0x8a0] sm:$0xf] }
 0x31a   :  { %5802 = vmatpush.bf16.msra.mxu2 %v9863_v59  ;;  %5815 = vmatpush.bf16.msra.mxu3 %v9867_v28  ;;  %v10938_v16 = vld [vmem:[#allocation7 + $0x8dc] sm:$0xf0]  ;;  %v10930_v59 = vld [vmem:[#allocation7 + $0x8a4] sm:$0xf] }
 0x31b   :  { %v9472_v28 = vld [vmem:[#allocation7 + $0x8e0] sm:$0xf0]  ;;  %v9471_v3 = vor.u32 %v10938_v16, %v9470_v26  ;;  %v9751_v26 = vor.u32 %v11005_v17, %v9750_v15  ;;  %v9755_v16 = vor.u32 %v10997_v49, %v9752_v18  ;;  %v10917_v15 = vld [vmem:[#allocation7 + $0x83c] sm:$0xf] }
 0x31c   :  { %v9432_v17 = vld [vmem:[#allocation7 + $0x878] sm:$0xf0] }
 0x31d   :  { %5777 = vmatpush.bf16.msra.mxu0 %v9791_v7  ;;  %5790 = vmatpush.bf16.msra.mxu1 %v9795_v8  ;;  %v9475_v7 = vor.u32 %v10930_v59, %v9472_v28  ;;  %v10922_v8 = vld [vmem:[#allocation7 + $0x85c] sm:$0xf0]  ;;  %v9686_v59 = vld [vmem:[#allocation7 + $0xa38] sm:$0xf] }
 0x31e   :  { %5803 = vmatpush.bf16.msra.mxu2 %v9799_v10  ;;  %5816 = vmatpush.bf16.msra.mxu3 %v9803_v11  ;;  %v9479_v10 = vor.u32 %v10939_v0, %v9478_v60  ;;  %v9483_v11 = vor.u32 %v10931_v1, %v9480_v2  ;;  %v9407_v23 = vor.u32 %v10922_v8, %v9406_v6  ;;  %v10989_v28 = vld [vmem:[#allocation7 + $0xa74] sm:$0xf0]  ;;  %v10981_v60 = vld [vmem:[#allocation7 + $0xa3c] sm:$0xf]  ;;  %v9614_v6 = vld [vmem:[#allocation7 + $0x9b0] sm:$0xf] }
 0x31f   :  { %v9688_v0 = vld [vmem:[#allocation7 + $0xa78] sm:$0xf0] }
 0x320   :  { %v9691_v8 = vor.u32 %v10981_v60, %v9688_v0  ;;  %v11043_v60 = vld [vmem:[#allocation8 + $0x828] sm:$0xff] }
 0x321   :  { %5778 = vmatpush.bf16.msra.mxu0 %v9727_v40  ;;  %5791 = vmatpush.bf16.msra.mxu1 %v9731_v21  ;;  %v11028_v40 = vld [vmem:[#allocation7 + $0xbb4] sm:$0xf]  ;;  %v11051_v0 = vld [vmem:[#allocation8 + $0x868] sm:$0xff] }
 0x322   :  { %5804 = vmatpush.bf16.msra.mxu2 %v9735_v24  ;;  %5817 = vmatpush.bf16.msra.mxu3 %v9739_v63  ;;  %v9872_v21 = vld [vmem:[#allocation7 + $0xbf0] sm:$0xf0]  ;;  %v9411_v24 = vor.u32 %v10914_v9, %v9408_v29  ;;  %v11037_v63 = vld [vmem:[#allocation7 + $0xbf4] sm:$0xf0] }
 0x323   :  { %v9875_v33 = vor.u32 %v11028_v40, %v9872_v21  ;;  %v9879_v35 = vor.u32 %v11037_v63, %v9878_v22  ;;  %v10964_v9 = vld [vmem:[#allocation7 + $0x9b4] sm:$0xf]  ;;  %v9627_v21 = vor.u32 %v10965_v14, %v9624_v4  ;;  %v10957_v63 = vld [vmem:[#allocation7 + $0x974] sm:$0xf0] }
 0x324   :  { %v9616_v29 = vld [vmem:[#allocation7 + $0x9f0] sm:$0xf0] }
 0x325   :  { %5779 = vmatpush.bf16.msra.mxu0 %v9663_v56  ;;  %5792 = vmatpush.bf16.msra.mxu1 %v9667_v34  ;;  %v9806_v56 = vld [vmem:[#allocation7 + $0xb30] sm:$0xf]  ;;  %v9619_v12 = vor.u32 %v10964_v9, %v9616_v29  ;;  %v10948_v22 = vld [vmem:[#allocation7 + $0x934] sm:$0xf]  ;;  %v11049_v9 = vld [vmem:[#allocation8 + $0x858] sm:$0xff] }
 0x326   :  { %5805 = vmatpush.bf16.msra.mxu2 %v9671_v5  ;;  %5818 = vmatpush.bf16.msra.mxu3 %v9675_v41  ;;  %v11020_v34 = vld [vmem:[#allocation7 + $0xb6c] sm:$0xf0]  ;;  %v11012_v5 = vld [vmem:[#allocation7 + $0xb34] sm:$0xf]  ;;  %v11057_v29 = vld [vmem:[#allocation8 + $0x898] sm:$0xff] }
 0x327   :  { %5732 = vmatmul.bf16.vlgmr.msrb.gmra.mxu0 %v11521_v52  ;;  %5745 = vmatmul.bf16.vlgmr.msrb.gmra.mxu1 %v11521_v52  ;;  %v9808_v41 = vld [vmem:[#allocation7 + $0xb70] sm:$0xf0]  ;;  %v9807_v43 = vor.u32 %v11020_v34, %v9806_v56  ;;  %v9563_v34 = vor.u32 %v10949_v25, %v9560_v27  ;;  %v11054_v25 = vld [vmem:[#allocation8 + $0x880] sm:$0xff] }
 0x328   :  { %5758 = vmatmul.bf16.vlgmr.msrb.gmra.mxu2 %v11521_v52  ;;  %5771 = vmatmul.bf16.vlgmr.msrb.gmra.mxu3 %v11521_v52  ;;  %v9811_v51 = vor.u32 %v11012_v5, %v9808_v41  ;;  %v9494_v5 = vld [vmem:[#allocation7 + $0x8b8] sm:$0xf]  ;;  %v11048_v14 = vld [vmem:[#allocation8 + $0x850] sm:$0xff]  ;;  %v11062_v27 = vld [vmem:[#allocation8 + $0x8c0] sm:$0xff] }
 0x329   :  { %5780 = vmatpush.bf16.msra.mxu0 %v9599_v57  ;;  %5793 = vmatpush.bf16.msra.mxu1 %v9603_v44  ;;  %v9742_v57 = vld [vmem:[#allocation7 + $0xab0] sm:$0xf]  ;;  %v10941_v41 = vld [vmem:[#allocation7 + $0x8f4] sm:$0xf0] }
 0x32a   :  { %5806 = vmatpush.bf16.msra.mxu2 %v9607_v47  ;;  %5819 = vmatpush.bf16.msra.mxu3 %v9611_v48  ;;  %v11004_v44 = vld [vmem:[#allocation7 + $0xaec] sm:$0xf0]  ;;  %v10996_v47 = vld [vmem:[#allocation7 + $0xab4] sm:$0xf] }
 0x32b   :  { %v9744_v48 = vld [vmem:[#allocation7 + $0xaf0] sm:$0xf0]  ;;  %v9743_v53 = vor.u32 %v11004_v44, %v9742_v57  ;;  %v9495_v57 = vor.u32 %v10941_v41, %v9494_v5  ;;  %v9499_v44 = vor.u32 %v10933_v37, %v9496_v38  ;;  %v11091_v5 = vld [vmem:[#allocation8 + $0x9a8] sm:$0xff]  ;;  %v11074_v37 = vld [vmem:[#allocation8 + $0x920] sm:$0xff] }
 0x32c   :  { %v9747_v54 = vor.u32 %v10996_v47, %v9744_v48  ;;  %v9430_v47 = vld [vmem:[#allocation7 + $0x838] sm:$0xf]  ;;  %v11056_v4 = vld [vmem:[#allocation8 + $0x890] sm:$0xff]  ;;  %v11099_v41 = vld [vmem:[#allocation8 + $0x9e8] sm:$0xff] }
 0x32d   :  { %5781 = vmatpush.bf16.msra.mxu0 %v9535_v55  ;;  %5794 = vmatpush.bf16.msra.mxu1 %v9539_v61  ;;  %v9678_v55 = vld [vmem:[#allocation7 + $0xa30] sm:$0xf]  ;;  %v10925_v48 = vld [vmem:[#allocation7 + $0x874] sm:$0xf0]  ;;  %v11082_v38 = vld [vmem:[#allocation8 + $0x960] sm:$0xff] }
 0x32e   :  { %5807 = vmatpush.bf16.msra.mxu2 %v9543_v58  ;;  %5820 = vmatpush.bf16.msra.mxu3 %v9547_v62  ;;  %v10988_v61 = vld [vmem:[#allocation7 + $0xa6c] sm:$0xf0]  ;;  %v10980_v58 = vld [vmem:[#allocation7 + $0xa34] sm:$0xf] }
 0x32f   :  { %v9680_v62 = vld [vmem:[#allocation7 + $0xa70] sm:$0xf0]  ;;  %v9679_v1 = vor.u32 %v10988_v61, %v9678_v55  ;;  %v11045_v55 = vld [vmem:[#allocation8 + $0x838] sm:$0xff] }
 0x330   :  { %v9683_v2 = vor.u32 %v10980_v58, %v9680_v62  ;;  %v11053_v61 = vld [vmem:[#allocation8 + $0x878] sm:$0xff]  ;;  %v11044_v58 = vld [vmem:[#allocation8 + $0x830] sm:$0xff] }
 0x331   :  { %5782 = vmatpush.bf16.msra.mxu0 %v9471_v3  ;;  %5795 = vmatpush.bf16.msra.mxu1 %v9475_v7  ;;  %v10972_v3 = vld [vmem:[#allocation7 + $0x9ec] sm:$0xf0]  ;;  %v9687_v7 = vor.u32 %v10989_v28, %v9686_v59 }
 0x332   :  { %5808 = vmatpush.bf16.msra.mxu2 %v9479_v10  ;;  %5821 = vmatpush.bf16.msra.mxu3 %v9483_v11  ;;  %v9622_v10 = vld [vmem:[#allocation7 + $0x9b8] sm:$0xf]  ;;  %v9615_v13 = vor.u32 %v10972_v3, %v9614_v6  ;;  %v11052_v62 = vld [vmem:[#allocation8 + $0x870] sm:$0xff]  ;;  %v11042_v6 = vld [vmem:[#allocation8 + $0x820] sm:$0xff] }
 0x333   :  { %v10973_v11 = vld [vmem:[#allocation7 + $0x9f4] sm:$0xf0]  ;;  %v11060_v59 = vld [vmem:[#allocation8 + $0x8b0] sm:$0xff]  ;;  %v11050_v3 = vld [vmem:[#allocation8 + $0x860] sm:$0xff] }
 0x334   :  { %v9623_v40 = vor.u32 %v10973_v11, %v9622_v10  ;;  %v11068_v28 = vld [vmem:[#allocation8 + $0x8f0] sm:$0xff]  ;;  %v11065_v10 = vld [vmem:[#allocation8 + $0x8d8] sm:$0xff] }
 0x335   :  { %5783 = vmatpush.bf16.msra.mxu0 %v9407_v23  ;;  %5796 = vmatpush.bf16.msra.mxu1 %v9411_v24  ;;  %v9552_v23 = vld [vmem:[#allocation7 + $0x970] sm:$0xf0]  ;;  %v9558_v24 = vld [vmem:[#allocation7 + $0x938] sm:$0xf] }
 0x336   :  { %5809 = vmatpush.bf16.msra.mxu2 %v9415_v30  ;;  %5822 = vmatpush.bf16.msra.mxu3 %v9419_v31  ;;  %v9551_v30 = vor.u32 %v10956_v20, %v9550_v19  ;;  %v9555_v31 = vor.u32 %v10948_v22, %v9552_v23  ;;  %v9559_v56 = vor.u32 %v10957_v63, %v9558_v24  ;;  %v11040_v11 = vld [vmem:[#allocation8 + $0x810] sm:$0xff]  ;;  %v11047_v19 = vld [vmem:[#allocation8 + $0x848] sm:$0xff]  ;;  %v11046_v22 = vld [vmem:[#allocation8 + $0x840] sm:$0xff] }
 0x337   :  { %v11055_v20 = vld [vmem:[#allocation8 + $0x888] sm:$0xff]  ;;  %v11077_v23 = vld [vmem:[#allocation8 + $0x938] sm:$0xff] }
 0x338   :  { %5784 = vmatmul.bf16.vlgmr.msra.gmra.mxu0 %v11521_v52  ;;  %5797 = vmatmul.bf16.vlgmr.msra.gmra.mxu1 %v11521_v52  ;;  %v11085_v24 = vld [vmem:[#allocation8 + $0x978] sm:$0xff]  ;;  %v9884_v63 = vld [vmem:[%s11560_s3 + $0x20] sm:$0xff] }
 0x339   :  { %5828 = vmatpush.bf16.msrb.mxu0 %v9871_v32  ;;  %5841 = vmatpush.bf16.msrb.mxu1 %v9875_v33  ;;  %v9486_v32 = vld [vmem:[#allocation7 + $0x8b0] sm:$0xf]  ;;  %5892 = vst [vmem:[#allocation1] ss:$9 sm:$0xff] %v9884_v63 }
 0x33a   :  { %5854 = vmatpush.bf16.msrb.mxu2 %v9879_v35  ;;  %5867 = vmatpush.bf16.msrb.mxu3 %v9883_v36  ;;  %v10940_v33 = vld [vmem:[#allocation7 + $0x8ec] sm:$0xf0]  ;;  %v10932_v35 = vld [vmem:[#allocation7 + $0x8b4] sm:$0xf] }
 0x33b   :  { %5810 = vmatmul.bf16.vlgmr.msra.gmra.mxu2 %v11521_v52  ;;  %5823 = vmatmul.bf16.vlgmr.msra.gmra.mxu3 %v11521_v52  ;;  %v9488_v36 = vld [vmem:[#allocation7 + $0x8f0] sm:$0xf0]  ;;  %v9487_v39 = vor.u32 %v10940_v33, %v9486_v32 }
 0x33c   :  { %v9491_v42 = vor.u32 %v10932_v35, %v9488_v36  ;;  %v11076_v32 = vld [vmem:[#allocation8 + $0x930] sm:$0xff]  ;;  %v11075_v35 = vld [vmem:[#allocation8 + $0x928] sm:$0xff] }
 0x33d   :  { %5829 = vmatpush.bf16.msrb.mxu0 %v9807_v43  ;;  %5842 = vmatpush.bf16.msrb.mxu1 %v9811_v51  ;;  %v9422_v43 = vld [vmem:[#allocation7 + $0x830] sm:$0xf]  ;;  %v11083_v36 = vld [vmem:[#allocation8 + $0x968] sm:$0xff] }
 0x33e   :  { %5855 = vmatpush.bf16.msrb.mxu2 %v9815_v45  ;;  %5868 = vmatpush.bf16.msrb.mxu3 %v9819_v46  ;;  %v10924_v51 = vld [vmem:[#allocation7 + $0x86c] sm:$0xf0]  ;;  %v10916_v45 = vld [vmem:[#allocation7 + $0x834] sm:$0xf] }
 0x33f   :  { %v9424_v46 = vld [vmem:[#allocation7 + $0x870] sm:$0xf0]  ;;  %v9423_v49 = vor.u32 %v10924_v51, %v9422_v43  ;;  %v11073_v43 = vld [vmem:[#allocation8 + $0x918] sm:$0xff] }
 0x340   :  { %v9427_v18 = vor.u32 %v10916_v45, %v9424_v46  ;;  %v11084_v33 = vld [vmem:[#allocation8 + $0x970] sm:$0xff]  ;;  %v11081_v51 = vld [vmem:[#allocation8 + $0x958] sm:$0xff] }
 0x341   :  { %5830 = vmatpush.bf16.msrb.mxu0 %v9743_v53  ;;  %5843 = vmatpush.bf16.msrb.mxu1 %v9747_v54  ;;  %v9431_v53 = vor.u32 %v10925_v48, %v9430_v47  ;;  %v9435_v54 = vor.u32 %v10917_v15, %v9432_v17  ;;  %v11072_v45 = vld [vmem:[#allocation8 + $0x910] sm:$0xff]  ;;  %v11071_v15 = vld [vmem:[#allocation8 + $0x908] sm:$0xff] }
 0x342   :  { %5856 = vmatpush.bf16.msrb.mxu2 %v9751_v26  ;;  %5869 = vmatpush.bf16.msrb.mxu3 %v9755_v16  ;;  %v11061_v26 = vld [vmem:[#allocation8 + $0x8b8] sm:$0xff]  ;;  %v11080_v46 = vld [vmem:[#allocation8 + $0x950] sm:$0xff]  ;;  %v11079_v17 = vld [vmem:[#allocation8 + $0x948] sm:$0xff] }
 0x343   :  { %v11069_v16 = vld [vmem:[#allocation8 + $0x8f8] sm:$0xff]  ;;  %v11088_v47 = vld [vmem:[#allocation8 + $0x990] sm:$0xff] }
 0x344   :  { %v11096_v48 = vld [vmem:[#allocation8 + $0x9d0] sm:$0xff] }
 0x345   :  { %5831 = vmatpush.bf16.msrb.mxu0 %v9679_v1  ;;  %5844 = vmatpush.bf16.msrb.mxu1 %v9683_v2  ;;  %v11059_v1 = vld [vmem:[#allocation8 + $0x8a8] sm:$0xff] }
 0x346   :  { %5857 = vmatpush.bf16.msrb.mxu2 %v9687_v7  ;;  %5870 = vmatpush.bf16.msrb.mxu3 %v9691_v8  ;;  %v11067_v2 = vld [vmem:[#allocation8 + $0x8e8] sm:$0xff]  ;;  %v11058_v7 = vld [vmem:[#allocation8 + $0x8a0] sm:$0xff]  ;;  %v11041_v8 = vld [vmem:[#allocation8 + $0x818] sm:$0xff] }
 0x349   :  { %5832 = vmatpush.bf16.msrb.mxu0 %v9615_v13  ;;  %5845 = vmatpush.bf16.msrb.mxu1 %v9619_v12  ;;  %v11064_v13 = vld [vmem:[#allocation8 + $0x8d0] sm:$0xff]  ;;  %v11039_v12 = vld [vmem:[#allocation8 + $0x808] sm:$0xff] }
 0x34a   :  { %5858 = vmatpush.bf16.msrb.mxu2 %v9623_v40  ;;  %5871 = vmatpush.bf16.msrb.mxu3 %v9627_v21  ;;  %v11063_v40 = vld [vmem:[#allocation8 + $0x8c8] sm:$0xff]  ;;  %v11038_v21 = vld [vmem:[#allocation8 + $0x800] sm:$0xff] }
 0x34d   :  { %5833 = vmatpush.bf16.msrb.mxu0 %v9551_v30  ;;  %5846 = vmatpush.bf16.msrb.mxu1 %v9555_v31  ;;  %v11093_v30 = vld [vmem:[#allocation8 + $0x9b8] sm:$0xff] }
 0x34e   :  { %5859 = vmatpush.bf16.msrb.mxu2 %v9559_v56  ;;  %5872 = vmatpush.bf16.msrb.mxu3 %v9563_v34  ;;  %v11101_v31 = vld [vmem:[#allocation8 + $0x9f8] sm:$0xff]  ;;  %v11092_v56 = vld [vmem:[#allocation8 + $0x9b0] sm:$0xff] }
 0x34f   :  { %v11100_v34 = vld [vmem:[#allocation8 + $0x9f0] sm:$0xff] }
 0x351   :  { %5834 = vmatpush.bf16.msrb.mxu0 %v9487_v39  ;;  %5847 = vmatpush.bf16.msrb.mxu1 %v9491_v42  ;;  %v11090_v39 = vld [vmem:[#allocation8 + $0x9a0] sm:$0xff] }
 0x352   :  { %5860 = vmatpush.bf16.msrb.mxu2 %v9495_v57  ;;  %5873 = vmatpush.bf16.msrb.mxu3 %v9499_v44  ;;  %v11098_v42 = vld [vmem:[#allocation8 + $0x9e0] sm:$0xff]  ;;  %v11089_v57 = vld [vmem:[#allocation8 + $0x998] sm:$0xff] }
 0x353   :  { %v11097_v44 = vld [vmem:[#allocation8 + $0x9d8] sm:$0xff] }
 0x355   :  { %5835 = vmatpush.bf16.msrb.mxu0 %v9423_v49  ;;  %5848 = vmatpush.bf16.msrb.mxu1 %v9427_v18  ;;  %v5893_v49 = vld [vmem:[#allocation1] sm:$0xff] }
 0x356   :  { %5861 = vmatpush.bf16.msrb.mxu2 %v9431_v53  ;;  %5874 = vmatpush.bf16.msrb.mxu3 %v9435_v54  ;;  %v11087_v18 = vld [vmem:[#allocation8 + $0x988] sm:$0xff]  ;;  %v5894_v54 = vld [vmem:[#allocation1 + $0x9] sm:$0xff] }
 0x357   :  { %v11095_v53 = vld [vmem:[#allocation8 + $0x9c8] sm:$0xff] }
 0x358   :  { %5836 = vmatmul.bf16.vlgmr.msrb.gmra.mxu0 %v11521_v52  ;;  %5849 = vmatmul.bf16.vlgmr.msrb.gmra.mxu1 %v11521_v52 }
 0x359   :  { %7093 = vmatpush.bf16.msra.mxu0 %v11045_v55  ;;  %7106 = vmatpush.bf16.msra.mxu1 %v11053_v61  ;;  %v11070_v55 = vld [vmem:[#allocation8 + $0x900] sm:$0xff] }
 0x35a   :  { %5862 = vmatmul.bf16.vlgmr.msrb.gmra.mxu2 %v11521_v52  ;;  %5875 = vmatmul.bf16.vlgmr.msrb.gmra.mxu3 %v11521_v52  ;;  %v11066_v52 = vld [vmem:[#allocation8 + $0x8e0] sm:$0xff] }
 0x35b   :  { %7119 = vmatpush.bf16.msra.mxu2 %v11061_v26  ;;  %7132 = vmatpush.bf16.msra.mxu3 %v11069_v16  ;;  %v11078_v61 = vld [vmem:[#allocation8 + $0x940] sm:$0xff]  ;;  %v5896_v16 = vld [vmem:[#allocation1 + $0x1b] sm:$0xff] }
 0x35c   :  { %v5895_v26 = vld [vmem:[#allocation1 + $0x12] sm:$0xff] }
 0x35d   :  { %7094 = vmatpush.bf16.msra.mxu0 %v11044_v58  ;;  %7107 = vmatpush.bf16.msra.mxu1 %v11052_v62  ;;  %v5897_v58 = vld [vmem:[#allocation1 + $0x24] sm:$0xff]  ;;  %v5911_v62 = vpack.i.b16 %v5893_v49, %v5893_v49 }
 0x35f   :  { %7120 = vmatpush.bf16.msra.mxu2 %v11060_v59  ;;  %7133 = vmatpush.bf16.msra.mxu3 %v11068_v28  ;;  %v5914_v59 = vpack.i.b16 %v5894_v54, %v5894_v54  ;;  %v5898_v28 = vld [vmem:[#allocation1 + $0x2d] sm:$0xff]  ;;  %v11107_v54 = vld [vmem:[#allocation8 + $0xa28] sm:$0xff] }
 0x361   :  { %7095 = vmatpush.bf16.msra.mxu0 %v11043_v60  ;;  %7108 = vmatpush.bf16.msra.mxu1 %v11051_v0  ;;  %v11086_v60 = vld [vmem:[#allocation8 + $0x980] sm:$0xff] }
 0x362   :  { %v11094_v0 = vld [vmem:[#allocation8 + $0x9c0] sm:$0xff] }
 0x363   :  { %7121 = vmatpush.bf16.msra.mxu2 %v11059_v1  ;;  %7134 = vmatpush.bf16.msra.mxu3 %v11067_v2  ;;  %v11542_v1 = vld [vmem:[#allocation1 + $0x36] sm:$0xff]  ;;  %v11544_v2 = vld [vmem:[#allocation1 + $0x3f] sm:$0xff] }
 0x365   :  { %7096 = vmatpush.bf16.msra.mxu0 %v11042_v6  ;;  %7109 = vmatpush.bf16.msra.mxu1 %v11050_v3  ;;  %v9885_v6 = vld [vmem:[%s11560_s3 + $0x28] sm:$0xff]  ;;  %v5913_v3 = vperm.slane %v5911_v62, 0  ;;  %s11343_s3 = smov [#allocation11]  }
 0x366   :  { %5902 = vst [vmem:[#allocation1] ss:$9 sm:$0xff] %v9885_v6  ;;  %v11106_v6 = vld [vmem:[#allocation8 + $0xa20] sm:$0xff]  ;;  %s7308_s10 = sshll.u32 %s11343_s3, 4  ;;  %s7309_s10 = int_to_ptr.vmem [resolvable:$true] %s7308_s10 }
 0x367   :  { %7122 = vmatpush.bf16.msra.mxu2 %v11058_v7  ;;  %7135 = vmatpush.bf16.msra.mxu3 %v11066_v52  ;;  %v5916_v7 = vperm.slane %v5914_v59, 0 }
 0x369   :  { %7097 = vmatpush.bf16.msra.mxu0 %v11041_v8  ;;  %7110 = vmatpush.bf16.msra.mxu1 %v11049_v9  ;;  %v5917_v9 = vpack.i.b16 %v5895_v26, %v5895_v26 }
 0x36b   :  { %7123 = vmatpush.bf16.msra.mxu2 %v11057_v29  ;;  %7136 = vmatpush.bf16.msra.mxu3 %v11065_v10  ;;  %v5920_v29 = vpack.i.b16 %v5896_v16, %v5896_v16 }
 0x36d   :  { %7098 = vmatpush.bf16.msra.mxu0 %v11040_v11  ;;  %7111 = vmatpush.bf16.msra.mxu1 %v11048_v14  ;;  %v5975_v11 = vunpack.c.l.bf16 %v5913_v3  ;;  %v5976_v14 = vunpack.c.l.bf16 %v5916_v7  ;;  %v11114_v3 = vld [vmem:[#allocation8 + $0xa60] sm:$0xff] }
 0x36f   :  { %7124 = vmatpush.bf16.msra.mxu2 %v11056_v4  ;;  %7137 = vmatpush.bf16.msra.mxu3 %v11064_v13 }
 0x371   :  { %7099 = vmatpush.bf16.msra.mxu0 %v11039_v12  ;;  %7112 = vmatpush.bf16.msra.mxu1 %v11047_v19  ;;  %v5919_v12 = vperm.slane %v5917_v9, 0  ;;  %v5922_v19 = vperm.slane %v5920_v29, 0 }
 0x373   :  { %7125 = vmatpush.bf16.msra.mxu2 %v11055_v20  ;;  %7138 = vmatpush.bf16.msra.mxu3 %v11063_v40 }
 0x375   :  { %7100 = vmatpush.bf16.msra.mxu0 %v11038_v21  ;;  %7113 = vmatpush.bf16.msra.mxu1 %v11046_v22 }
 0x377   :  { %7126 = vmatpush.bf16.msra.mxu2 %v11054_v25  ;;  %7139 = vmatpush.bf16.msra.mxu3 %v11062_v27  ;;  %v5977_v25 = vunpack.c.l.bf16 %v5919_v12  ;;  %v5978_v27 = vunpack.c.l.bf16 %v5922_v19 }
 0x379   :  { %7145 = vmatpush.bf16.msrb.mxu0 %v11077_v23  ;;  %7158 = vmatpush.bf16.msrb.mxu1 %v11085_v24 }
 0x37b   :  { %7171 = vmatpush.bf16.msrb.mxu2 %v11093_v30  ;;  %7184 = vmatpush.bf16.msrb.mxu3 %v11101_v31 }
 0x37d   :  { %7146 = vmatpush.bf16.msrb.mxu0 %v11076_v32  ;;  %7159 = vmatpush.bf16.msrb.mxu1 %v11084_v33  ;;  %v11109_v32 = vld [vmem:[#allocation8 + $0xa38] sm:$0xff] }
 0x37e   :  { %v11117_v33 = vld [vmem:[#allocation8 + $0xa78] sm:$0xff] }
 0x37f   :  { %7172 = vmatpush.bf16.msrb.mxu2 %v11092_v56  ;;  %7185 = vmatpush.bf16.msrb.mxu3 %v11100_v34 }
 0x381   :  { %7147 = vmatpush.bf16.msrb.mxu0 %v11075_v35  ;;  %7160 = vmatpush.bf16.msrb.mxu1 %v11083_v36  ;;  %v5923_v35 = vpack.i.b16 %v5897_v58, %v5897_v58  ;;  %v5926_v36 = vpack.i.b16 %v5898_v28, %v5898_v28  ;;  %v11124_v28 = vld [vmem:[#allocation8 + $0xab0] sm:$0xff] }
 0x383   :  { %7173 = vmatpush.bf16.msrb.mxu2 %v11091_v5  ;;  %7186 = vmatpush.bf16.msrb.mxu3 %v11099_v41 }
 0x385   :  { %7148 = vmatpush.bf16.msrb.mxu0 %v11074_v37  ;;  %7161 = vmatpush.bf16.msrb.mxu1 %v11082_v38 }
 0x387   :  { %7174 = vmatpush.bf16.msrb.mxu2 %v11090_v39  ;;  %7187 = vmatpush.bf16.msrb.mxu3 %v11098_v42  ;;  %v11108_v39 = vld [vmem:[#allocation8 + $0xa30] sm:$0xff] }
 0x388   :  { %v11116_v42 = vld [vmem:[#allocation8 + $0xa70] sm:$0xff] }
 0x389   :  { %7149 = vmatpush.bf16.msrb.mxu0 %v11073_v43  ;;  %7162 = vmatpush.bf16.msrb.mxu1 %v11081_v51  ;;  %v5925_v43 = vperm.slane %v5923_v35, 0  ;;  %v5928_v51 = vperm.slane %v5926_v36, 0  ;;  %v11112_v35 = vld [vmem:[#allocation8 + $0xa50] sm:$0xff] }
 0x38b   :  { %7175 = vmatpush.bf16.msrb.mxu2 %v11089_v57  ;;  %7188 = vmatpush.bf16.msrb.mxu3 %v11097_v44  ;;  %v5979_v16 = vunpack.c.l.bf16 %v5925_v43  ;;  %v5980_v58 = vunpack.c.l.bf16 %v5928_v51  ;;  %v11129_v43 = vld [vmem:[#allocation8 + $0xad8] sm:$0xff]  ;;  %v5905_v51 = vld [vmem:[#allocation1 + $0x12] sm:$0xff] }
 0x38d   :  { %7150 = vmatpush.bf16.msrb.mxu0 %v11072_v45  ;;  %7163 = vmatpush.bf16.msrb.mxu1 %v11080_v46 }
 0x38f   :  { %7176 = vmatpush.bf16.msrb.mxu2 %v11088_v47  ;;  %7189 = vmatpush.bf16.msrb.mxu3 %v11096_v48  ;;  %v11125_v47 = vld [vmem:[#allocation8 + $0xab8] sm:$0xff] }
 0x390   :  { %v11133_v48 = vld [vmem:[#allocation8 + $0xaf8] sm:$0xff] }
 0x391   :  { %7151 = vmatpush.bf16.msrb.mxu0 %v11071_v15  ;;  %7164 = vmatpush.bf16.msrb.mxu1 %v11079_v17  ;;  %v5929_v15 = vpack.i.b16 %v11542_v1, %v11542_v1 }
 0x393   :  { %7177 = vmatpush.bf16.msrb.mxu2 %v11087_v18  ;;  %7190 = vmatpush.bf16.msrb.mxu3 %v11095_v53 }
 0x394   :  { %v5681_v52 = vpop.f32.mrf.mxu0  ;;  %v5694_v8 = vpop.f32.mrf.mxu1 }
 0x395   :  { %7152 = vmatpush.bf16.msrb.mxu0 %v11070_v55  ;;  %7165 = vmatpush.bf16.msrb.mxu1 %v11078_v61  ;;  %v5880_v10 = vpack.c.bf16 %v5694_v8, %v5681_v52  ;;  %v11115_v55 = vld [vmem:[#allocation8 + $0xa68] sm:$0xff]  ;;  %v5932_v61 = vpack.i.b16 %v11544_v2, %v11544_v2 }
 0x397   :  { %7178 = vmatpush.bf16.msrb.mxu2 %v11086_v60  ;;  %7191 = vmatpush.bf16.msrb.mxu3 %v11094_v0  ;;  %v5959_v4 = vunpack.c.l.bf16 %v5880_v10  ;;  %v5960_v13 = vunpack.c.h.bf16 %v5880_v10  ;;  %v11132_v60 = vld [vmem:[#allocation8 + $0xaf0] sm:$0xff]  ;;  %v5931_v0 = vperm.slane %v5929_v15, 0  ;;  %v5934_v1 = vperm.slane %v5932_v61, 0  ;;  %v11123_v10 = vld [vmem:[#allocation8 + $0xaa8] sm:$0xff] }
 0x398   :  { %v11128_v61 = vld [vmem:[#allocation8 + $0xad0] sm:$0xff] }
 0x399   :  { %v5991_v20 = vadd.f32 %v5975_v11, %v5959_v4  ;;  %v5992_v40 = vadd.f32 %v5976_v14, %v5960_v13  ;;  %v11131_v11 = vld [vmem:[#allocation8 + $0xae8] sm:$0xff]  ;;  %v5981_v4 = vunpack.c.l.bf16 %v5931_v0  ;;  %v5982_v13 = vunpack.c.l.bf16 %v5934_v1  ;;  %v11149_v0 = vld [vmem:[#allocation8 + $0xb78] sm:$0xff] }
 0x39b   :  { %v6031_v21 = vmax.f32 %v5991_v20, 0.0  ;;  %v6032_v22 = vmax.f32 %v5992_v40, 0.0  ;;  %v5707_v23 = vpop.f32.mrf.mxu2  ;;  %v5720_v24 = vpop.f32.mrf.mxu3  ;;  %v5903_v20 = vld [vmem:[#allocation1] sm:$0xff]  ;;  %v5904_v40 = vld [vmem:[#allocation1 + $0x9] sm:$0xff] }
 0x39c   :  { %v5881_v63 = vpack.c.bf16 %v5720_v24, %v5707_v23  ;;  %v5683_v30 = vpop.f32.mrf.mxu0  ;;  %v5696_v31 = vpop.f32.mrf.mxu1  ;;  %v11105_v23 = vld [vmem:[#allocation8 + $0xa18] sm:$0xff] }
 0x39d   :  { %v6047_v56 = vpack.c.bf16 %v6031_v21, %v6031_v21  ;;  %v6048_v34 = vpack.c.bf16 %v6032_v22, %v6032_v22  ;;  %v11113_v24 = vld [vmem:[#allocation8 + $0xa58] sm:$0xff]  ;;  %v11130_v30 = vld [vmem:[#allocation8 + $0xae0] sm:$0xff]  ;;  %v5935_v31 = vpack.i.b16 %v5903_v20, %v5903_v20 }
 0x39e   :  { %v5961_v5 = vunpack.c.l.bf16 %v5881_v63  ;;  %v5962_v41 = vunpack.c.h.bf16 %v5881_v63 }
 0x39f   :  { %7101 = vmatmul.bf16.vlgmr.msra.gmra.mxu0 %v6047_v56  ;;  %7114 = vmatmul.bf16.vlgmr.msra.gmra.mxu1 %v6048_v34  ;;  %v11104_v34 = vld [vmem:[#allocation8 + $0xa10] sm:$0xff] }
 0x3a0   :  { %v5993_v37 = vadd.f32 %v5977_v25, %v5961_v5  ;;  %v5994_v38 = vadd.f32 %v5978_v27, %v5962_v41  ;;  %7197 = vmatpush.bf16.msra.mxu0 %v11109_v32  ;;  %7210 = vmatpush.bf16.msra.mxu1 %v11117_v33  ;;  %v11122_v27 = vld [vmem:[#allocation8 + $0xaa0] sm:$0xff]  ;;  %v5938_v32 = vpack.i.b16 %v5904_v40, %v5904_v40  ;;  %v11121_v41 = vld [vmem:[#allocation8 + $0xa98] sm:$0xff] }
 0x3a1   :  { %v11118_v40 = vld [vmem:[#allocation8 + $0xa80] sm:$0xff] }
 0x3a2   :  { %v6033_v57 = vmax.f32 %v5993_v37, 0.0  ;;  %v6034_v44 = vmax.f32 %v5994_v38, 0.0 }
 0x3a3   :  { %v5709_v45 = vpop.f32.mrf.mxu2  ;;  %v5722_v46 = vpop.f32.mrf.mxu3 }
 0x3a4   :  { %v6049_v17 = vpack.c.bf16 %v6033_v57, %v6033_v57  ;;  %v6050_v49 = vpack.c.bf16 %v6034_v44, %v6034_v44  ;;  %7198 = vmatpush.bf16.msra.mxu0 %v11108_v39  ;;  %7211 = vmatpush.bf16.msra.mxu1 %v11116_v42  ;;  %v5733_v18 = vpop.f32.mrf.mxu0  ;;  %v5746_v53 = vpop.f32.mrf.mxu1  ;;  %v5937_v39 = vperm.slane %v5935_v31, 0  ;;  %v5940_v42 = vperm.slane %v5938_v32, 0  ;;  %v5906_v57 = vld [vmem:[#allocation1 + $0x1b] sm:$0xff] }
 0x3a5   :  { %v5882_v26 = vpack.c.bf16 %v5746_v53, %v5733_v18  ;;  %v11103_v46 = vld [vmem:[#allocation8 + $0xa08] sm:$0xff] }
 0x3a6   :  { %7127 = vmatmul.bf16.vlgmr.msra.gmra.mxu2 %v6049_v17  ;;  %7140 = vmatmul.bf16.vlgmr.msra.gmra.mxu3 %v6050_v49  ;;  %v5941_v17 = vpack.i.b16 %v5905_v51, %v5905_v51  ;;  %v5944_v49 = vpack.i.b16 %v5906_v57, %v5906_v57  ;;  %v5983_v53 = vunpack.c.l.bf16 %v5937_v39  ;;  %v11147_v31 = vld [vmem:[#allocation8 + $0xb68] sm:$0xff]  ;;  %v5908_v51 = vld [vmem:[#allocation1 + $0x2d] sm:$0xff] }
 0x3a7   :  { %v5963_v62 = vunpack.c.l.bf16 %v5882_v26  ;;  %v5964_v59 = vunpack.c.h.bf16 %v5882_v26  ;;  %7223 = vmatpush.bf16.msra.mxu2 %v11125_v47  ;;  %7236 = vmatpush.bf16.msra.mxu3 %v11133_v48  ;;  %v11111_v47 = vld [vmem:[#allocation8 + $0xa48] sm:$0xff]  ;;  %v11137_v57 = vld [vmem:[#allocation8 + $0xb18] sm:$0xff] }
 0x3a8   :  { %7199 = vmatpush.bf16.msra.mxu0 %v11107_v54  ;;  %7212 = vmatpush.bf16.msra.mxu1 %v11115_v55  ;;  %v5984_v54 = vunpack.c.l.bf16 %v5940_v42  ;;  %v11120_v55 = vld [vmem:[#allocation8 + $0xa90] sm:$0xff]  ;;  %v11155_v39 = vld [vmem:[#allocation8 + $0xba8] sm:$0xff] }
 0x3a9   :  { %v5995_v7 = vadd.f32 %v5979_v16, %v5963_v62  ;;  %v5996_v52 = vadd.f32 %v5980_v58, %v5964_v59  ;;  %v11102_v58 = vld [vmem:[#allocation8 + $0xa00] sm:$0xff]  ;;  %v5943_v59 = vperm.slane %v5941_v17, 0  ;;  %v11163_v42 = vld [vmem:[#allocation8 + $0xbe8] sm:$0xff]  ;;  %v11144_v17 = vld [vmem:[#allocation8 + $0xb50] sm:$0xff] }
 0x3aa   :  { %v11110_v62 = vld [vmem:[#allocation8 + $0xa40] sm:$0xff] }
 0x3ab   :  { %v6035_v2 = vmax.f32 %v5995_v7, 0.0  ;;  %v6036_v8 = vmax.f32 %v5996_v52, 0.0  ;;  %7224 = vmatpush.bf16.msra.mxu2 %v11124_v28  ;;  %7237 = vmatpush.bf16.msra.mxu3 %v11132_v60  ;;  %v5759_v9 = vpop.f32.mrf.mxu2  ;;  %v5772_v29 = vpop.f32.mrf.mxu3  ;;  %v5946_v28 = vperm.slane %v5944_v49, 0  ;;  %v11141_v60 = vld [vmem:[#allocation8 + $0xb38] sm:$0xff]  ;;  %v11127_v7 = vld [vmem:[#allocation8 + $0xac8] sm:$0xff] }
 0x3ac   :  { %v5883_v14 = vpack.c.bf16 %v5772_v29, %v5759_v9  ;;  %7200 = vmatpush.bf16.msra.mxu0 %v11106_v6  ;;  %7213 = vmatpush.bf16.msra.mxu1 %v11114_v3  ;;  %v5735_v12 = vpop.f32.mrf.mxu0  ;;  %v5748_v19 = vpop.f32.mrf.mxu1  ;;  %v11119_v3 = vld [vmem:[#allocation8 + $0xa88] sm:$0xff] }
 0x3ad   :  { %v6051_v21 = vpack.c.bf16 %v6035_v2, %v6035_v2  ;;  %v6052_v22 = vpack.c.bf16 %v6036_v8, %v6036_v8  ;;  %v11148_v12 = vld [vmem:[#allocation8 + $0xb70] sm:$0xff] }
 0x3ae   :  { %v5965_v63 = vunpack.c.l.bf16 %v5883_v14  ;;  %v5966_v25 = vunpack.c.h.bf16 %v5883_v14 }
 0x3af   :  { %7225 = vmatpush.bf16.msra.mxu2 %v11123_v10  ;;  %7238 = vmatpush.bf16.msra.mxu3 %v11131_v11  ;;  %v5985_v10 = vunpack.c.l.bf16 %v5943_v59  ;;  %v5986_v11 = vunpack.c.l.bf16 %v5946_v28 }
 0x3b0   :  { %v5997_v33 = vadd.f32 %v5981_v4, %v5965_v63  ;;  %v5998_v56 = vadd.f32 %v5982_v13, %v5966_v25  ;;  %7153 = vmatmul.bf16.vlgmr.msrb.gmra.mxu0 %v6051_v21  ;;  %7166 = vmatmul.bf16.vlgmr.msrb.gmra.mxu1 %v6052_v22  ;;  %v11140_v13 = vld [vmem:[#allocation8 + $0xb30] sm:$0xff]  ;;  %v11126_v21 = vld [vmem:[#allocation8 + $0xac0] sm:$0xff]  ;;  %v11165_v63 = vld [vmem:[#allocation8 + $0xbf8] sm:$0xff] }
 0x3b1   :  { %7201 = vmatpush.bf16.msra.mxu0 %v11105_v23  ;;  %7214 = vmatpush.bf16.msra.mxu1 %v11113_v24  ;;  %v11157_v24 = vld [vmem:[#allocation8 + $0xbb8] sm:$0xff] }
 0x3b2   :  { %v6037_v36 = vmax.f32 %v5997_v33, 0.0  ;;  %v6038_v5 = vmax.f32 %v5998_v56, 0.0 }
 0x3b3   :  { %7226 = vmatpush.bf16.msra.mxu2 %v11122_v27  ;;  %7239 = vmatpush.bf16.msra.mxu3 %v11130_v30  ;;  %v5761_v37 = vpop.f32.mrf.mxu2  ;;  %v5774_v38 = vpop.f32.mrf.mxu3  ;;  %v11139_v30 = vld [vmem:[#allocation8 + $0xb28] sm:$0xff] }
 0x3b4   :  { %v6053_v44 = vpack.c.bf16 %v6037_v36, %v6037_v36  ;;  %v6054_v45 = vpack.c.bf16 %v6038_v5, %v6038_v5  ;;  %v11164_v36 = vld [vmem:[#allocation8 + $0xbf0] sm:$0xff]  ;;  %v11138_v37 = vld [vmem:[#allocation8 + $0xb20] sm:$0xff] }
 0x3b5   :  { %7202 = vmatpush.bf16.msra.mxu0 %v11104_v34  ;;  %7215 = vmatpush.bf16.msra.mxu1 %v11112_v35  ;;  %v5785_v48 = vpop.f32.mrf.mxu0  ;;  %v5798_v15 = vpop.f32.mrf.mxu1  ;;  %v11156_v35 = vld [vmem:[#allocation8 + $0xbb0] sm:$0xff]  ;;  %v11146_v38 = vld [vmem:[#allocation8 + $0xb60] sm:$0xff] }
 0x3b6   :  { %7179 = vmatmul.bf16.vlgmr.msrb.gmra.mxu2 %v6053_v44  ;;  %7192 = vmatmul.bf16.vlgmr.msrb.gmra.mxu3 %v6054_v45  ;;  %v5884_v18 = vpack.c.bf16 %v5798_v15, %v5785_v48  ;;  %v11145_v44 = vld [vmem:[#allocation8 + $0xb58] sm:$0xff]  ;;  %v11162_v48 = vld [vmem:[#allocation8 + $0xbe0] sm:$0xff]  ;;  %v11136_v15 = vld [vmem:[#allocation8 + $0xb10] sm:$0xff] }
 0x3b7   :  { %7227 = vmatpush.bf16.msra.mxu2 %v11121_v41  ;;  %7240 = vmatpush.bf16.msra.mxu3 %v11129_v43  ;;  %v5907_v43 = vld [vmem:[#allocation1 + $0x24] sm:$0xff] }
 0x3b8   :  { %v5967_v26 = vunpack.c.l.bf16 %v5884_v18  ;;  %v5968_v16 = vunpack.c.h.bf16 %v5884_v18  ;;  %v5947_v45 = vpack.i.b16 %v5907_v43, %v5907_v43 }
 0x3b9   :  { %7203 = vmatpush.bf16.msra.mxu0 %v11103_v46  ;;  %7216 = vmatpush.bf16.msra.mxu1 %v11111_v47  ;;  %v5950_v46 = vpack.i.b16 %v5908_v51, %v5908_v51  ;;  %v11154_v47 = vld [vmem:[#allocation8 + $0xba0] sm:$0xff] }
 0x3ba   :  { %v5999_v1 = vadd.f32 %v5983_v53, %v5967_v26  ;;  %v6000_v6 = vadd.f32 %v5984_v54, %v5968_v16  ;;  %v5949_v49 = vperm.slane %v5947_v45, 0  ;;  %v5909_v53 = vld [vmem:[#allocation1 + $0x36] sm:$0xff]  ;;  %v5910_v54 = vld [vmem:[#allocation1 + $0x3f] sm:$0xff] }
 0x3bb   :  { %7228 = vmatpush.bf16.msra.mxu2 %v11120_v55  ;;  %7241 = vmatpush.bf16.msra.mxu3 %v11128_v61  ;;  %v5952_v18 = vperm.slane %v5950_v46, 0  ;;  %v11153_v55 = vld [vmem:[#allocation8 + $0xb98] sm:$0xff]  ;;  %v11135_v26 = vld [vmem:[#allocation8 + $0xb08] sm:$0xff]  ;;  %v5953_v59 = vpack.i.b16 %v5909_v53, %v5909_v53  ;;  %v5956_v28 = vpack.i.b16 %v5910_v54, %v5910_v54 }
 0x3bc   :  { %v6039_v52 = vmax.f32 %v5999_v1, 0.0  ;;  %v6040_v2 = vmax.f32 %v6000_v6, 0.0  ;;  %v11161_v61 = vld [vmem:[#allocation8 + $0xbd8] sm:$0xff]  ;;  %v11143_v16 = vld [vmem:[#allocation8 + $0xb48] sm:$0xff]  ;;  %v11152_v6 = vld [vmem:[#allocation8 + $0xb90] sm:$0xff] }
 0x3bd   :  { %7204 = vmatpush.bf16.msra.mxu0 %v11102_v58  ;;  %7217 = vmatpush.bf16.msra.mxu1 %v11110_v62  ;;  %v5787_v14 = vpop.f32.mrf.mxu0  ;;  %v5800_v4 = vpop.f32.mrf.mxu1  ;;  %v5988_v1 = vunpack.c.l.bf16 %v5952_v18 }
 0x3be   :  { %v5811_v8 = vpop.f32.mrf.mxu2  ;;  %v5824_v9 = vpop.f32.mrf.mxu3  ;;  %v6055_v19 = vpack.c.bf16 %v6039_v52, %v6039_v52  ;;  %v6056_v20 = vpack.c.bf16 %v6040_v2, %v6040_v2  ;;  %v11134_v2 = vld [vmem:[#allocation8 + $0xb00] sm:$0xff]  ;;  %v11151_v14 = vld [vmem:[#allocation8 + $0xb88] sm:$0xff] }
 0x3bf   :  { %v5885_v29 = vpack.c.bf16 %v5824_v9, %v5811_v8  ;;  %7229 = vmatpush.bf16.msra.mxu2 %v11119_v3  ;;  %7242 = vmatpush.bf16.msra.mxu3 %v11127_v7  ;;  %v11160_v3 = vld [vmem:[#allocation8 + $0xbd0] sm:$0xff]  ;;  %v11142_v8 = vld [vmem:[#allocation8 + $0xb40] sm:$0xff]  ;;  %v5955_v9 = vperm.slane %v5953_v59, 0  ;;  %v11159_v4 = vld [vmem:[#allocation8 + $0xbc8] sm:$0xff] }
 0x3c0   :  { %7205 = vmatmul.bf16.vlgmr.msra.gmra.mxu0 %v6055_v19  ;;  %7218 = vmatmul.bf16.vlgmr.msra.gmra.mxu1 %v6056_v20 }
 0x3c1   :  { %7249 = vmatpush.bf16.msrb.mxu0 %v11141_v60  ;;  %7262 = vmatpush.bf16.msrb.mxu1 %v11149_v0  ;;  %v5969_v22 = vunpack.c.l.bf16 %v5885_v29  ;;  %v5970_v23 = vunpack.c.h.bf16 %v5885_v29  ;;  %v5987_v0 = vunpack.c.l.bf16 %v5949_v49  ;;  %v5958_v29 = vperm.slane %v5956_v28, 0 }
 0x3c3   :  { %v6001_v25 = vadd.f32 %v5985_v10, %v5969_v22  ;;  %v6002_v27 = vadd.f32 %v5986_v11, %v5970_v23  ;;  %7230 = vmatpush.bf16.msra.mxu2 %v11118_v40  ;;  %7243 = vmatpush.bf16.msra.mxu3 %v11126_v21  ;;  %v5989_v21 = vunpack.c.l.bf16 %v5955_v9  ;;  %v5990_v22 = vunpack.c.l.bf16 %v5958_v29 }
 0x3c5   :  { %7250 = vmatpush.bf16.msrb.mxu0 %v11140_v13  ;;  %7263 = vmatpush.bf16.msrb.mxu1 %v11148_v12  ;;  %v6041_v32 = vmax.f32 %v6001_v25, 0.0  ;;  %v6042_v33 = vmax.f32 %v6002_v27, 0.0 }
 0x3c6   :  { %v5813_v56 = vpop.f32.mrf.mxu2  ;;  %v5826_v34 = vpop.f32.mrf.mxu3 }
 0x3c7   :  { %7275 = vmatpush.bf16.msrb.mxu2 %v11157_v24  ;;  %7288 = vmatpush.bf16.msrb.mxu3 %v11165_v63  ;;  %v6057_v5 = vpack.c.bf16 %v6041_v32, %v6041_v32  ;;  %v6058_v41 = vpack.c.bf16 %v6042_v33, %v6042_v33  ;;  %v11158_v32 = vld [vmem:[#allocation8 + $0xbc0] sm:$0xff] }
 0x3c9   :  { %7251 = vmatpush.bf16.msrb.mxu0 %v11139_v30  ;;  %7264 = vmatpush.bf16.msrb.mxu1 %v11147_v31  ;;  %v11150_v31 = vld [vmem:[#allocation8 + $0xb80] sm:$0xff] }
 0x3ca   :  { %7231 = vmatmul.bf16.vlgmr.msra.gmra.mxu2 %v6057_v5  ;;  %7244 = vmatmul.bf16.vlgmr.msra.gmra.mxu3 %v6058_v41 }
 0x3cb   :  { %7276 = vmatpush.bf16.msrb.mxu2 %v11156_v35  ;;  %7289 = vmatpush.bf16.msrb.mxu3 %v11164_v36 }
 0x3cd   :  { %7252 = vmatpush.bf16.msrb.mxu0 %v11138_v37  ;;  %7265 = vmatpush.bf16.msrb.mxu1 %v11146_v38 }
 0x3cf   :  { %7277 = vmatpush.bf16.msrb.mxu2 %v11155_v39  ;;  %7290 = vmatpush.bf16.msrb.mxu3 %v11163_v42 }
 0x3d1   :  { %7253 = vmatpush.bf16.msrb.mxu0 %v11137_v57  ;;  %7266 = vmatpush.bf16.msrb.mxu1 %v11145_v44 }
 0x3d3   :  { %7278 = vmatpush.bf16.msrb.mxu2 %v11154_v47  ;;  %7291 = vmatpush.bf16.msrb.mxu3 %v11162_v48 }
 0x3d5   :  { %7254 = vmatpush.bf16.msrb.mxu0 %v11136_v15  ;;  %7267 = vmatpush.bf16.msrb.mxu1 %v11144_v17  ;;  %v5837_v58 = vpop.f32.mrf.mxu0  ;;  %v5850_v62 = vpop.f32.mrf.mxu1  ;;  %v11180_v17 = vld [vmem:[#allocation10 + $0x2] ss:$0 sm:$0xff] }
 0x3d6   :  { %v5886_v60 = vpack.c.bf16 %v5850_v62, %v5837_v58 }
 0x3d7   :  { %7279 = vmatpush.bf16.msrb.mxu2 %v11153_v55  ;;  %7292 = vmatpush.bf16.msrb.mxu3 %v11161_v61 }
 0x3d8   :  { %v5971_v7 = vunpack.c.l.bf16 %v5886_v60  ;;  %v5972_v52 = vunpack.c.h.bf16 %v5886_v60 }
 0x3d9   :  { %7255 = vmatpush.bf16.msrb.mxu0 %v11135_v26  ;;  %7268 = vmatpush.bf16.msrb.mxu1 %v11143_v16 }
 0x3da   :  { %v6003_v10 = vadd.f32 %v5987_v0, %v5971_v7  ;;  %v6004_v11 = vadd.f32 %v5988_v1, %v5972_v52 }
 0x3db   :  { %7280 = vmatpush.bf16.msrb.mxu2 %v11152_v6  ;;  %7293 = vmatpush.bf16.msrb.mxu3 %v11160_v3 }
 0x3dc   :  { %v6043_v13 = vmax.f32 %v6003_v10, 0.0  ;;  %v6044_v12 = vmax.f32 %v6004_v11, 0.0 }
 0x3dd   :  { %v5863_v19 = vpop.f32.mrf.mxu2  ;;  %v5876_v20 = vpop.f32.mrf.mxu3  ;;  %7256 = vmatpush.bf16.msrb.mxu0 %v11134_v2  ;;  %7269 = vmatpush.bf16.msrb.mxu1 %v11142_v8 }
 0x3de   :  { %v5887_v40 = vpack.c.bf16 %v5876_v20, %v5863_v19  ;;  %v5839_v23 = vpop.f32.mrf.mxu0  ;;  %v5852_v24 = vpop.f32.mrf.mxu1  ;;  %v6059_v63 = vpack.c.bf16 %v6043_v13, %v6043_v13  ;;  %v6060_v25 = vpack.c.bf16 %v6044_v12, %v6044_v12 }
 0x3df   :  { %7281 = vmatpush.bf16.msrb.mxu2 %v11151_v14  ;;  %7294 = vmatpush.bf16.msrb.mxu3 %v11159_v4 }
 0x3e0   :  { %v5973_v27 = vunpack.c.l.bf16 %v5887_v40  ;;  %v5974_v30 = vunpack.c.h.bf16 %v5887_v40  ;;  %7257 = vmatmul.bf16.vlgmr.msrb.gmra.mxu0 %v6059_v63  ;;  %7270 = vmatmul.bf16.vlgmr.msrb.gmra.mxu1 %v6060_v25 }
 0x3e2   :  { %v6005_v33 = vadd.f32 %v5989_v21, %v5973_v27  ;;  %v6006_v56 = vadd.f32 %v5990_v22, %v5974_v30 }
 0x3e3   :  { %7282 = vmatpush.bf16.msrb.mxu2 %v11150_v31  ;;  %7295 = vmatpush.bf16.msrb.mxu3 %v11158_v32 }
 0x3e4   :  { %v6045_v34 = vmax.f32 %v6005_v33, 0.0  ;;  %v6046_v35 = vmax.f32 %v6006_v56, 0.0 }
 0x3e5   :  { %v5865_v36 = vpop.f32.mrf.mxu2  ;;  %v5878_v5 = vpop.f32.mrf.mxu3 }
 0x3e6   :  { %v6061_v41 = vpack.c.bf16 %v6045_v34, %v6045_v34  ;;  %v6062_v37 = vpack.c.bf16 %v6046_v35, %v6046_v35 }
 0x3e8   :  { %7283 = vmatmul.bf16.vlgmr.msrb.gmra.mxu2 %v6061_v41  ;;  %7296 = vmatmul.bf16.vlgmr.msrb.gmra.mxu3 %v6062_v37 }
 0x41c   :  { %v7102_v38 = vpop.f32.mrf.mxu0  ;;  %v7115_v39 = vpop.f32.mrf.mxu1 }
 0x41d   :  { %v7103_v53 = vadd.f32 %v11180_v17, %v7102_v38 }
 0x41f   :  { %v7116_v61 = vadd.f32 %v7115_v39, %v7103_v53 }
 0x424   :  { %v7104_v42 = vpop.f32.mrf.mxu0  ;;  %v7117_v43 = vpop.f32.mrf.mxu1 }
 0x429   :  { %v7128_v51 = vpop.f32.mrf.mxu2  ;;  %v7141_v57 = vpop.f32.mrf.mxu3 }
 0x42a   :  { %v7129_v26 = vadd.f32 %v7128_v51, %v7116_v61 }
 0x42c   :  { %v7142_v62 = vadd.f32 %v7141_v57, %v7129_v26 }
 0x42d   :  { %v7154_v44 = vpop.f32.mrf.mxu0  ;;  %v7167_v45 = vpop.f32.mrf.mxu1 }
 0x42e   :  { %v7155_v60 = vadd.f32 %v7154_v44, %v7142_v62 }
 0x430   :  { %v7168_v6 = vadd.f32 %v7167_v45, %v7155_v60 }
 0x431   :  { %v7130_v46 = vpop.f32.mrf.mxu2  ;;  %v7143_v47 = vpop.f32.mrf.mxu3 }
 0x435   :  { %v7156_v48 = vpop.f32.mrf.mxu0  ;;  %v7169_v15 = vpop.f32.mrf.mxu1 }
 0x439   :  { %v7180_v49 = vpop.f32.mrf.mxu2  ;;  %v7193_v18 = vpop.f32.mrf.mxu3 }
 0x43a   :  { %v7181_v3 = vadd.f32 %v7180_v49, %v7168_v6 }
 0x43c   :  { %v7194_v7 = vadd.f32 %v7193_v18, %v7181_v3 }
 0x43d   :  { %v7206_v54 = vpop.f32.mrf.mxu0  ;;  %v7219_v55 = vpop.f32.mrf.mxu1 }
 0x43e   :  { %v7207_v8 = vadd.f32 %v7206_v54, %v7194_v7 }
 0x440   :  { %v7220_v9 = vadd.f32 %v7219_v55, %v7207_v8 }
 0x441   :  { %v7182_v16 = vpop.f32.mrf.mxu2  ;;  %v7195_v58 = vpop.f32.mrf.mxu3 }
 0x445   :  { %v7208_v59 = vpop.f32.mrf.mxu0  ;;  %v7221_v28 = vpop.f32.mrf.mxu1 }
 0x44d   :  { %v7232_v0 = vpop.f32.mrf.mxu2  ;;  %v7245_v1 = vpop.f32.mrf.mxu3 }
 0x44e   :  { %v7233_v11 = vadd.f32 %v7232_v0, %v7220_v9 }
 0x450   :  { %v7246_v14 = vadd.f32 %v7245_v1, %v7233_v11 }
 0x455   :  { %v7234_v52 = vpop.f32.mrf.mxu2  ;;  %v7247_v2 = vpop.f32.mrf.mxu3 }
 0x45d   :  { %v7258_v29 = vpop.f32.mrf.mxu0  ;;  %v7271_v10 = vpop.f32.mrf.mxu1 }
 0x45e   :  { %v7259_v4 = vadd.f32 %v7258_v29, %v7246_v14 }
 0x460   :  { %v7272_v19 = vadd.f32 %v7271_v10, %v7259_v4 }
 0x465   :  { %v7260_v13 = vpop.f32.mrf.mxu0  ;;  %v7273_v12 = vpop.f32.mrf.mxu1 }
 0x46b   :  { %v7284_v20 = vpop.f32.mrf.mxu2  ;;  %v7297_v40 = vpop.f32.mrf.mxu3 }
 0x46c   :  { %v7285_v21 = vadd.f32 %v7284_v20, %v7272_v19 }
 0x46e   :  { %v7298_v22 = vadd.f32 %v7297_v40, %v7285_v21 }
 0x470   :  { %v7301_v23 = vadd.f32 %v7298_v22, %v11517_v50 }
 0x472   :  { %7302 = vst [vmem:[#allocation11] sm:$0xff] %v7301_v23 }
 0x473   :  { %v7286_v24 = vpop.f32.mrf.mxu2  ;;  %v7299_v63 = vpop.f32.mrf.mxu3  ;;  %7313 = dma.vmem_to_hbm [thread:$0]  %s7309_s10, 128, %s7311_s12, [#allocation4]  }
 0x474   :  { %11331 = dma.done.wait [#allocation4], 128  }
 0x475   :  { %11332 = vsyncadd [#allocation4], 4294967168 }
 0x476   :  { %7318 = vsyncpa [#allocation3], 1 }
 0x477   :  { %7319 = vsyncpa [#allocation6], 1 }
 0x478   :  { %7320 = vsyncpa [#allocation9], 1 }
 0x479   :  { %7321 = vsyncpa [#allocation4], 1 }

</bundles_post_ra>
